<compile_context>
chip_gen: v5e
topology: v5e:2x2
jax: 0.10.0
libtpu: 0.0.40
codegen_flags: <defaults>
</compile_context>

<pallas_src>
import jax
import jax.numpy as jnp
from jax.experimental import pallas as pl
from jax.experimental.pallas import tpu as pltpu

EPS = 1e-5       # nn.BatchNorm2d default eps
SLOPE = 0.2      # leaky_relu negative slope


def _tpu_defaults():
    """(tile_target_bytes, max_tm, vmem_limit_bytes) per TPU generation."""
    try:
        kind = jax.devices()[0].device_kind.lower()
    except Exception:
        kind = ""
    if "v5" in kind or "v6" in kind:
        # 128 MiB physical VMEM: bigger tiles amortize per-step overhead.
        return 16 << 20, 4096, 64 << 20
    # v7x (64 MiB physical VMEM per core) and unknown chips: conservative.
    return 8 << 20, 2048, 48 << 20


TILE_TARGET_BYTES, MAX_TM, VMEM_LIMIT = _tpu_defaults()


def _params():
    return pltpu.CompilerParams(dimension_semantics=("parallel",),
                                vmem_limit_bytes=VMEM_LIMIT)


def _choose_tm(m, bytes_per_row):
    """Largest row-tile that divides m, fits the byte budget, keeps grid>=2."""
    cap = min(MAX_TM, max(128, TILE_TARGET_BYTES // max(int(bytes_per_row), 1)))
    if m >= 256:
        cap = min(cap, m // 2)          # >=2 grid steps -> megacore gets work
    if m <= cap:
        return m
    for align in (256, 128, 16, 8):
        start = (cap // align) * align
        for tm in range(start, 0, -align):
            if m % tm == 0:
                return tm
    # Correctness guard (review): never fall back to a full-M block that can
    # exceed the VMEM budget -- take the largest divisor under the cap.
    for tm in range(min(cap, m), 0, -1):
        if m % tm == 0:
            return tm
    return 1


# ---------------------------------------------------------------------------
# Pallas kernels
# ---------------------------------------------------------------------------
def matmul_lrelu_kernel(p_ref, w_ref, o_ref):
    # p_ref: (TM, K) bf16 im2col rows   w_ref: (K, Cout) bf16
    y = jnp.dot(p_ref[...], w_ref[...], preferred_element_type=jnp.float32)
    o_ref[...] = jnp.maximum(y, SLOPE * y).astype(o_ref.dtype)


def fused_conv_kernel(x_ref, w_ref, y_ref, stats_ref):
    # x_ref: (TN, RH, RW, 4C) bf16 -- zero-padded, space-to-depth packed input
    #        (RH = OH+1, RW = OW+1, feature order = (r2, c2, cin)).
    # w_ref: (2, 2, 4C, Cout) bf16 -- 4x4 kernel regrouped by (dh, dw).
    # A 4x4 / stride-2 / pad-1 conv == sum over (dh, dw) of box-slice matmuls.
    tn, rh, rw, feat = x_ref.shape
    oh, ow = rh - 1, rw - 1
    cout = w_ref.shape[-1]
    m = tn * oh * ow
    acc = None
    for dh in range(2):
        for dw in range(2):
            patch = x_ref[:, dh:dh + oh, dw:dw + ow, :].reshape(m, feat)
            term = jnp.dot(patch, w_ref[dh, dw],
                           preferred_element_type=jnp.float32)
            acc = term if acc is None else acc + term
    # Per-tile training-BN partials, written row-by-row (no concatenate).
    stats_ref[0, 0:1, :] = jnp.sum(acc, axis=0, keepdims=True)
    stats_ref[0, 1:2, :] = jnp.sum(acc * acc, axis=0, keepdims=True)
    y_ref[...] = acc.reshape(tn, oh, ow, cout).astype(y_ref.dtype)


# ---------------------------------------------------------------------------
# pallas_call wrappers
# ---------------------------------------------------------------------------
def matmul_lrelu(patches, wmat):
    m, k = patches.shape
    cout = wmat.shape[1]
    # bf16 in/out double-buffered + f32 accumulator (review: fixed byte model).
    tm = _choose_tm(m, 2 * (2 * k + 2 * cout) + 4 * cout)
    return pl.pallas_call(
        matmul_lrelu_kernel,
        out_shape=jax.ShapeDtypeStruct((m, cout), jnp.bfloat16),
        grid_spec=pltpu.PrefetchScalarGridSpec(
            num_scalar_prefetch=0,
            grid=(m // tm,),
            in_specs=[pl.BlockSpec((tm, k), lambda i: (i, 0)),
                      pl.BlockSpec((k, cout), lambda i: (0, 0))],
            out_specs=pl.BlockSpec((tm, cout), lambda i: (i, 0)),
        ),
        compiler_params=_params(),
    )(patches, wmat)


def fused_conv(x_packed, w_arr):
    n, rh, rw, feat = x_packed.shape
    oh, ow = rh - 1, rw - 1
    cout = w_arr.shape[-1]
    per_img = (2 * rh * rw * feat * 2          # double-buffered bf16 input
               + 2 * oh * ow * cout * 2        # double-buffered bf16 output
               + oh * ow * cout * 4)           # f32 accumulator
    tn = max(1, min(n, TILE_TARGET_BYTES // max(per_img, 1)))
    if n >= 2:
        tn = min(tn, n // 2)                   # >=2 grid steps for megacore
    while n % tn:
        tn -= 1
    grid = n // tn
    return pl.pallas_call(
        fused_conv_kernel,
        out_shape=(jax.ShapeDtypeStruct((n, oh, ow, cout), jnp.bfloat16),
                   jax.ShapeDtypeStruct((grid, 2, cout), jnp.float32)),
        grid_spec=pltpu.PrefetchScalarGridSpec(
            num_scalar_prefetch=0,
            grid=(grid,),
            in_specs=[pl.BlockSpec((tn, rh, rw, feat), lambda i: (i, 0, 0, 0)),
                      pl.BlockSpec((2, 2, feat, cout), lambda i: (0, 0, 0, 0))],
            out_specs=(pl.BlockSpec((tn, oh, ow, cout), lambda i: (i, 0, 0, 0)),
                       pl.BlockSpec((1, 2, cout), lambda i: (i, 0, 0))),
        ),
        compiler_params=_params(),
    )(x_packed, w_arr)


# ---------------------------------------------------------------------------
# Plain-JAX glue (layout plumbing, fused by XLA)
# ---------------------------------------------------------------------------
def im2col(x_nhwc, k, stride, pad):
    n, h, w, c = x_nhwc.shape
    xp = jnp.pad(x_nhwc, ((0, 0), (pad, pad), (pad, pad), (0, 0)))
    oh = (h + 2 * pad - k) // stride + 1
    ow = (w + 2 * pad - k) // stride + 1
    cols = []
    for i in range(k):       # kh
        for j in range(k):   # kw
            cols.append(xp[:, i:i + stride * oh:stride, j:j + stride * ow:stride, :])
    patches = jnp.stack(cols, axis=-1)                  # (N, OH, OW, C, k*k)
    patches = patches.reshape(n * oh * ow, c * k * k)   # flat = ci*16 + kh*4 + kw
    return patches, oh, ow


def _wmat(w_oihw):
    cout = w_oihw.shape[0]
    return w_oihw.reshape(cout, -1).T.astype(jnp.bfloat16)   # (Cin*KH*KW, Cout)


def _pack_conv_weight(w_oihw):
    # OIHW 4x4 kernel -> (2, 2, 4*Cin, Cout) grouped by (dh, dw); feature order
    # (r2, c2, cin) matches act_pad_pack's packing.
    wt = jnp.transpose(w_oihw, (2, 3, 1, 0))                 # (kh, kw, ci, co)
    c, co = wt.shape[2], wt.shape[3]
    rows = []
    for dh in range(2):
        cols = []
        for dw in range(2):
            cols.append(wt[2 * dh:2 * dh + 2, 2 * dw:2 * dw + 2].reshape(4 * c, co))
        rows.append(jnp.stack(cols, axis=0))
    return jnp.stack(rows, axis=0).astype(jnp.bfloat16)      # (2, 2, 4C, Cout)


def act_pad_pack(y, scale=None, shift=None):
    # Optional training-mode BN affine + LeakyReLU (folded here instead of a
    # separate Pallas pass), then zero-pad by 1 and space-to-depth pack:
    # (N,H,W,C) -> (N,(H+2)/2,(W+2)/2,4C).  XLA fuses the elementwise with the
    # pad/pack, replacing both the old bn_lrelu kernel and the old im2col.
    if scale is not None:
        a = y.astype(jnp.float32) * scale + shift
        a = jnp.maximum(a, SLOPE * a).astype(jnp.bfloat16)
    else:
        a = y.astype(jnp.bfloat16)
    xp = jnp.pad(a, ((0, 0), (1, 1), (1, 1), (0, 0)))
    n, hp, wp, c = xp.shape
    x6 = xp.reshape(n, hp // 2, 2, wp // 2, 2, c)
    return jnp.transpose(x6, (0, 1, 3, 2, 4, 5)).reshape(n, hp // 2, wp // 2, 4 * c)


def bn_affine(stats, gamma, beta, m):
    # Exact training-mode BN over (N, OH, OW) from per-tile partial sums.
    total = jnp.sum(stats, axis=0)                        # (2, Cout) f32
    mean = total[0] / m
    var = jnp.maximum(total[1] / m - mean * mean, 0.0)    # biased batch variance
    scale = gamma * jax.lax.rsqrt(var + EPS)
    shift = beta - mean * scale
    return scale, shift


# ---------------------------------------------------------------------------
# Parameters (deterministic, DCGAN-style init)
# ---------------------------------------------------------------------------
def init_params(key, nc, ndf):
    ks = jax.random.split(key, 8)

    def conv_w(k, co, ci):
        return 0.02 * jax.random.normal(k, (co, ci, 4, 4), jnp.float32)

    return {
        "w1": conv_w(ks[0], ndf, nc),
        "w2": conv_w(ks[1], ndf * 2, ndf),
        "w3": conv_w(ks[2], ndf * 4, ndf * 2),
        "w4": conv_w(ks[3], ndf * 8, ndf * 4),
        "w5": conv_w(ks[4], 1, ndf * 8),
        "g2": 1.0 + 0.02 * jax.random.normal(ks[5], (ndf * 2,), jnp.float32),
        "b2": jnp.zeros((ndf * 2,), jnp.float32),
        "g3": 1.0 + 0.02 * jax.random.normal(ks[6], (ndf * 4,), jnp.float32),
        "b3": jnp.zeros((ndf * 4,), jnp.float32),
        "g4": 1.0 + 0.02 * jax.random.normal(ks[7], (ndf * 8,), jnp.float32),
        "b4": jnp.zeros((ndf * 8,), jnp.float32),
    }


def discriminator_forward(x_nchw, p):
    n = x_nchw.shape[0]
    x = jnp.transpose(x_nchw, (0, 2, 3, 1)).astype(jnp.bfloat16)   # NHWC bf16

    # conv1 + LeakyReLU: M-tiled im2col matmul (Cin=3 too narrow to fuse).
    patches, oh, ow = im2col(x, 4, 2, 1)
    a1 = matmul_lrelu(patches, _wmat(p["w1"])).reshape(n, oh, ow, p["w1"].shape[0])

    # conv2 (fused im2col) -> BN2 batch stats.
    y2, s2 = fused_conv(act_pad_pack(a1), _pack_conv_weight(p["w2"]))
    sc2, sh2 = bn_affine(s2, p["g2"], p["b2"], n * y2.shape[1] * y2.shape[2])

    # BN2 + lrelu folded into conv3's pad/pack; conv3 (fused) -> BN3 stats.
    y3, s3 = fused_conv(act_pad_pack(y2, sc2, sh2), _pack_conv_weight(p["w3"]))
    sc3, sh3 = bn_affine(s3, p["g3"], p["b3"], n * y3.shape[1] * y3.shape[2])

    # conv4 (fused) -> BN4 stats.
    y4, s4 = fused_conv(act_pad_pack(y3, sc3, sh3), _pack_conv_weight(p["w4"]))
    sc4, sh4 = bn_affine(s4, p["g4"], p["b4"], n * y4.shape[1] * y4.shape[2])

    # BN4 + lrelu + conv5 (4x4 valid on 4x4 map, Cout=1, M=N) + sigmoid:
    # degenerate matmul -> plain JAX (review item), f32 output.
    a4 = y4.astype(jnp.float32) * sc4 + sh4
    a4 = jnp.maximum(a4, SLOPE * a4)
    w5 = jnp.transpose(p["w5"], (2, 3, 1, 0)).reshape(-1, 1).astype(jnp.float32)
    out = jax.nn.sigmoid(a4.reshape(n, -1) @ w5)
    return out.reshape(n, 1, 1, 1).astype(jnp.float32)    # NCHW (N, 1, 1, 1)


if __name__ == "__main__":
    key = jax.random.PRNGKey(0)
    kx, kp = jax.random.split(key)

    N, nc, ndf = 2, 3, 8          # DCGAN needs 64x64 input for conv5's 4x4 valid
    x = jax.random.normal(kx, (N, nc, 64, 64), jnp.float32)
    params = init_params(kp, nc, ndf)

    out = jax.jit(discriminator_forward)(x, params)
    jax.block_until_ready(out)

    assert out.shape == (N, 1, 1, 1), out.shape
    assert bool(jnp.all((out >= 0.0) & (out <= 1.0)))     # sigmoid range sanity
    print("KERNEL_OK")
</pallas_src>

<mosaic_0001>
module attributes {stable_mosaic.version = 11 : i64} {
  func.func @matmul_lrelu_kernel(%arg0: i32, %arg1: memref<1024x48xbf16, #tpu.memory_space<vmem>>, %arg2: memref<48x8xbf16, #tpu.memory_space<vmem>>, %arg3: memref<1024x8xbf16, #tpu.memory_space<vmem>>) attributes {dimension_semantics = [#tpu.dimension_semantics<parallel>], iteration_bounds = array<i64: 2>, scalar_prefetch = 0 : i64, scratch_operands = 0 : i64, tpu.core_type = #tpu.core_type<tc>, window_params = [{transform_indices = @transform_0, window_bounds = array<i64: 1024, 48>}, {pipeline_mode = #tpu.pipeline_mode<synchronous>, transform_indices = @transform_1, window_bounds = array<i64: 48, 8>}, {transform_indices = @transform_2, window_bounds = array<i64: 1024, 8>}]} {
    %c0 = arith.constant 0 : index
    %c0_0 = arith.constant 0 : index
    %0 = vector.load %arg1[%c0, %c0_0] : memref<1024x48xbf16, #tpu.memory_space<vmem>>, vector<1024x48xbf16>
    %c0_1 = arith.constant 0 : index
    %c0_2 = arith.constant 0 : index
    %1 = vector.load %arg2[%c0_1, %c0_2] : memref<48x8xbf16, #tpu.memory_space<vmem>>, vector<48x8xbf16>
    %cst = arith.constant dense<0.000000e+00> : vector<1024x8xf32>
    %2 = tpu.matmul %0, %1, %cst {dimension_numbers = #tpu.dot_dimension_numbers<[1], [0], [0], [1], [0, 0, 1, 1], [], []>} : vector<1024x48xbf16>, vector<48x8xbf16>, vector<1024x8xf32> -> vector<1024x8xf32>
    %cst_3 = arith.constant 2.000000e-01 : f32
    %3 = vector.broadcast %cst_3 : f32 to vector<1024x8xf32>
    %4 = arith.mulf %3, %2 : vector<1024x8xf32>
    %5 = arith.maximumf %2, %4 : vector<1024x8xf32>
    %6 = arith.truncf %5 : vector<1024x8xf32> to vector<1024x8xbf16>
    %c0_4 = arith.constant 0 : index
    %c0_5 = arith.constant 0 : index
    %7 = vector.load %arg3[%c0_4, %c0_5] : memref<1024x8xbf16, #tpu.memory_space<vmem>>, vector<1024x8xbf16>
    tpu.vector_store %arg3[%c0_4, %c0_5], %6 {strides = array<i32>} : memref<1024x8xbf16, #tpu.memory_space<vmem>>, vector<1024x8xbf16>,
    return
  }
  func.func @transform_0(%arg0: i32) -> (i32, i32) {
    %c0_i32 = arith.constant 0 : i32
    %c0_i32_0 = arith.constant 0 : i32
    return %arg0, %c0_i32 : i32, i32
  }
  func.func @transform_1(%arg0: i32) -> (i32, i32) {
    %c0_i32 = arith.constant 0 : i32
    %c0_i32_0 = arith.constant 0 : i32
    %c0_i32_1 = arith.constant 0 : i32
    return %c0_i32, %c0_i32_0 : i32, i32
  }
  func.func @transform_2(%arg0: i32) -> (i32, i32) {
    %c0_i32 = arith.constant 0 : i32
    %c0_i32_0 = arith.constant 0 : i32
    return %arg0, %c0_i32 : i32, i32
  }
}

module attributes {stable_mosaic.version = 11 : i64} {
  func.func @fused_conv_kernel(%arg0: i32, %arg1: memref<1x17x17x32xbf16, #tpu.memory_space<vmem>>, %arg2: memref<2x2x32x16xbf16, #tpu.memory_space<vmem>>, %arg3: memref<1x16x16x16xbf16, #tpu.memory_space<vmem>>, %arg4: memref<1x2x16xf32, #tpu.memory_space<vmem>>) attributes {dimension_semantics = [#tpu.dimension_semantics<parallel>], iteration_bounds = array<i64: 2>, scalar_prefetch = 0 : i64, scratch_operands = 0 : i64, tpu.core_type = #tpu.core_type<tc>, window_params = [{transform_indices = @transform_0, window_bounds = array<i64: 1, 17, 17, 32>}, {pipeline_mode = #tpu.pipeline_mode<synchronous>, transform_indices = @transform_1, window_bounds = array<i64: 2, 2, 32, 16>}, {transform_indices = @transform_2, window_bounds = array<i64: 1, 16, 16, 16>}, {transform_indices = @transform_3, window_bounds = array<i64: 1, 2, 16>}]} {
    %c0 = arith.constant 0 : index
    %c0_0 = arith.constant 0 : index
    %c0_1 = arith.constant 0 : index
    %c0_2 = arith.constant 0 : index
    %0 = vector.load %arg1[%c0, %c0_0, %c0_1, %c0_2] : memref<1x17x17x32xbf16, #tpu.memory_space<vmem>>, vector<1x16x16x32xbf16>
    %1 = vector.shape_cast %0 : vector<1x16x16x32xbf16> to vector<256x32xbf16>
    %c0_3 = arith.constant 0 : index
    %c0_4 = arith.constant 0 : index
    %c0_5 = arith.constant 0 : index
    %c0_6 = arith.constant 0 : index
    %2 = vector.load %arg2[%c0_3, %c0_4, %c0_5, %c0_6] : memref<2x2x32x16xbf16, #tpu.memory_space<vmem>>, vector<1x1x32x16xbf16>
    %3 = vector.shape_cast %2 : vector<1x1x32x16xbf16> to vector<32x16xbf16>
    %cst = arith.constant dense<0.000000e+00> : vector<256x16xf32>
    %4 = tpu.matmul %1, %3, %cst {dimension_numbers = #tpu.dot_dimension_numbers<[1], [0], [0], [1], [0, 0, 1, 1], [], []>} : vector<256x32xbf16>, vector<32x16xbf16>, vector<256x16xf32> -> vector<256x16xf32>
    %c0_7 = arith.constant 0 : index
    %c0_8 = arith.constant 0 : index
    %c1 = arith.constant 1 : index
    %c0_9 = arith.constant 0 : index
    %5 = vector.load %arg1[%c0_7, %c0_8, %c1, %c0_9] : memref<1x17x17x32xbf16, #tpu.memory_space<vmem>>, vector<1x16x16x32xbf16>
    %6 = vector.shape_cast %5 : vector<1x16x16x32xbf16> to vector<256x32xbf16>
    %c0_10 = arith.constant 0 : index
    %c1_11 = arith.constant 1 : index
    %c0_12 = arith.constant 0 : index
    %c0_13 = arith.constant 0 : index
    %7 = vector.load %arg2[%c0_10, %c1_11, %c0_12, %c0_13] : memref<2x2x32x16xbf16, #tpu.memory_space<vmem>>, vector<1x1x32x16xbf16>
    %8 = vector.shape_cast %7 : vector<1x1x32x16xbf16> to vector<32x16xbf16>
    %cst_14 = arith.constant dense<0.000000e+00> : vector<256x16xf32>
    %9 = tpu.matmul %6, %8, %cst_14 {dimension_numbers = #tpu.dot_dimension_numbers<[1], [0], [0], [1], [0, 0, 1, 1], [], []>} : vector<256x32xbf16>, vector<32x16xbf16>, vector<256x16xf32> -> vector<256x16xf32>
    %10 = arith.addf %4, %9 : vector<256x16xf32>
    %c0_15 = arith.constant 0 : index
    %c1_16 = arith.constant 1 : index
    %c0_17 = arith.constant 0 : index
    %c0_18 = arith.constant 0 : index
    %11 = vector.load %arg1[%c0_15, %c1_16, %c0_17, %c0_18] : memref<1x17x17x32xbf16, #tpu.memory_space<vmem>>, vector<1x16x16x32xbf16>
    %12 = vector.shape_cast %11 : vector<1x16x16x32xbf16> to vector<256x32xbf16>
    %c1_19 = arith.constant 1 : index
    %c0_20 = arith.constant 0 : index
    %c0_21 = arith.constant 0 : index
    %c0_22 = arith.constant 0 : index
    %13 = vector.load %arg2[%c1_19, %c0_20, %c0_21, %c0_22] : memref<2x2x32x16xbf16, #tpu.memory_space<vmem>>, vector<1x1x32x16xbf16>
    %14 = vector.shape_cast %13 : vector<1x1x32x16xbf16> to vector<32x16xbf16>
    %cst_23 = arith.constant dense<0.000000e+00> : vector<256x16xf32>
    %15 = tpu.matmul %12, %14, %cst_23 {dimension_numbers = #tpu.dot_dimension_numbers<[1], [0], [0], [1], [0, 0, 1, 1], [], []>} : vector<256x32xbf16>, vector<32x16xbf16>, vector<256x16xf32> -> vector<256x16xf32>
    %16 = arith.addf %10, %15 : vector<256x16xf32>
    %c0_24 = arith.constant 0 : index
    %c1_25 = arith.constant 1 : index
    %c1_26 = arith.constant 1 : index
    %c0_27 = arith.constant 0 : index
    %17 = vector.load %arg1[%c0_24, %c1_25, %c1_26, %c0_27] : memref<1x17x17x32xbf16, #tpu.memory_space<vmem>>, vector<1x16x16x32xbf16>
    %18 = vector.shape_cast %17 : vector<1x16x16x32xbf16> to vector<256x32xbf16>
    %c1_28 = arith.constant 1 : index
    %c1_29 = arith.constant 1 : index
    %c0_30 = arith.constant 0 : index
    %c0_31 = arith.constant 0 : index
    %19 = vector.load %arg2[%c1_28, %c1_29, %c0_30, %c0_31] : memref<2x2x32x16xbf16, #tpu.memory_space<vmem>>, vector<1x1x32x16xbf16>
    %20 = vector.shape_cast %19 : vector<1x1x32x16xbf16> to vector<32x16xbf16>
    %cst_32 = arith.constant dense<0.000000e+00> : vector<256x16xf32>
    %21 = tpu.matmul %18, %20, %cst_32 {dimension_numbers = #tpu.dot_dimension_numbers<[1], [0], [0], [1], [0, 0, 1, 1], [], []>} : vector<256x32xbf16>, vector<32x16xbf16>, vector<256x16xf32> -> vector<256x16xf32>
    %22 = arith.addf %16, %21 : vector<256x16xf32>
    %cst_33 = arith.constant dense<0.000000e+00> : vector<16xf32>
    %23 = vector.multi_reduction <add>, %22, %cst_33 [0] : vector<256x16xf32> to vector<16xf32>
    %24 = vector.shape_cast %23 : vector<16xf32> to vector<1x16xf32>
    %c0_34 = arith.constant 0 : index
    %c0_35 = arith.constant 0 : index
    %c0_36 = arith.constant 0 : index
    %25 = vector.load %arg4[%c0_34, %c0_35, %c0_36] : memref<1x2x16xf32, #tpu.memory_space<vmem>>, vector<1x1x16xf32>
    %26 = vector.shape_cast %25 : vector<1x1x16xf32> to vector<1x16xf32>
    %27 = vector.shape_cast %24 : vector<1x16xf32> to vector<1x1x16xf32>
    tpu.vector_store %arg4[%c0_34, %c0_35, %c0_36], %27 {strides = array<i32>} : memref<1x2x16xf32, #tpu.memory_space<vmem>>, vector<1x1x16xf32>,
    %28 = arith.mulf %22, %22 : vector<256x16xf32>
    %cst_37 = arith.constant dense<0.000000e+00> : vector<16xf32>
    %29 = vector.multi_reduction <add>, %28, %cst_37 [0] : vector<256x16xf32> to vector<16xf32>
    %30 = vector.shape_cast %29 : vector<16xf32> to vector<1x16xf32>
    %c0_38 = arith.constant 0 : index
    %c1_39 = arith.constant 1 : index
    %c0_40 = arith.constant 0 : index
    %31 = vector.load %arg4[%c0_38, %c1_39, %c0_40] : memref<1x2x16xf32, #tpu.memory_space<vmem>>, vector<1x1x16xf32>
    %32 = vector.shape_cast %31 : vector<1x1x16xf32> to vector<1x16xf32>
    %33 = vector.shape_cast %30 : vector<1x16xf32> to vector<1x1x16xf32>
    tpu.vector_store %arg4[%c0_38, %c1_39, %c0_40], %33 {strides = array<i32>} : memref<1x2x16xf32, #tpu.memory_space<vmem>>, vector<1x1x16xf32>,
    %34 = vector.shape_cast %22 : vector<256x16xf32> to vector<1x16x16x16xf32>
    %35 = arith.truncf %34 : vector<1x16x16x16xf32> to vector<1x16x16x16xbf16>
    %c0_41 = arith.constant 0 : index
    %c0_42 = arith.constant 0 : index
    %c0_43 = arith.constant 0 : index
    %c0_44 = arith.constant 0 : index
    %36 = vector.load %arg3[%c0_41, %c0_42, %c0_43, %c0_44] : memref<1x16x16x16xbf16, #tpu.memory_space<vmem>>, vector<1x16x16x16xbf16>
    tpu.vector_store %arg3[%c0_41, %c0_42, %c0_43, %c0_44], %35 {strides = array<i32>} : memref<1x16x16x16xbf16, #tpu.memory_space<vmem>>, vector<1x16x16x16xbf16>,
    return
  }
  func.func @transform_0(%arg0: i32) -> (i32, i32, i32, i32) {
    %c0_i32 = arith.constant 0 : i32
    %c0_i32_0 = arith.constant 0 : i32
    %c0_i32_1 = arith.constant 0 : i32
    %c0_i32_2 = arith.constant 0 : i32
    return %arg0, %c0_i32, %c0_i32_0, %c0_i32_1 : i32, i32, i32, i32
  }
  func.func @transform_1(%arg0: i32) -> (i32, i32, i32, i32) {
    %c0_i32 = arith.constant 0 : i32
    %c0_i32_0 = arith.constant 0 : i32
    %c0_i32_1 = arith.constant 0 : i32
    %c0_i32_2 = arith.constant 0 : i32
    %c0_i32_3 = arith.constant 0 : i32
    return %c0_i32, %c0_i32_0, %c0_i32_1, %c0_i32_2 : i32, i32, i32, i32
  }
  func.func @transform_2(%arg0: i32) -> (i32, i32, i32, i32) {
    %c0_i32 = arith.constant 0 : i32
    %c0_i32_0 = arith.constant 0 : i32
    %c0_i32_1 = arith.constant 0 : i32
    %c0_i32_2 = arith.constant 0 : i32
    return %arg0, %c0_i32, %c0_i32_0, %c0_i32_1 : i32, i32, i32, i32
  }
  func.func @transform_3(%arg0: i32) -> (i32, i32, i32) {
    %c0_i32 = arith.constant 0 : i32
    %c0_i32_0 = arith.constant 0 : i32
    %c0_i32_1 = arith.constant 0 : i32
    return %arg0, %c0_i32, %c0_i32_0 : i32, i32, i32
  }
}

module attributes {stable_mosaic.version = 11 : i64} {
  func.func @fused_conv_kernel(%arg0: i32, %arg1: memref<1x9x9x64xbf16, #tpu.memory_space<vmem>>, %arg2: memref<2x2x64x32xbf16, #tpu.memory_space<vmem>>, %arg3: memref<1x8x8x32xbf16, #tpu.memory_space<vmem>>, %arg4: memref<1x2x32xf32, #tpu.memory_space<vmem>>) attributes {dimension_semantics = [#tpu.dimension_semantics<parallel>], iteration_bounds = array<i64: 2>, scalar_prefetch = 0 : i64, scratch_operands = 0 : i64, tpu.core_type = #tpu.core_type<tc>, window_params = [{transform_indices = @transform_0, window_bounds = array<i64: 1, 9, 9, 64>}, {pipeline_mode = #tpu.pipeline_mode<synchronous>, transform_indices = @transform_1, window_bounds = array<i64: 2, 2, 64, 32>}, {transform_indices = @transform_2, window_bounds = array<i64: 1, 8, 8, 32>}, {transform_indices = @transform_3, window_bounds = array<i64: 1, 2, 32>}]} {
    %c0 = arith.constant 0 : index
    %c0_0 = arith.constant 0 : index
    %c0_1 = arith.constant 0 : index
    %c0_2 = arith.constant 0 : index
    %0 = vector.load %arg1[%c0, %c0_0, %c0_1, %c0_2] : memref<1x9x9x64xbf16, #tpu.memory_space<vmem>>, vector<1x8x8x64xbf16>
    %1 = vector.shape_cast %0 : vector<1x8x8x64xbf16> to vector<64x64xbf16>
    %c0_3 = arith.constant 0 : index
    %c0_4 = arith.constant 0 : index
    %c0_5 = arith.constant 0 : index
    %c0_6 = arith.constant 0 : index
    %2 = vector.load %arg2[%c0_3, %c0_4, %c0_5, %c0_6] : memref<2x2x64x32xbf16, #tpu.memory_space<vmem>>, vector<1x1x64x32xbf16>
    %3 = vector.shape_cast %2 : vector<1x1x64x32xbf16> to vector<64x32xbf16>
    %cst = arith.constant dense<0.000000e+00> : vector<64x32xf32>
    %4 = tpu.matmul %1, %3, %cst {dimension_numbers = #tpu.dot_dimension_numbers<[1], [0], [0], [1], [0, 0, 1, 1], [], []>} : vector<64x64xbf16>, vector<64x32xbf16>, vector<64x32xf32> -> vector<64x32xf32>
    %c0_7 = arith.constant 0 : index
    %c0_8 = arith.constant 0 : index
    %c1 = arith.constant 1 : index
    %c0_9 = arith.constant 0 : index
    %5 = vector.load %arg1[%c0_7, %c0_8, %c1, %c0_9] : memref<1x9x9x64xbf16, #tpu.memory_space<vmem>>, vector<1x8x8x64xbf16>
    %6 = vector.shape_cast %5 : vector<1x8x8x64xbf16> to vector<64x64xbf16>
    %c0_10 = arith.constant 0 : index
    %c1_11 = arith.constant 1 : index
    %c0_12 = arith.constant 0 : index
    %c0_13 = arith.constant 0 : index
    %7 = vector.load %arg2[%c0_10, %c1_11, %c0_12, %c0_13] : memref<2x2x64x32xbf16, #tpu.memory_space<vmem>>, vector<1x1x64x32xbf16>
    %8 = vector.shape_cast %7 : vector<1x1x64x32xbf16> to vector<64x32xbf16>
    %cst_14 = arith.constant dense<0.000000e+00> : vector<64x32xf32>
    %9 = tpu.matmul %6, %8, %cst_14 {dimension_numbers = #tpu.dot_dimension_numbers<[1], [0], [0], [1], [0, 0, 1, 1], [], []>} : vector<64x64xbf16>, vector<64x32xbf16>, vector<64x32xf32> -> vector<64x32xf32>
    %10 = arith.addf %4, %9 : vector<64x32xf32>
    %c0_15 = arith.constant 0 : index
    %c1_16 = arith.constant 1 : index
    %c0_17 = arith.constant 0 : index
    %c0_18 = arith.constant 0 : index
    %11 = vector.load %arg1[%c0_15, %c1_16, %c0_17, %c0_18] : memref<1x9x9x64xbf16, #tpu.memory_space<vmem>>, vector<1x8x8x64xbf16>
    %12 = vector.shape_cast %11 : vector<1x8x8x64xbf16> to vector<64x64xbf16>
    %c1_19 = arith.constant 1 : index
    %c0_20 = arith.constant 0 : index
    %c0_21 = arith.constant 0 : index
    %c0_22 = arith.constant 0 : index
    %13 = vector.load %arg2[%c1_19, %c0_20, %c0_21, %c0_22] : memref<2x2x64x32xbf16, #tpu.memory_space<vmem>>, vector<1x1x64x32xbf16>
    %14 = vector.shape_cast %13 : vector<1x1x64x32xbf16> to vector<64x32xbf16>
    %cst_23 = arith.constant dense<0.000000e+00> : vector<64x32xf32>
    %15 = tpu.matmul %12, %14, %cst_23 {dimension_numbers = #tpu.dot_dimension_numbers<[1], [0], [0], [1], [0, 0, 1, 1], [], []>} : vector<64x64xbf16>, vector<64x32xbf16>, vector<64x32xf32> -> vector<64x32xf32>
    %16 = arith.addf %10, %15 : vector<64x32xf32>
    %c0_24 = arith.constant 0 : index
    %c1_25 = arith.constant 1 : index
    %c1_26 = arith.constant 1 : index
    %c0_27 = arith.constant 0 : index
    %17 = vector.load %arg1[%c0_24, %c1_25, %c1_26, %c0_27] : memref<1x9x9x64xbf16, #tpu.memory_space<vmem>>, vector<1x8x8x64xbf16>
    %18 = vector.shape_cast %17 : vector<1x8x8x64xbf16> to vector<64x64xbf16>
    %c1_28 = arith.constant 1 : index
    %c1_29 = arith.constant 1 : index
    %c0_30 = arith.constant 0 : index
    %c0_31 = arith.constant 0 : index
    %19 = vector.load %arg2[%c1_28, %c1_29, %c0_30, %c0_31] : memref<2x2x64x32xbf16, #tpu.memory_space<vmem>>, vector<1x1x64x32xbf16>
    %20 = vector.shape_cast %19 : vector<1x1x64x32xbf16> to vector<64x32xbf16>
    %cst_32 = arith.constant dense<0.000000e+00> : vector<64x32xf32>
    %21 = tpu.matmul %18, %20, %cst_32 {dimension_numbers = #tpu.dot_dimension_numbers<[1], [0], [0], [1], [0, 0, 1, 1], [], []>} : vector<64x64xbf16>, vector<64x32xbf16>, vector<64x32xf32> -> vector<64x32xf32>
    %22 = arith.addf %16, %21 : vector<64x32xf32>
    %cst_33 = arith.constant dense<0.000000e+00> : vector<32xf32>
    %23 = vector.multi_reduction <add>, %22, %cst_33 [0] : vector<64x32xf32> to vector<32xf32>
    %24 = vector.shape_cast %23 : vector<32xf32> to vector<1x32xf32>
    %c0_34 = arith.constant 0 : index
    %c0_35 = arith.constant 0 : index
    %c0_36 = arith.constant 0 : index
    %25 = vector.load %arg4[%c0_34, %c0_35, %c0_36] : memref<1x2x32xf32, #tpu.memory_space<vmem>>, vector<1x1x32xf32>
    %26 = vector.shape_cast %25 : vector<1x1x32xf32> to vector<1x32xf32>
    %27 = vector.shape_cast %24 : vector<1x32xf32> to vector<1x1x32xf32>
    tpu.vector_store %arg4[%c0_34, %c0_35, %c0_36], %27 {strides = array<i32>} : memref<1x2x32xf32, #tpu.memory_space<vmem>>, vector<1x1x32xf32>,
    %28 = arith.mulf %22, %22 : vector<64x32xf32>
    %cst_37 = arith.constant dense<0.000000e+00> : vector<32xf32>
    %29 = vector.multi_reduction <add>, %28, %cst_37 [0] : vector<64x32xf32> to vector<32xf32>
    %30 = vector.shape_cast %29 : vector<32xf32> to vector<1x32xf32>
    %c0_38 = arith.constant 0 : index
    %c1_39 = arith.constant 1 : index
    %c0_40 = arith.constant 0 : index
    %31 = vector.load %arg4[%c0_38, %c1_39, %c0_40] : memref<1x2x32xf32, #tpu.memory_space<vmem>>, vector<1x1x32xf32>
    %32 = vector.shape_cast %31 : vector<1x1x32xf32> to vector<1x32xf32>
    %33 = vector.shape_cast %30 : vector<1x32xf32> to vector<1x1x32xf32>
    tpu.vector_store %arg4[%c0_38, %c1_39, %c0_40], %33 {strides = array<i32>} : memref<1x2x32xf32, #tpu.memory_space<vmem>>, vector<1x1x32xf32>,
    %34 = vector.shape_cast %22 : vector<64x32xf32> to vector<1x8x8x32xf32>
    %35 = arith.truncf %34 : vector<1x8x8x32xf32> to vector<1x8x8x32xbf16>
    %c0_41 = arith.constant 0 : index
    %c0_42 = arith.constant 0 : index
    %c0_43 = arith.constant 0 : index
    %c0_44 = arith.constant 0 : index
    %36 = vector.load %arg3[%c0_41, %c0_42, %c0_43, %c0_44] : memref<1x8x8x32xbf16, #tpu.memory_space<vmem>>, vector<1x8x8x32xbf16>
    tpu.vector_store %arg3[%c0_41, %c0_42, %c0_43, %c0_44], %35 {strides = array<i32>} : memref<1x8x8x32xbf16, #tpu.memory_space<vmem>>, vector<1x8x8x32xbf16>,
    return
  }
  func.func @transform_0(%arg0: i32) -> (i32, i32, i32, i32) {
    %c0_i32 = arith.constant 0 : i32
    %c0_i32_0 = arith.constant 0 : i32
    %c0_i32_1 = arith.constant 0 : i32
    %c0_i32_2 = arith.constant 0 : i32
    return %arg0, %c0_i32, %c0_i32_0, %c0_i32_1 : i32, i32, i32, i32
  }
  func.func @transform_1(%arg0: i32) -> (i32, i32, i32, i32) {
    %c0_i32 = arith.constant 0 : i32
    %c0_i32_0 = arith.constant 0 : i32
    %c0_i32_1 = arith.constant 0 : i32
    %c0_i32_2 = arith.constant 0 : i32
    %c0_i32_3 = arith.constant 0 : i32
    return %c0_i32, %c0_i32_0, %c0_i32_1, %c0_i32_2 : i32, i32, i32, i32
  }
  func.func @transform_2(%arg0: i32) -> (i32, i32, i32, i32) {
    %c0_i32 = arith.constant 0 : i32
    %c0_i32_0 = arith.constant 0 : i32
    %c0_i32_1 = arith.constant 0 : i32
    %c0_i32_2 = arith.constant 0 : i32
    return %arg0, %c0_i32, %c0_i32_0, %c0_i32_1 : i32, i32, i32, i32
  }
  func.func @transform_3(%arg0: i32) -> (i32, i32, i32) {
    %c0_i32 = arith.constant 0 : i32
    %c0_i32_0 = arith.constant 0 : i32
    %c0_i32_1 = arith.constant 0 : i32
    return %arg0, %c0_i32, %c0_i32_0 : i32, i32, i32
  }
}

module attributes {stable_mosaic.version = 11 : i64} {
  func.func @fused_conv_kernel(%arg0: i32, %arg1: memref<1x5x5x128xbf16, #tpu.memory_space<vmem>>, %arg2: memref<2x2x128x64xbf16, #tpu.memory_space<vmem>>, %arg3: memref<1x4x4x64xbf16, #tpu.memory_space<vmem>>, %arg4: memref<1x2x64xf32, #tpu.memory_space<vmem>>) attributes {dimension_semantics = [#tpu.dimension_semantics<parallel>], iteration_bounds = array<i64: 2>, scalar_prefetch = 0 : i64, scratch_operands = 0 : i64, tpu.core_type = #tpu.core_type<tc>, window_params = [{transform_indices = @transform_0, window_bounds = array<i64: 1, 5, 5, 128>}, {pipeline_mode = #tpu.pipeline_mode<synchronous>, transform_indices = @transform_1, window_bounds = array<i64: 2, 2, 128, 64>}, {transform_indices = @transform_2, window_bounds = array<i64: 1, 4, 4, 64>}, {transform_indices = @transform_3, window_bounds = array<i64: 1, 2, 64>}]} {
    %c0 = arith.constant 0 : index
    %c0_0 = arith.constant 0 : index
    %c0_1 = arith.constant 0 : index
    %c0_2 = arith.constant 0 : index
    %0 = vector.load %arg1[%c0, %c0_0, %c0_1, %c0_2] : memref<1x5x5x128xbf16, #tpu.memory_space<vmem>>, vector<1x4x4x128xbf16>
    %1 = vector.shape_cast %0 : vector<1x4x4x128xbf16> to vector<16x128xbf16>
    %c0_3 = arith.constant 0 : index
    %c0_4 = arith.constant 0 : index
    %c0_5 = arith.constant 0 : index
    %c0_6 = arith.constant 0 : index
    %2 = vector.load %arg2[%c0_3, %c0_4, %c0_5, %c0_6] : memref<2x2x128x64xbf16, #tpu.memory_space<vmem>>, vector<1x1x128x64xbf16>
    %3 = vector.shape_cast %2 : vector<1x1x128x64xbf16> to vector<128x64xbf16>
    %cst = arith.constant dense<0.000000e+00> : vector<16x64xf32>
    %4 = tpu.matmul %1, %3, %cst {dimension_numbers = #tpu.dot_dimension_numbers<[1], [0], [0], [1], [0, 0, 1, 1], [], []>} : vector<16x128xbf16>, vector<128x64xbf16>, vector<16x64xf32> -> vector<16x64xf32>
    %c0_7 = arith.constant 0 : index
    %c0_8 = arith.constant 0 : index
    %c1 = arith.constant 1 : index
    %c0_9 = arith.constant 0 : index
    %5 = vector.load %arg1[%c0_7, %c0_8, %c1, %c0_9] : memref<1x5x5x128xbf16, #tpu.memory_space<vmem>>, vector<1x4x4x128xbf16>
    %6 = vector.shape_cast %5 : vector<1x4x4x128xbf16> to vector<16x128xbf16>
    %c0_10 = arith.constant 0 : index
    %c1_11 = arith.constant 1 : index
    %c0_12 = arith.constant 0 : index
    %c0_13 = arith.constant 0 : index
    %7 = vector.load %arg2[%c0_10, %c1_11, %c0_12, %c0_13] : memref<2x2x128x64xbf16, #tpu.memory_space<vmem>>, vector<1x1x128x64xbf16>
    %8 = vector.shape_cast %7 : vector<1x1x128x64xbf16> to vector<128x64xbf16>
    %cst_14 = arith.constant dense<0.000000e+00> : vector<16x64xf32>
    %9 = tpu.matmul %6, %8, %cst_14 {dimension_numbers = #tpu.dot_dimension_numbers<[1], [0], [0], [1], [0, 0, 1, 1], [], []>} : vector<16x128xbf16>, vector<128x64xbf16>, vector<16x64xf32> -> vector<16x64xf32>
    %10 = arith.addf %4, %9 : vector<16x64xf32>
    %c0_15 = arith.constant 0 : index
    %c1_16 = arith.constant 1 : index
    %c0_17 = arith.constant 0 : index
    %c0_18 = arith.constant 0 : index
    %11 = vector.load %arg1[%c0_15, %c1_16, %c0_17, %c0_18] : memref<1x5x5x128xbf16, #tpu.memory_space<vmem>>, vector<1x4x4x128xbf16>
    %12 = vector.shape_cast %11 : vector<1x4x4x128xbf16> to vector<16x128xbf16>
    %c1_19 = arith.constant 1 : index
    %c0_20 = arith.constant 0 : index
    %c0_21 = arith.constant 0 : index
    %c0_22 = arith.constant 0 : index
    %13 = vector.load %arg2[%c1_19, %c0_20, %c0_21, %c0_22] : memref<2x2x128x64xbf16, #tpu.memory_space<vmem>>, vector<1x1x128x64xbf16>
    %14 = vector.shape_cast %13 : vector<1x1x128x64xbf16> to vector<128x64xbf16>
    %cst_23 = arith.constant dense<0.000000e+00> : vector<16x64xf32>
    %15 = tpu.matmul %12, %14, %cst_23 {dimension_numbers = #tpu.dot_dimension_numbers<[1], [0], [0], [1], [0, 0, 1, 1], [], []>} : vector<16x128xbf16>, vector<128x64xbf16>, vector<16x64xf32> -> vector<16x64xf32>
    %16 = arith.addf %10, %15 : vector<16x64xf32>
    %c0_24 = arith.constant 0 : index
    %c1_25 = arith.constant 1 : index
    %c1_26 = arith.constant 1 : index
    %c0_27 = arith.constant 0 : index
    %17 = vector.load %arg1[%c0_24, %c1_25, %c1_26, %c0_27] : memref<1x5x5x128xbf16, #tpu.memory_space<vmem>>, vector<1x4x4x128xbf16>
    %18 = vector.shape_cast %17 : vector<1x4x4x128xbf16> to vector<16x128xbf16>
    %c1_28 = arith.constant 1 : index
    %c1_29 = arith.constant 1 : index
    %c0_30 = arith.constant 0 : index
    %c0_31 = arith.constant 0 : index
    %19 = vector.load %arg2[%c1_28, %c1_29, %c0_30, %c0_31] : memref<2x2x128x64xbf16, #tpu.memory_space<vmem>>, vector<1x1x128x64xbf16>
    %20 = vector.shape_cast %19 : vector<1x1x128x64xbf16> to vector<128x64xbf16>
    %cst_32 = arith.constant dense<0.000000e+00> : vector<16x64xf32>
    %21 = tpu.matmul %18, %20, %cst_32 {dimension_numbers = #tpu.dot_dimension_numbers<[1], [0], [0], [1], [0, 0, 1, 1], [], []>} : vector<16x128xbf16>, vector<128x64xbf16>, vector<16x64xf32> -> vector<16x64xf32>
    %22 = arith.addf %16, %21 : vector<16x64xf32>
    %cst_33 = arith.constant dense<0.000000e+00> : vector<64xf32>
    %23 = vector.multi_reduction <add>, %22, %cst_33 [0] : vector<16x64xf32> to vector<64xf32>
    %24 = vector.shape_cast %23 : vector<64xf32> to vector<1x64xf32>
    %c0_34 = arith.constant 0 : index
    %c0_35 = arith.constant 0 : index
    %c0_36 = arith.constant 0 : index
    %25 = vector.load %arg4[%c0_34, %c0_35, %c0_36] : memref<1x2x64xf32, #tpu.memory_space<vmem>>, vector<1x1x64xf32>
    %26 = vector.shape_cast %25 : vector<1x1x64xf32> to vector<1x64xf32>
    %27 = vector.shape_cast %24 : vector<1x64xf32> to vector<1x1x64xf32>
    tpu.vector_store %arg4[%c0_34, %c0_35, %c0_36], %27 {strides = array<i32>} : memref<1x2x64xf32, #tpu.memory_space<vmem>>, vector<1x1x64xf32>,
    %28 = arith.mulf %22, %22 : vector<16x64xf32>
    %cst_37 = arith.constant dense<0.000000e+00> : vector<64xf32>
    %29 = vector.multi_reduction <add>, %28, %cst_37 [0] : vector<16x64xf32> to vector<64xf32>
    %30 = vector.shape_cast %29 : vector<64xf32> to vector<1x64xf32>
    %c0_38 = arith.constant 0 : index
    %c1_39 = arith.constant 1 : index
    %c0_40 = arith.constant 0 : index
    %31 = vector.load %arg4[%c0_38, %c1_39, %c0_40] : memref<1x2x64xf32, #tpu.memory_space<vmem>>, vector<1x1x64xf32>
    %32 = vector.shape_cast %31 : vector<1x1x64xf32> to vector<1x64xf32>
    %33 = vector.shape_cast %30 : vector<1x64xf32> to vector<1x1x64xf32>
    tpu.vector_store %arg4[%c0_38, %c1_39, %c0_40], %33 {strides = array<i32>} : memref<1x2x64xf32, #tpu.memory_space<vmem>>, vector<1x1x64xf32>,
    %34 = vector.shape_cast %22 : vector<16x64xf32> to vector<1x4x4x64xf32>
    %35 = arith.truncf %34 : vector<1x4x4x64xf32> to vector<1x4x4x64xbf16>
    %c0_41 = arith.constant 0 : index
    %c0_42 = arith.constant 0 : index
    %c0_43 = arith.constant 0 : index
    %c0_44 = arith.constant 0 : index
    %36 = vector.load %arg3[%c0_41, %c0_42, %c0_43, %c0_44] : memref<1x4x4x64xbf16, #tpu.memory_space<vmem>>, vector<1x4x4x64xbf16>
    tpu.vector_store %arg3[%c0_41, %c0_42, %c0_43, %c0_44], %35 {strides = array<i32>} : memref<1x4x4x64xbf16, #tpu.memory_space<vmem>>, vector<1x4x4x64xbf16>,
    return
  }
  func.func @transform_0(%arg0: i32) -> (i32, i32, i32, i32) {
    %c0_i32 = arith.constant 0 : i32
    %c0_i32_0 = arith.constant 0 : i32
    %c0_i32_1 = arith.constant 0 : i32
    %c0_i32_2 = arith.constant 0 : i32
    return %arg0, %c0_i32, %c0_i32_0, %c0_i32_1 : i32, i32, i32, i32
  }
  func.func @transform_1(%arg0: i32) -> (i32, i32, i32, i32) {
    %c0_i32 = arith.constant 0 : i32
    %c0_i32_0 = arith.constant 0 : i32
    %c0_i32_1 = arith.constant 0 : i32
    %c0_i32_2 = arith.constant 0 : i32
    %c0_i32_3 = arith.constant 0 : i32
    return %c0_i32, %c0_i32_0, %c0_i32_1, %c0_i32_2 : i32, i32, i32, i32
  }
  func.func @transform_2(%arg0: i32) -> (i32, i32, i32, i32) {
    %c0_i32 = arith.constant 0 : i32
    %c0_i32_0 = arith.constant 0 : i32
    %c0_i32_1 = arith.constant 0 : i32
    %c0_i32_2 = arith.constant 0 : i32
    return %arg0, %c0_i32, %c0_i32_0, %c0_i32_1 : i32, i32, i32, i32
  }
  func.func @transform_3(%arg0: i32) -> (i32, i32, i32) {
    %c0_i32 = arith.constant 0 : i32
    %c0_i32_0 = arith.constant 0 : i32
    %c0_i32_1 = arith.constant 0 : i32
    return %arg0, %c0_i32, %c0_i32_0 : i32, i32, i32
  }
}

</mosaic_0001>

<bundles_post_ra>
// kernel: discriminator_forward.4
= control target key start
LH: loop header
LB: loop body
LE: loop exit
PB: predicated region body
PF: predicated region fallthrough
CT: control target
= control target key end

     0   :  { %s2161_s9 = smov 0   ;;  %s2582_s0 = inlined_call_operand.vmem [shape: bf16[2048,48], index: 0, kind: input, shape index: {}]   ;;  %s2583_s1 = inlined_call_operand.vmem [shape: bf16[48,8], index: 1, kind: input, shape index: {}]   ;;  %s2584_s2 = inlined_call_operand.vmem [shape: bf16[2048,8], index: 2, kind: output, shape index: {}]  }
   0x1 LB: > { %s1711_s10 = sadd.s32 4294967295, %s2144_s9   ;;  %p1715_p0 = scmp.ge.s32.totalorder %s2144_s9, 1  ;;  %s2144_s9 = sphi %s2161_s9, %s12_s9  }
   0x2   : > { %p113_p1 = scmp.lt.s32.totalorder %s2144_s9, 3 }
   0x4   : > { %p114_p2 = pnand %p1715_p0, %p113_p1 }
   0x5   : > { %s1716_s13 = sshll.u32 (!%p114_p2), %s1711_s10, 7 }
   0x6   : > { %117 = sbr.rel (%p114_p2) target bundleno = 412 (0x19c), region = 28  ;;  %p136_p3 = scmp.lt.s32.totalorder (!%p114_p2), %s1716_s13, 255 }
   0xb   : > { %v2120_v0 = vld [vmem:[%s2583_s1 + $0x10] sm:$0xff]  ;;  %v2119_v1 = vld [vmem:[%s2583_s1 + $0x8] sm:$0xff]  ;;  %s2586_s13 = smov (!%p136_p3, %s1716_s13), 255  ;;  %v2118_v2 = vld [vmem:[%s2583_s1] sm:$0xff]  ;;  %vm620_vm0 = vcmask 392192   ;;  %vm1526_vm1 = vcmask 60416  }
   0xc   : > { %818 = vmatpush.bf16.msra.mxu0 %v2120_v0  ;;  %2121 = vmatpush.bf16.msra.mxu1 %v2120_v0  ;;  %s1717_s16 = sshll.u32 %s2586_s13, 2 }
   0xd   : > { %2122 = vmatpush.bf16.msra.mxu2 %v2120_v0  ;;  %2123 = vmatpush.bf16.msra.mxu3 %v2120_v0  ;;  %s2186_s21 = scalar_lea.vmem %s2582_s0, %s1717_s16  ;;  %s2263_s24 = scalar_lea.vmem %s2584_s2, %s1717_s16 }
   0xe   : > { %v2054_v3 = vld [vmem:[%s2186_s21] sm:$0xff]  ;;  %v2055_v7 = vld [vmem:[%s2186_s21 + $0x8] sm:$0xff]  ;;  %v2056_v11 = vld [vmem:[%s2186_s21 + $0x10] sm:$0xff] }
   0xf   : > { %v2070_v4 = vld [vmem:[%s2186_s21 + $0x80] sm:$0xff]  ;;  %v2071_v8 = vld [vmem:[%s2186_s21 + $0x88] sm:$0xff]  ;;  %v2072_v12 = vld [vmem:[%s2186_s21 + $0x90] sm:$0xff] }
  0x10   : > { %819 = vmatpush.bf16.msra.mxu0 %v2119_v1  ;;  %2124 = vmatpush.bf16.msra.mxu1 %v2119_v1  ;;  %v2086_v5 = vld [vmem:[%s2186_s21 + $0x100] sm:$0xff]  ;;  %v2087_v9 = vld [vmem:[%s2186_s21 + $0x108] sm:$0xff]  ;;  %v2088_v13 = vld [vmem:[%s2186_s21 + $0x110] sm:$0xff] }
  0x11   : > { %2125 = vmatpush.bf16.msra.mxu2 %v2119_v1  ;;  %2126 = vmatpush.bf16.msra.mxu3 %v2119_v1  ;;  %v2102_v6 = vld [vmem:[%s2186_s21 + $0x180] sm:$0xff]  ;;  %v2103_v10 = vld [vmem:[%s2186_s21 + $0x188] sm:$0xff]  ;;  %v2104_v14 = vld [vmem:[%s2186_s21 + $0x190] sm:$0xff] }
  0x12   : > { %v2057_v15 = vld [vmem:[%s2186_s21 + $0x18] sm:$0xff]  ;;  %v2058_v19 = vld [vmem:[%s2186_s21 + $0x20] sm:$0xff]  ;;  %v2059_v23 = vld [vmem:[%s2186_s21 + $0x28] sm:$0xff] }
  0x13   : > { %v2073_v16 = vld [vmem:[%s2186_s21 + $0x98] sm:$0xff]  ;;  %v2074_v20 = vld [vmem:[%s2186_s21 + $0xa0] sm:$0xff]  ;;  %v2075_v24 = vld [vmem:[%s2186_s21 + $0xa8] sm:$0xff] }
  0x14   : > { %820 = vmatpush.bf16.msra.mxu0 %v2118_v2  ;;  %2127 = vmatpush.bf16.msra.mxu1 %v2118_v2  ;;  %v2089_v17 = vld [vmem:[%s2186_s21 + $0x118] sm:$0xff]  ;;  %v2090_v21 = vld [vmem:[%s2186_s21 + $0x120] sm:$0xff]  ;;  %v2091_v25 = vld [vmem:[%s2186_s21 + $0x128] sm:$0xff] }
  0x15   : > { %2128 = vmatpush.bf16.msra.mxu2 %v2118_v2  ;;  %2129 = vmatpush.bf16.msra.mxu3 %v2118_v2  ;;  %v2105_v18 = vld [vmem:[%s2186_s21 + $0x198] sm:$0xff]  ;;  %v2106_v22 = vld [vmem:[%s2186_s21 + $0x1a0] sm:$0xff]  ;;  %v2107_v26 = vld [vmem:[%s2186_s21 + $0x1a8] sm:$0xff] }
  0x16   : > { %v2060_v27 = vld [vmem:[%s2186_s21 + $0x30] sm:$0xff]  ;;  %v2061_v31 = vld [vmem:[%s2186_s21 + $0x38] sm:$0xff]  ;;  %v2062_v35 = vld [vmem:[%s2186_s21 + $0x40] sm:$0xff] }
  0x17   : > { %1988 = vmatmul.msk.bf16.vlgmr.msra.gmra.mxu0 %vm620_vm0, %v2054_v3  ;;  %2004 = vmatmul.msk.bf16.vlgmr.msra.gmra.mxu1 %vm620_vm0, %v2070_v4  ;;  %v2076_v28 = vld [vmem:[%s2186_s21 + $0xb0] sm:$0xff]  ;;  %v2077_v32 = vld [vmem:[%s2186_s21 + $0xb8] sm:$0xff]  ;;  %v2078_v36 = vld [vmem:[%s2186_s21 + $0xc0] sm:$0xff] }
  0x18   : > { %2020 = vmatmul.msk.bf16.vlgmr.msra.gmra.mxu2 %vm620_vm0, %v2086_v5  ;;  %2036 = vmatmul.msk.bf16.vlgmr.msra.gmra.mxu3 %vm620_vm0, %v2102_v6  ;;  %v2092_v29 = vld [vmem:[%s2186_s21 + $0x130] sm:$0xff]  ;;  %v2093_v33 = vld [vmem:[%s2186_s21 + $0x138] sm:$0xff]  ;;  %v2094_v39 = vld [vmem:[%s2186_s21 + $0x140] sm:$0xff] }
  0x19   : > { %v2108_v30 = vld [vmem:[%s2186_s21 + $0x1b0] sm:$0xff]  ;;  %v2109_v34 = vld [vmem:[%s2186_s21 + $0x1b8] sm:$0xff]  ;;  %v2110_v40 = vld [vmem:[%s2186_s21 + $0x1c0] sm:$0xff] }
  0x1a   : > { %v2063_v63 = vld [vmem:[%s2186_s21 + $0x48] sm:$0xff] }
  0x1b   : > { %v2079_v2 = vld [vmem:[%s2186_s21 + $0xc8] sm:$0xff] }
  0x1c   : > { %v2095_v3 = vld [vmem:[%s2186_s21 + $0x148] sm:$0xff] }
  0x1d   : > { %v2111_v4 = vld [vmem:[%s2186_s21 + $0x1c8] sm:$0xff] }
  0x27   : > { %1989 = vmatmul.msk.bf16.gmra.mxu0 %vm620_vm0, %v2055_v7  ;;  %2005 = vmatmul.msk.bf16.gmra.mxu1 %vm620_vm0, %v2071_v8 }
  0x28   : > { %2021 = vmatmul.msk.bf16.gmra.mxu2 %vm620_vm0, %v2087_v9  ;;  %2037 = vmatmul.msk.bf16.gmra.mxu3 %vm620_vm0, %v2103_v10 }
  0x37   : > { %1990 = vmatmul.msk.bf16.gmra.mxu0 %vm620_vm0, %v2056_v11  ;;  %2006 = vmatmul.msk.bf16.gmra.mxu1 %vm620_vm0, %v2072_v12 }
  0x38   : > { %2022 = vmatmul.msk.bf16.gmra.mxu2 %vm620_vm0, %v2088_v13  ;;  %2038 = vmatmul.msk.bf16.gmra.mxu3 %vm620_vm0, %v2104_v14 }
  0x47   : > { %1991 = vmatmul.msk.bf16.gmra.mxu0 %vm620_vm0, %v2057_v15  ;;  %2007 = vmatmul.msk.bf16.gmra.mxu1 %vm620_vm0, %v2073_v16 }
  0x48   : > { %2023 = vmatmul.msk.bf16.gmra.mxu2 %vm620_vm0, %v2089_v17  ;;  %2039 = vmatmul.msk.bf16.gmra.mxu3 %vm620_vm0, %v2105_v18 }
  0x57   : > { %1992 = vmatmul.msk.bf16.gmra.mxu0 %vm620_vm0, %v2058_v19  ;;  %2008 = vmatmul.msk.bf16.gmra.mxu1 %vm620_vm0, %v2074_v20 }
  0x58   : > { %2024 = vmatmul.msk.bf16.gmra.mxu2 %vm620_vm0, %v2090_v21  ;;  %2040 = vmatmul.msk.bf16.gmra.mxu3 %vm620_vm0, %v2106_v22 }
  0x67   : > { %1993 = vmatmul.msk.bf16.gmra.mxu0 %vm620_vm0, %v2059_v23  ;;  %2009 = vmatmul.msk.bf16.gmra.mxu1 %vm620_vm0, %v2075_v24 }
  0x68   : > { %2025 = vmatmul.msk.bf16.gmra.mxu2 %vm620_vm0, %v2091_v25  ;;  %2041 = vmatmul.msk.bf16.gmra.mxu3 %vm620_vm0, %v2107_v26 }
  0x77   : > { %1994 = vmatmul.msk.bf16.gmra.mxu0 %vm620_vm0, %v2060_v27  ;;  %2010 = vmatmul.msk.bf16.gmra.mxu1 %vm620_vm0, %v2076_v28 }
  0x78   : > { %2026 = vmatmul.msk.bf16.gmra.mxu2 %vm620_vm0, %v2092_v29  ;;  %2042 = vmatmul.msk.bf16.gmra.mxu3 %vm620_vm0, %v2108_v30 }
  0x87   : > { %1995 = vmatmul.msk.bf16.gmra.mxu0 %vm620_vm0, %v2061_v31  ;;  %2011 = vmatmul.msk.bf16.gmra.mxu1 %vm620_vm0, %v2077_v32 }
  0x88   : > { %2027 = vmatmul.msk.bf16.gmra.mxu2 %vm620_vm0, %v2093_v33  ;;  %2043 = vmatmul.msk.bf16.gmra.mxu3 %vm620_vm0, %v2109_v34 }
  0x94   : > { %v822_v37 = vpop.f32.mrf.mxu0  ;;  %v902_v38 = vpop.f32.mrf.mxu1 }
  0x95   : > { %v1142_v41 = vmul.f32 0.2, %v822_v37  ;;  %v1174_v42 = vmul.f32 0.2, %v902_v38 }
  0x97   : > { %v1270_v43 = vmax.f32 %v822_v37, %v1142_v41  ;;  %v1302_v44 = vmax.f32 %v902_v38, %v1174_v42  ;;  %1996 = vmatmul.msk.bf16.gmra.mxu0 %vm620_vm0, %v2062_v35  ;;  %2012 = vmatmul.msk.bf16.gmra.mxu1 %vm620_vm0, %v2078_v36  ;;  %v2064_v35 = vld [vmem:[%s2186_s21 + $0x50] sm:$0xff] }
  0x98   : > { %2028 = vmatmul.msk.bf16.gmra.mxu2 %vm620_vm0, %v2094_v39  ;;  %2044 = vmatmul.msk.bf16.gmra.mxu3 %vm620_vm0, %v2110_v40  ;;  %v2080_v38 = vld [vmem:[%s2186_s21 + $0xd0] sm:$0xff] }
  0x99   : > { %v1398_v45 = vpack.c.bf16 %v1270_v43, %v1270_v43  ;;  %v1430_v46 = vpack.c.bf16 %v1302_v44, %v1302_v44  ;;  %v2096_v39 = vld [vmem:[%s2186_s21 + $0x150] sm:$0xff] }
  0x9a   : > { %v2112_v40 = vld [vmem:[%s2186_s21 + $0x1d0] sm:$0xff] }
  0x9b   : > { %1527 = vst.msk [vmem:[%s2263_s24] sm:$0xf] %vm1526_vm1, %v1398_v45  ;;  %v982_v47 = vpop.f32.mrf.mxu2  ;;  %v1062_v48 = vpop.f32.mrf.mxu3 }
  0x9c   : > { %1559 = vst.msk [vmem:[%s2263_s24 + $0x80] sm:$0xf] %vm1526_vm1, %v1430_v46  ;;  %v1206_v49 = vmul.f32 0.2, %v982_v47  ;;  %v1238_v50 = vmul.f32 0.2, %v1062_v48  ;;  %v824_v51 = vpop.f32.mrf.mxu0  ;;  %v904_v52 = vpop.f32.mrf.mxu1 }
  0x9d   : > { %v1143_v53 = vmul.f32 0.2, %v824_v51  ;;  %v1175_v54 = vmul.f32 0.2, %v904_v52 }
  0x9e   : > { %v1334_v55 = vmax.f32 %v982_v47, %v1206_v49  ;;  %v1366_v56 = vmax.f32 %v1062_v48, %v1238_v50 }
  0x9f   : > { %v1271_v57 = vmax.f32 %v824_v51, %v1143_v53  ;;  %v1303_v58 = vmax.f32 %v904_v52, %v1175_v54 }
  0xa0   : > { %v1462_v59 = vpack.c.bf16 %v1334_v55, %v1334_v55  ;;  %v1494_v60 = vpack.c.bf16 %v1366_v56, %v1366_v56 }
  0xa1   : > { %v1399_v61 = vpack.c.bf16 %v1271_v57, %v1271_v57  ;;  %v1431_v62 = vpack.c.bf16 %v1303_v58, %v1303_v58 }
  0xa2   : > { %1591 = vst.msk [vmem:[%s2263_s24 + $0x100] sm:$0xf] %vm1526_vm1, %v1462_v59 }
  0xa3   : > { %1623 = vst.msk [vmem:[%s2263_s24 + $0x180] sm:$0xf] %vm1526_vm1, %v1494_v60  ;;  %v984_v0 = vpop.f32.mrf.mxu2  ;;  %v1064_v1 = vpop.f32.mrf.mxu3 }
  0xa4   : > { %1528 = vst.msk [vmem:[%s2263_s24 + $0x4] sm:$0xf] %vm1526_vm1, %v1399_v61  ;;  %v1207_v5 = vmul.f32 0.2, %v984_v0  ;;  %v1239_v6 = vmul.f32 0.2, %v1064_v1  ;;  %v827_v7 = vpop.f32.mrf.mxu0  ;;  %v907_v8 = vpop.f32.mrf.mxu1 }
  0xa5   : > { %1560 = vst.msk [vmem:[%s2263_s24 + $0x84] sm:$0xf] %vm1526_vm1, %v1431_v62  ;;  %v1144_v9 = vmul.f32 0.2, %v827_v7  ;;  %v1176_v10 = vmul.f32 0.2, %v907_v8 }
  0xa6   : > { %v1335_v11 = vmax.f32 %v984_v0, %v1207_v5  ;;  %v1367_v12 = vmax.f32 %v1064_v1, %v1239_v6 }
  0xa7   : > { %v1272_v13 = vmax.f32 %v827_v7, %v1144_v9  ;;  %v1304_v14 = vmax.f32 %v907_v8, %v1176_v10  ;;  %1997 = vmatmul.msk.bf16.gmra.mxu0 %vm620_vm0, %v2063_v63  ;;  %2013 = vmatmul.msk.bf16.gmra.mxu1 %vm620_vm0, %v2079_v2  ;;  %v2065_v7 = vld [vmem:[%s2186_s21 + $0x58] sm:$0xff] }
  0xa8   : > { %v1463_v15 = vpack.c.bf16 %v1335_v11, %v1335_v11  ;;  %v1495_v16 = vpack.c.bf16 %v1367_v12, %v1367_v12  ;;  %2029 = vmatmul.msk.bf16.gmra.mxu2 %vm620_vm0, %v2095_v3  ;;  %2045 = vmatmul.msk.bf16.gmra.mxu3 %vm620_vm0, %v2111_v4  ;;  %v2081_v10 = vld [vmem:[%s2186_s21 + $0xd8] sm:$0xff] }
  0xa9   : > { %v1400_v17 = vpack.c.bf16 %v1272_v13, %v1272_v13  ;;  %v1432_v18 = vpack.c.bf16 %v1304_v14, %v1304_v14  ;;  %v2097_v11 = vld [vmem:[%s2186_s21 + $0x158] sm:$0xff] }
  0xaa   : > { %1592 = vst.msk [vmem:[%s2263_s24 + $0x104] sm:$0xf] %vm1526_vm1, %v1463_v15  ;;  %v2113_v12 = vld [vmem:[%s2186_s21 + $0x1d8] sm:$0xff] }
  0xab   : > { %1624 = vst.msk [vmem:[%s2263_s24 + $0x184] sm:$0xf] %vm1526_vm1, %v1495_v16  ;;  %v987_v19 = vpop.f32.mrf.mxu2  ;;  %v1067_v20 = vpop.f32.mrf.mxu3 }
  0xac   : > { %1529 = vst.msk [vmem:[%s2263_s24 + $0x8] sm:$0xf] %vm1526_vm1, %v1400_v17  ;;  %v1208_v21 = vmul.f32 0.2, %v987_v19  ;;  %v1240_v22 = vmul.f32 0.2, %v1067_v20  ;;  %v829_v23 = vpop.f32.mrf.mxu0  ;;  %v909_v24 = vpop.f32.mrf.mxu1 }
  0xad   : > { %1561 = vst.msk [vmem:[%s2263_s24 + $0x88] sm:$0xf] %vm1526_vm1, %v1432_v18  ;;  %v1145_v25 = vmul.f32 0.2, %v829_v23  ;;  %v1177_v26 = vmul.f32 0.2, %v909_v24 }
  0xae   : > { %v1336_v27 = vmax.f32 %v987_v19, %v1208_v21  ;;  %v1368_v28 = vmax.f32 %v1067_v20, %v1240_v22 }
  0xaf   : > { %v1273_v29 = vmax.f32 %v829_v23, %v1145_v25  ;;  %v1305_v30 = vmax.f32 %v909_v24, %v1177_v26 }
  0xb0   : > { %v1464_v31 = vpack.c.bf16 %v1336_v27, %v1336_v27  ;;  %v1496_v32 = vpack.c.bf16 %v1368_v28, %v1368_v28 }
  0xb1   : > { %v1401_v33 = vpack.c.bf16 %v1273_v29, %v1273_v29  ;;  %v1433_v34 = vpack.c.bf16 %v1305_v30, %v1305_v30 }
  0xb2   : > { %1593 = vst.msk [vmem:[%s2263_s24 + $0x108] sm:$0xf] %vm1526_vm1, %v1464_v31 }
  0xb3   : > { %1625 = vst.msk [vmem:[%s2263_s24 + $0x188] sm:$0xf] %vm1526_vm1, %v1496_v32  ;;  %v989_v36 = vpop.f32.mrf.mxu2  ;;  %v1069_v37 = vpop.f32.mrf.mxu3 }
  0xb4   : > { %1530 = vst.msk [vmem:[%s2263_s24 + $0xc] sm:$0xf] %vm1526_vm1, %v1401_v33  ;;  %v1209_v41 = vmul.f32 0.2, %v989_v36  ;;  %v1241_v42 = vmul.f32 0.2, %v1069_v37  ;;  %v832_v43 = vpop.f32.mrf.mxu0  ;;  %v912_v44 = vpop.f32.mrf.mxu1 }
  0xb5   : > { %1562 = vst.msk [vmem:[%s2263_s24 + $0x8c] sm:$0xf] %vm1526_vm1, %v1433_v34  ;;  %v1146_v45 = vmul.f32 0.2, %v832_v43  ;;  %v1178_v46 = vmul.f32 0.2, %v912_v44 }
  0xb6   : > { %v1337_v47 = vmax.f32 %v989_v36, %v1209_v41  ;;  %v1369_v48 = vmax.f32 %v1069_v37, %v1241_v42 }
  0xb7   : > { %v1274_v49 = vmax.f32 %v832_v43, %v1146_v45  ;;  %v1306_v50 = vmax.f32 %v912_v44, %v1178_v46  ;;  %1998 = vmatmul.msk.bf16.gmra.mxu0 %vm620_vm0, %v2064_v35  ;;  %2014 = vmatmul.msk.bf16.gmra.mxu1 %vm620_vm0, %v2080_v38  ;;  %v2066_v43 = vld [vmem:[%s2186_s21 + $0x60] sm:$0xff] }
  0xb8   : > { %v1465_v51 = vpack.c.bf16 %v1337_v47, %v1337_v47  ;;  %v1497_v52 = vpack.c.bf16 %v1369_v48, %v1369_v48  ;;  %2030 = vmatmul.msk.bf16.gmra.mxu2 %vm620_vm0, %v2096_v39  ;;  %2046 = vmatmul.msk.bf16.gmra.mxu3 %vm620_vm0, %v2112_v40  ;;  %v2082_v46 = vld [vmem:[%s2186_s21 + $0xe0] sm:$0xff] }
  0xb9   : > { %v1402_v53 = vpack.c.bf16 %v1274_v49, %v1274_v49  ;;  %v1434_v54 = vpack.c.bf16 %v1306_v50, %v1306_v50  ;;  %v2098_v47 = vld [vmem:[%s2186_s21 + $0x160] sm:$0xff] }
  0xba   : > { %1594 = vst.msk [vmem:[%s2263_s24 + $0x10c] sm:$0xf] %vm1526_vm1, %v1465_v51  ;;  %v2114_v48 = vld [vmem:[%s2186_s21 + $0x1e0] sm:$0xff] }
  0xbb   : > { %1626 = vst.msk [vmem:[%s2263_s24 + $0x18c] sm:$0xf] %vm1526_vm1, %v1497_v52  ;;  %v992_v55 = vpop.f32.mrf.mxu2  ;;  %v1072_v56 = vpop.f32.mrf.mxu3 }
  0xbc   : > { %1531 = vst.msk [vmem:[%s2263_s24 + $0x10] sm:$0xf] %vm1526_vm1, %v1402_v53  ;;  %v1210_v57 = vmul.f32 0.2, %v992_v55  ;;  %v1242_v58 = vmul.f32 0.2, %v1072_v56  ;;  %v834_v59 = vpop.f32.mrf.mxu0  ;;  %v914_v60 = vpop.f32.mrf.mxu1 }
  0xbd   : > { %1563 = vst.msk [vmem:[%s2263_s24 + $0x90] sm:$0xf] %vm1526_vm1, %v1434_v54  ;;  %v1147_v61 = vmul.f32 0.2, %v834_v59  ;;  %v1179_v62 = vmul.f32 0.2, %v914_v60 }
  0xbe   : > { %v1338_v63 = vmax.f32 %v992_v55, %v1210_v57  ;;  %v1370_v0 = vmax.f32 %v1072_v56, %v1242_v58 }
  0xbf   : > { %v1275_v1 = vmax.f32 %v834_v59, %v1147_v61  ;;  %v1307_v2 = vmax.f32 %v914_v60, %v1179_v62 }
  0xc0   : > { %v1466_v3 = vpack.c.bf16 %v1338_v63, %v1338_v63  ;;  %v1498_v4 = vpack.c.bf16 %v1370_v0, %v1370_v0 }
  0xc1   : > { %v1403_v5 = vpack.c.bf16 %v1275_v1, %v1275_v1  ;;  %v1435_v6 = vpack.c.bf16 %v1307_v2, %v1307_v2 }
  0xc2   : > { %1595 = vst.msk [vmem:[%s2263_s24 + $0x110] sm:$0xf] %vm1526_vm1, %v1466_v3 }
  0xc3   : > { %1627 = vst.msk [vmem:[%s2263_s24 + $0x190] sm:$0xf] %vm1526_vm1, %v1498_v4  ;;  %v994_v8 = vpop.f32.mrf.mxu2  ;;  %v1074_v9 = vpop.f32.mrf.mxu3 }
  0xc4   : > { %1532 = vst.msk [vmem:[%s2263_s24 + $0x14] sm:$0xf] %vm1526_vm1, %v1403_v5  ;;  %v1211_v13 = vmul.f32 0.2, %v994_v8  ;;  %v1243_v14 = vmul.f32 0.2, %v1074_v9  ;;  %v837_v15 = vpop.f32.mrf.mxu0  ;;  %v917_v16 = vpop.f32.mrf.mxu1 }
  0xc5   : > { %1564 = vst.msk [vmem:[%s2263_s24 + $0x94] sm:$0xf] %vm1526_vm1, %v1435_v6  ;;  %v1148_v17 = vmul.f32 0.2, %v837_v15  ;;  %v1180_v18 = vmul.f32 0.2, %v917_v16 }
  0xc6   : > { %v1339_v19 = vmax.f32 %v994_v8, %v1211_v13  ;;  %v1371_v20 = vmax.f32 %v1074_v9, %v1243_v14 }
  0xc7   : > { %v1276_v21 = vmax.f32 %v837_v15, %v1148_v17  ;;  %v1308_v22 = vmax.f32 %v917_v16, %v1180_v18  ;;  %1999 = vmatmul.msk.bf16.gmra.mxu0 %vm620_vm0, %v2065_v7  ;;  %2015 = vmatmul.msk.bf16.gmra.mxu1 %vm620_vm0, %v2081_v10  ;;  %v2067_v15 = vld [vmem:[%s2186_s21 + $0x68] sm:$0xff] }
  0xc8   : > { %v1467_v23 = vpack.c.bf16 %v1339_v19, %v1339_v19  ;;  %v1499_v24 = vpack.c.bf16 %v1371_v20, %v1371_v20  ;;  %2031 = vmatmul.msk.bf16.gmra.mxu2 %vm620_vm0, %v2097_v11  ;;  %2047 = vmatmul.msk.bf16.gmra.mxu3 %vm620_vm0, %v2113_v12  ;;  %v2083_v18 = vld [vmem:[%s2186_s21 + $0xe8] sm:$0xff] }
  0xc9   : > { %v1404_v25 = vpack.c.bf16 %v1276_v21, %v1276_v21  ;;  %v1436_v26 = vpack.c.bf16 %v1308_v22, %v1308_v22  ;;  %v2099_v19 = vld [vmem:[%s2186_s21 + $0x168] sm:$0xff] }
  0xca   : > { %1596 = vst.msk [vmem:[%s2263_s24 + $0x114] sm:$0xf] %vm1526_vm1, %v1467_v23  ;;  %v2115_v20 = vld [vmem:[%s2186_s21 + $0x1e8] sm:$0xff] }
  0xcb   : > { %1628 = vst.msk [vmem:[%s2263_s24 + $0x194] sm:$0xf] %vm1526_vm1, %v1499_v24  ;;  %v997_v27 = vpop.f32.mrf.mxu2  ;;  %v1077_v28 = vpop.f32.mrf.mxu3 }
  0xcc   : > { %1533 = vst.msk [vmem:[%s2263_s24 + $0x18] sm:$0xf] %vm1526_vm1, %v1404_v25  ;;  %v1212_v29 = vmul.f32 0.2, %v997_v27  ;;  %v1244_v30 = vmul.f32 0.2, %v1077_v28  ;;  %v839_v31 = vpop.f32.mrf.mxu0  ;;  %v919_v32 = vpop.f32.mrf.mxu1 }
  0xcd   : > { %1565 = vst.msk [vmem:[%s2263_s24 + $0x98] sm:$0xf] %vm1526_vm1, %v1436_v26  ;;  %v1149_v33 = vmul.f32 0.2, %v839_v31  ;;  %v1181_v34 = vmul.f32 0.2, %v919_v32 }
  0xce   : > { %v1340_v35 = vmax.f32 %v997_v27, %v1212_v29  ;;  %v1372_v36 = vmax.f32 %v1077_v28, %v1244_v30 }
  0xcf   : > { %v1277_v37 = vmax.f32 %v839_v31, %v1149_v33  ;;  %v1309_v38 = vmax.f32 %v919_v32, %v1181_v34 }
  0xd0   : > { %v1468_v39 = vpack.c.bf16 %v1340_v35, %v1340_v35  ;;  %v1500_v40 = vpack.c.bf16 %v1372_v36, %v1372_v36 }
  0xd1   : > { %v1405_v41 = vpack.c.bf16 %v1277_v37, %v1277_v37  ;;  %v1437_v42 = vpack.c.bf16 %v1309_v38, %v1309_v38 }
  0xd2   : > { %1597 = vst.msk [vmem:[%s2263_s24 + $0x118] sm:$0xf] %vm1526_vm1, %v1468_v39 }
  0xd3   : > { %1629 = vst.msk [vmem:[%s2263_s24 + $0x198] sm:$0xf] %vm1526_vm1, %v1500_v40  ;;  %v999_v44 = vpop.f32.mrf.mxu2  ;;  %v1079_v45 = vpop.f32.mrf.mxu3 }
  0xd4   : > { %1534 = vst.msk [vmem:[%s2263_s24 + $0x1c] sm:$0xf] %vm1526_vm1, %v1405_v41  ;;  %v1213_v49 = vmul.f32 0.2, %v999_v44  ;;  %v1245_v50 = vmul.f32 0.2, %v1079_v45  ;;  %v842_v51 = vpop.f32.mrf.mxu0  ;;  %v922_v52 = vpop.f32.mrf.mxu1 }
  0xd5   : > { %1566 = vst.msk [vmem:[%s2263_s24 + $0x9c] sm:$0xf] %vm1526_vm1, %v1437_v42  ;;  %v1150_v53 = vmul.f32 0.2, %v842_v51  ;;  %v1182_v54 = vmul.f32 0.2, %v922_v52 }
  0xd6   : > { %v1341_v55 = vmax.f32 %v999_v44, %v1213_v49  ;;  %v1373_v56 = vmax.f32 %v1079_v45, %v1245_v50 }
  0xd7   : > { %v1278_v57 = vmax.f32 %v842_v51, %v1150_v53  ;;  %v1310_v58 = vmax.f32 %v922_v52, %v1182_v54  ;;  %2000 = vmatmul.msk.bf16.gmra.mxu0 %vm620_vm0, %v2066_v43  ;;  %2016 = vmatmul.msk.bf16.gmra.mxu1 %vm620_vm0, %v2082_v46  ;;  %v2068_v51 = vld [vmem:[%s2186_s21 + $0x70] sm:$0xff] }
  0xd8   : > { %v1469_v59 = vpack.c.bf16 %v1341_v55, %v1341_v55  ;;  %v1501_v60 = vpack.c.bf16 %v1373_v56, %v1373_v56  ;;  %2032 = vmatmul.msk.bf16.gmra.mxu2 %vm620_vm0, %v2098_v47  ;;  %2048 = vmatmul.msk.bf16.gmra.mxu3 %vm620_vm0, %v2114_v48  ;;  %v2084_v54 = vld [vmem:[%s2186_s21 + $0xf0] sm:$0xff] }
  0xd9   : > { %v1406_v61 = vpack.c.bf16 %v1278_v57, %v1278_v57  ;;  %v1438_v62 = vpack.c.bf16 %v1310_v58, %v1310_v58  ;;  %v2100_v55 = vld [vmem:[%s2186_s21 + $0x170] sm:$0xff] }
  0xda   : > { %1598 = vst.msk [vmem:[%s2263_s24 + $0x11c] sm:$0xf] %vm1526_vm1, %v1469_v59  ;;  %v2116_v56 = vld [vmem:[%s2186_s21 + $0x1f0] sm:$0xff] }
  0xdb   : > { %1630 = vst.msk [vmem:[%s2263_s24 + $0x19c] sm:$0xf] %vm1526_vm1, %v1501_v60  ;;  %v1002_v63 = vpop.f32.mrf.mxu2  ;;  %v1082_v0 = vpop.f32.mrf.mxu3 }
  0xdc   : > { %1535 = vst.msk [vmem:[%s2263_s24 + $0x20] sm:$0xf] %vm1526_vm1, %v1406_v61  ;;  %v1214_v1 = vmul.f32 0.2, %v1002_v63  ;;  %v1246_v2 = vmul.f32 0.2, %v1082_v0  ;;  %v844_v3 = vpop.f32.mrf.mxu0  ;;  %v924_v4 = vpop.f32.mrf.mxu1 }
  0xdd   : > { %1567 = vst.msk [vmem:[%s2263_s24 + $0xa0] sm:$0xf] %vm1526_vm1, %v1438_v62  ;;  %v1151_v5 = vmul.f32 0.2, %v844_v3  ;;  %v1183_v6 = vmul.f32 0.2, %v924_v4 }
  0xde   : > { %v1342_v7 = vmax.f32 %v1002_v63, %v1214_v1  ;;  %v1374_v8 = vmax.f32 %v1082_v0, %v1246_v2 }
  0xdf   : > { %v1279_v9 = vmax.f32 %v844_v3, %v1151_v5  ;;  %v1311_v10 = vmax.f32 %v924_v4, %v1183_v6 }
  0xe0   : > { %v1470_v11 = vpack.c.bf16 %v1342_v7, %v1342_v7  ;;  %v1502_v12 = vpack.c.bf16 %v1374_v8, %v1374_v8 }
  0xe1   : > { %v1407_v13 = vpack.c.bf16 %v1279_v9, %v1279_v9  ;;  %v1439_v14 = vpack.c.bf16 %v1311_v10, %v1311_v10 }
  0xe2   : > { %1599 = vst.msk [vmem:[%s2263_s24 + $0x120] sm:$0xf] %vm1526_vm1, %v1470_v11 }
  0xe3   : > { %1631 = vst.msk [vmem:[%s2263_s24 + $0x1a0] sm:$0xf] %vm1526_vm1, %v1502_v12  ;;  %v1004_v16 = vpop.f32.mrf.mxu2  ;;  %v1084_v17 = vpop.f32.mrf.mxu3 }
  0xe4   : > { %1536 = vst.msk [vmem:[%s2263_s24 + $0x24] sm:$0xf] %vm1526_vm1, %v1407_v13  ;;  %v1215_v21 = vmul.f32 0.2, %v1004_v16  ;;  %v1247_v22 = vmul.f32 0.2, %v1084_v17  ;;  %v847_v23 = vpop.f32.mrf.mxu0  ;;  %v927_v24 = vpop.f32.mrf.mxu1 }
  0xe5   : > { %1568 = vst.msk [vmem:[%s2263_s24 + $0xa4] sm:$0xf] %vm1526_vm1, %v1439_v14  ;;  %v1152_v25 = vmul.f32 0.2, %v847_v23  ;;  %v1184_v26 = vmul.f32 0.2, %v927_v24 }
  0xe6   : > { %v1343_v27 = vmax.f32 %v1004_v16, %v1215_v21  ;;  %v1375_v28 = vmax.f32 %v1084_v17, %v1247_v22 }
  0xe7   : > { %v1280_v29 = vmax.f32 %v847_v23, %v1152_v25  ;;  %v1312_v30 = vmax.f32 %v927_v24, %v1184_v26  ;;  %2001 = vmatmul.msk.bf16.gmra.mxu0 %vm620_vm0, %v2067_v15  ;;  %2017 = vmatmul.msk.bf16.gmra.mxu1 %vm620_vm0, %v2083_v18  ;;  %v2069_v23 = vld [vmem:[%s2186_s21 + $0x78] sm:$0xff] }
  0xe8   : > { %v1471_v31 = vpack.c.bf16 %v1343_v27, %v1343_v27  ;;  %v1503_v32 = vpack.c.bf16 %v1375_v28, %v1375_v28  ;;  %2033 = vmatmul.msk.bf16.gmra.mxu2 %vm620_vm0, %v2099_v19  ;;  %2049 = vmatmul.msk.bf16.gmra.mxu3 %vm620_vm0, %v2115_v20  ;;  %v2085_v26 = vld [vmem:[%s2186_s21 + $0xf8] sm:$0xff] }
  0xe9   : > { %v1408_v33 = vpack.c.bf16 %v1280_v29, %v1280_v29  ;;  %v1440_v34 = vpack.c.bf16 %v1312_v30, %v1312_v30  ;;  %v2101_v27 = vld [vmem:[%s2186_s21 + $0x178] sm:$0xff] }
  0xea   : > { %1600 = vst.msk [vmem:[%s2263_s24 + $0x124] sm:$0xf] %vm1526_vm1, %v1471_v31  ;;  %v2117_v28 = vld [vmem:[%s2186_s21 + $0x1f8] sm:$0xff] }
  0xeb   : > { %1632 = vst.msk [vmem:[%s2263_s24 + $0x1a4] sm:$0xf] %vm1526_vm1, %v1503_v32  ;;  %v1007_v35 = vpop.f32.mrf.mxu2  ;;  %v1087_v36 = vpop.f32.mrf.mxu3 }
  0xec   : > { %1537 = vst.msk [vmem:[%s2263_s24 + $0x28] sm:$0xf] %vm1526_vm1, %v1408_v33  ;;  %v1216_v37 = vmul.f32 0.2, %v1007_v35  ;;  %v1248_v38 = vmul.f32 0.2, %v1087_v36  ;;  %v849_v39 = vpop.f32.mrf.mxu0  ;;  %v929_v40 = vpop.f32.mrf.mxu1 }
  0xed   : > { %1569 = vst.msk [vmem:[%s2263_s24 + $0xa8] sm:$0xf] %vm1526_vm1, %v1440_v34  ;;  %v1153_v41 = vmul.f32 0.2, %v849_v39  ;;  %v1185_v42 = vmul.f32 0.2, %v929_v40 }
  0xee   : > { %v1344_v43 = vmax.f32 %v1007_v35, %v1216_v37  ;;  %v1376_v44 = vmax.f32 %v1087_v36, %v1248_v38 }
  0xef   : > { %v1281_v45 = vmax.f32 %v849_v39, %v1153_v41  ;;  %v1313_v46 = vmax.f32 %v929_v40, %v1185_v42 }
  0xf0   : > { %v1472_v47 = vpack.c.bf16 %v1344_v43, %v1344_v43  ;;  %v1504_v48 = vpack.c.bf16 %v1376_v44, %v1376_v44 }
  0xf1   : > { %v1409_v49 = vpack.c.bf16 %v1281_v45, %v1281_v45  ;;  %v1441_v50 = vpack.c.bf16 %v1313_v46, %v1313_v46 }
  0xf2   : > { %1601 = vst.msk [vmem:[%s2263_s24 + $0x128] sm:$0xf] %vm1526_vm1, %v1472_v47 }
  0xf3   : > { %1633 = vst.msk [vmem:[%s2263_s24 + $0x1a8] sm:$0xf] %vm1526_vm1, %v1504_v48  ;;  %v1009_v52 = vpop.f32.mrf.mxu2  ;;  %v1089_v53 = vpop.f32.mrf.mxu3 }
  0xf4   : > { %1538 = vst.msk [vmem:[%s2263_s24 + $0x2c] sm:$0xf] %vm1526_vm1, %v1409_v49  ;;  %v1217_v57 = vmul.f32 0.2, %v1009_v52  ;;  %v1249_v58 = vmul.f32 0.2, %v1089_v53  ;;  %v852_v59 = vpop.f32.mrf.mxu0  ;;  %v932_v60 = vpop.f32.mrf.mxu1 }
  0xf5   : > { %1570 = vst.msk [vmem:[%s2263_s24 + $0xac] sm:$0xf] %vm1526_vm1, %v1441_v50  ;;  %v1154_v61 = vmul.f32 0.2, %v852_v59  ;;  %v1186_v62 = vmul.f32 0.2, %v932_v60 }
  0xf6   : > { %v1345_v63 = vmax.f32 %v1009_v52, %v1217_v57  ;;  %v1377_v0 = vmax.f32 %v1089_v53, %v1249_v58 }
  0xf7   : > { %v1282_v1 = vmax.f32 %v852_v59, %v1154_v61  ;;  %v1314_v2 = vmax.f32 %v932_v60, %v1186_v62  ;;  %2002 = vmatmul.msk.bf16.gmra.mxu0 %vm620_vm0, %v2068_v51  ;;  %2018 = vmatmul.msk.bf16.gmra.mxu1 %vm620_vm0, %v2084_v54 }
  0xf8   : > { %v1473_v3 = vpack.c.bf16 %v1345_v63, %v1345_v63  ;;  %v1505_v4 = vpack.c.bf16 %v1377_v0, %v1377_v0  ;;  %2034 = vmatmul.msk.bf16.gmra.mxu2 %vm620_vm0, %v2100_v55  ;;  %2050 = vmatmul.msk.bf16.gmra.mxu3 %vm620_vm0, %v2116_v56 }
  0xf9   : > { %v1410_v5 = vpack.c.bf16 %v1282_v1, %v1282_v1  ;;  %v1442_v6 = vpack.c.bf16 %v1314_v2, %v1314_v2 }
  0xfa   : > { %1602 = vst.msk [vmem:[%s2263_s24 + $0x12c] sm:$0xf] %vm1526_vm1, %v1473_v3 }
  0xfb   : > { %1634 = vst.msk [vmem:[%s2263_s24 + $0x1ac] sm:$0xf] %vm1526_vm1, %v1505_v4  ;;  %v1012_v7 = vpop.f32.mrf.mxu2  ;;  %v1092_v8 = vpop.f32.mrf.mxu3 }
  0xfc   : > { %1539 = vst.msk [vmem:[%s2263_s24 + $0x30] sm:$0xf] %vm1526_vm1, %v1410_v5  ;;  %v1218_v9 = vmul.f32 0.2, %v1012_v7  ;;  %v1250_v10 = vmul.f32 0.2, %v1092_v8  ;;  %v854_v11 = vpop.f32.mrf.mxu0  ;;  %v934_v12 = vpop.f32.mrf.mxu1 }
  0xfd   : > { %1571 = vst.msk [vmem:[%s2263_s24 + $0xb0] sm:$0xf] %vm1526_vm1, %v1442_v6  ;;  %v1155_v13 = vmul.f32 0.2, %v854_v11  ;;  %v1187_v14 = vmul.f32 0.2, %v934_v12 }
  0xfe   : > { %v1346_v15 = vmax.f32 %v1012_v7, %v1218_v9  ;;  %v1378_v16 = vmax.f32 %v1092_v8, %v1250_v10 }
  0xff   : > { %v1283_v17 = vmax.f32 %v854_v11, %v1155_v13  ;;  %v1315_v18 = vmax.f32 %v934_v12, %v1187_v14 }
 0x100   : > { %v1474_v19 = vpack.c.bf16 %v1346_v15, %v1346_v15  ;;  %v1506_v20 = vpack.c.bf16 %v1378_v16, %v1378_v16 }
 0x101   : > { %v1411_v21 = vpack.c.bf16 %v1283_v17, %v1283_v17  ;;  %v1443_v22 = vpack.c.bf16 %v1315_v18, %v1315_v18 }
 0x102   : > { %1603 = vst.msk [vmem:[%s2263_s24 + $0x130] sm:$0xf] %vm1526_vm1, %v1474_v19 }
 0x103   : > { %1635 = vst.msk [vmem:[%s2263_s24 + $0x1b0] sm:$0xf] %vm1526_vm1, %v1506_v20  ;;  %v1014_v24 = vpop.f32.mrf.mxu2  ;;  %v1094_v25 = vpop.f32.mrf.mxu3 }
 0x104   : > { %1540 = vst.msk [vmem:[%s2263_s24 + $0x34] sm:$0xf] %vm1526_vm1, %v1411_v21  ;;  %v1219_v29 = vmul.f32 0.2, %v1014_v24  ;;  %v1251_v30 = vmul.f32 0.2, %v1094_v25  ;;  %v857_v31 = vpop.f32.mrf.mxu0  ;;  %v937_v32 = vpop.f32.mrf.mxu1 }
 0x105   : > { %1572 = vst.msk [vmem:[%s2263_s24 + $0xb4] sm:$0xf] %vm1526_vm1, %v1443_v22  ;;  %v1156_v33 = vmul.f32 0.2, %v857_v31  ;;  %v1188_v34 = vmul.f32 0.2, %v937_v32 }
 0x106   : > { %v1347_v35 = vmax.f32 %v1014_v24, %v1219_v29  ;;  %v1379_v36 = vmax.f32 %v1094_v25, %v1251_v30 }
 0x107   : > { %v1284_v37 = vmax.f32 %v857_v31, %v1156_v33  ;;  %v1316_v38 = vmax.f32 %v937_v32, %v1188_v34  ;;  %2003 = vmatmul.msk.bf16.gmra.mxu0 %vm620_vm0, %v2069_v23  ;;  %2019 = vmatmul.msk.bf16.gmra.mxu1 %vm620_vm0, %v2085_v26 }
 0x108   : > { %v1475_v39 = vpack.c.bf16 %v1347_v35, %v1347_v35  ;;  %v1507_v40 = vpack.c.bf16 %v1379_v36, %v1379_v36  ;;  %2035 = vmatmul.msk.bf16.gmra.mxu2 %vm620_vm0, %v2101_v27  ;;  %2051 = vmatmul.msk.bf16.gmra.mxu3 %vm620_vm0, %v2117_v28 }
 0x109   : > { %v1412_v41 = vpack.c.bf16 %v1284_v37, %v1284_v37  ;;  %v1444_v42 = vpack.c.bf16 %v1316_v38, %v1316_v38 }
 0x10a   : > { %1604 = vst.msk [vmem:[%s2263_s24 + $0x134] sm:$0xf] %vm1526_vm1, %v1475_v39 }
 0x10b   : > { %1636 = vst.msk [vmem:[%s2263_s24 + $0x1b4] sm:$0xf] %vm1526_vm1, %v1507_v40  ;;  %v1017_v43 = vpop.f32.mrf.mxu2  ;;  %v1097_v44 = vpop.f32.mrf.mxu3 }
 0x10c   : > { %1541 = vst.msk [vmem:[%s2263_s24 + $0x38] sm:$0xf] %vm1526_vm1, %v1412_v41  ;;  %v1220_v45 = vmul.f32 0.2, %v1017_v43  ;;  %v1252_v46 = vmul.f32 0.2, %v1097_v44  ;;  %v859_v47 = vpop.f32.mrf.mxu0  ;;  %v939_v48 = vpop.f32.mrf.mxu1 }
 0x10d   : > { %1573 = vst.msk [vmem:[%s2263_s24 + $0xb8] sm:$0xf] %vm1526_vm1, %v1444_v42  ;;  %v1157_v49 = vmul.f32 0.2, %v859_v47  ;;  %v1189_v50 = vmul.f32 0.2, %v939_v48 }
 0x10e   : > { %v1348_v51 = vmax.f32 %v1017_v43, %v1220_v45  ;;  %v1380_v52 = vmax.f32 %v1097_v44, %v1252_v46 }
 0x10f   : > { %v1285_v53 = vmax.f32 %v859_v47, %v1157_v49  ;;  %v1317_v54 = vmax.f32 %v939_v48, %v1189_v50 }
 0x110   : > { %v1476_v55 = vpack.c.bf16 %v1348_v51, %v1348_v51  ;;  %v1508_v56 = vpack.c.bf16 %v1380_v52, %v1380_v52 }
 0x111   : > { %v1413_v57 = vpack.c.bf16 %v1285_v53, %v1285_v53  ;;  %v1445_v58 = vpack.c.bf16 %v1317_v54, %v1317_v54 }
 0x112   : > { %1605 = vst.msk [vmem:[%s2263_s24 + $0x138] sm:$0xf] %vm1526_vm1, %v1476_v55 }
 0x113   : > { %1637 = vst.msk [vmem:[%s2263_s24 + $0x1b8] sm:$0xf] %vm1526_vm1, %v1508_v56  ;;  %v1019_v59 = vpop.f32.mrf.mxu2  ;;  %v1099_v60 = vpop.f32.mrf.mxu3 }
 0x114   : > { %1542 = vst.msk [vmem:[%s2263_s24 + $0x3c] sm:$0xf] %vm1526_vm1, %v1413_v57  ;;  %v1221_v61 = vmul.f32 0.2, %v1019_v59  ;;  %v1253_v62 = vmul.f32 0.2, %v1099_v60  ;;  %v862_v63 = vpop.f32.mrf.mxu0  ;;  %v942_v0 = vpop.f32.mrf.mxu1 }
 0x115   : > { %1574 = vst.msk [vmem:[%s2263_s24 + $0xbc] sm:$0xf] %vm1526_vm1, %v1445_v58  ;;  %v1158_v1 = vmul.f32 0.2, %v862_v63  ;;  %v1190_v2 = vmul.f32 0.2, %v942_v0 }
 0x116   : > { %v1349_v3 = vmax.f32 %v1019_v59, %v1221_v61  ;;  %v1381_v4 = vmax.f32 %v1099_v60, %v1253_v62 }
 0x117   : > { %v1286_v5 = vmax.f32 %v862_v63, %v1158_v1  ;;  %v1318_v6 = vmax.f32 %v942_v0, %v1190_v2 }
 0x118   : > { %v1477_v7 = vpack.c.bf16 %v1349_v3, %v1349_v3  ;;  %v1509_v8 = vpack.c.bf16 %v1381_v4, %v1381_v4 }
 0x119   : > { %v1414_v9 = vpack.c.bf16 %v1286_v5, %v1286_v5  ;;  %v1446_v10 = vpack.c.bf16 %v1318_v6, %v1318_v6 }
 0x11a   : > { %1606 = vst.msk [vmem:[%s2263_s24 + $0x13c] sm:$0xf] %vm1526_vm1, %v1477_v7 }
 0x11b   : > { %1638 = vst.msk [vmem:[%s2263_s24 + $0x1bc] sm:$0xf] %vm1526_vm1, %v1509_v8  ;;  %v1022_v11 = vpop.f32.mrf.mxu2  ;;  %v1102_v12 = vpop.f32.mrf.mxu3 }
 0x11c   : > { %1543 = vst.msk [vmem:[%s2263_s24 + $0x40] sm:$0xf] %vm1526_vm1, %v1414_v9  ;;  %v1222_v13 = vmul.f32 0.2, %v1022_v11  ;;  %v1254_v14 = vmul.f32 0.2, %v1102_v12  ;;  %v864_v15 = vpop.f32.mrf.mxu0  ;;  %v944_v16 = vpop.f32.mrf.mxu1 }
 0x11d   : > { %1575 = vst.msk [vmem:[%s2263_s24 + $0xc0] sm:$0xf] %vm1526_vm1, %v1446_v10  ;;  %v1159_v17 = vmul.f32 0.2, %v864_v15  ;;  %v1191_v18 = vmul.f32 0.2, %v944_v16 }
 0x11e   : > { %v1350_v19 = vmax.f32 %v1022_v11, %v1222_v13  ;;  %v1382_v20 = vmax.f32 %v1102_v12, %v1254_v14 }
 0x11f   : > { %v1287_v21 = vmax.f32 %v864_v15, %v1159_v17  ;;  %v1319_v22 = vmax.f32 %v944_v16, %v1191_v18 }
 0x120   : > { %v1478_v23 = vpack.c.bf16 %v1350_v19, %v1350_v19  ;;  %v1510_v24 = vpack.c.bf16 %v1382_v20, %v1382_v20 }
 0x121   : > { %v1415_v25 = vpack.c.bf16 %v1287_v21, %v1287_v21  ;;  %v1447_v26 = vpack.c.bf16 %v1319_v22, %v1319_v22 }
 0x122   : > { %1607 = vst.msk [vmem:[%s2263_s24 + $0x140] sm:$0xf] %vm1526_vm1, %v1478_v23 }
 0x123   : > { %1639 = vst.msk [vmem:[%s2263_s24 + $0x1c0] sm:$0xf] %vm1526_vm1, %v1510_v24  ;;  %v1024_v27 = vpop.f32.mrf.mxu2  ;;  %v1104_v28 = vpop.f32.mrf.mxu3 }
 0x124   : > { %1544 = vst.msk [vmem:[%s2263_s24 + $0x44] sm:$0xf] %vm1526_vm1, %v1415_v25  ;;  %v1223_v29 = vmul.f32 0.2, %v1024_v27  ;;  %v1255_v30 = vmul.f32 0.2, %v1104_v28  ;;  %v867_v31 = vpop.f32.mrf.mxu0  ;;  %v947_v32 = vpop.f32.mrf.mxu1 }
 0x125   : > { %1576 = vst.msk [vmem:[%s2263_s24 + $0xc4] sm:$0xf] %vm1526_vm1, %v1447_v26  ;;  %v1160_v33 = vmul.f32 0.2, %v867_v31  ;;  %v1192_v34 = vmul.f32 0.2, %v947_v32 }
 0x126   : > { %v1351_v35 = vmax.f32 %v1024_v27, %v1223_v29  ;;  %v1383_v36 = vmax.f32 %v1104_v28, %v1255_v30 }
 0x127   : > { %v1288_v37 = vmax.f32 %v867_v31, %v1160_v33  ;;  %v1320_v38 = vmax.f32 %v947_v32, %v1192_v34 }
 0x128   : > { %v1479_v39 = vpack.c.bf16 %v1351_v35, %v1351_v35  ;;  %v1511_v40 = vpack.c.bf16 %v1383_v36, %v1383_v36 }
 0x129   : > { %v1416_v41 = vpack.c.bf16 %v1288_v37, %v1288_v37  ;;  %v1448_v42 = vpack.c.bf16 %v1320_v38, %v1320_v38 }
 0x12a   : > { %1608 = vst.msk [vmem:[%s2263_s24 + $0x144] sm:$0xf] %vm1526_vm1, %v1479_v39 }
 0x12b   : > { %1640 = vst.msk [vmem:[%s2263_s24 + $0x1c4] sm:$0xf] %vm1526_vm1, %v1511_v40  ;;  %v1027_v43 = vpop.f32.mrf.mxu2  ;;  %v1107_v44 = vpop.f32.mrf.mxu3 }
 0x12c   : > { %1545 = vst.msk [vmem:[%s2263_s24 + $0x48] sm:$0xf] %vm1526_vm1, %v1416_v41  ;;  %v1224_v45 = vmul.f32 0.2, %v1027_v43  ;;  %v1256_v46 = vmul.f32 0.2, %v1107_v44  ;;  %v869_v47 = vpop.f32.mrf.mxu0  ;;  %v949_v48 = vpop.f32.mrf.mxu1 }
 0x12d   : > { %1577 = vst.msk [vmem:[%s2263_s24 + $0xc8] sm:$0xf] %vm1526_vm1, %v1448_v42  ;;  %v1161_v49 = vmul.f32 0.2, %v869_v47  ;;  %v1193_v50 = vmul.f32 0.2, %v949_v48 }
 0x12e   : > { %v1352_v51 = vmax.f32 %v1027_v43, %v1224_v45  ;;  %v1384_v52 = vmax.f32 %v1107_v44, %v1256_v46 }
 0x12f   : > { %v1289_v53 = vmax.f32 %v869_v47, %v1161_v49  ;;  %v1321_v54 = vmax.f32 %v949_v48, %v1193_v50 }
 0x130   : > { %v1480_v55 = vpack.c.bf16 %v1352_v51, %v1352_v51  ;;  %v1512_v56 = vpack.c.bf16 %v1384_v52, %v1384_v52 }
 0x131   : > { %v1417_v57 = vpack.c.bf16 %v1289_v53, %v1289_v53  ;;  %v1449_v58 = vpack.c.bf16 %v1321_v54, %v1321_v54 }
 0x132   : > { %1609 = vst.msk [vmem:[%s2263_s24 + $0x148] sm:$0xf] %vm1526_vm1, %v1480_v55 }
 0x133   : > { %1641 = vst.msk [vmem:[%s2263_s24 + $0x1c8] sm:$0xf] %vm1526_vm1, %v1512_v56  ;;  %v1029_v59 = vpop.f32.mrf.mxu2  ;;  %v1109_v60 = vpop.f32.mrf.mxu3 }
 0x134   : > { %1546 = vst.msk [vmem:[%s2263_s24 + $0x4c] sm:$0xf] %vm1526_vm1, %v1417_v57  ;;  %v1225_v61 = vmul.f32 0.2, %v1029_v59  ;;  %v1257_v62 = vmul.f32 0.2, %v1109_v60  ;;  %v872_v63 = vpop.f32.mrf.mxu0  ;;  %v952_v0 = vpop.f32.mrf.mxu1 }
 0x135   : > { %1578 = vst.msk [vmem:[%s2263_s24 + $0xcc] sm:$0xf] %vm1526_vm1, %v1449_v58  ;;  %v1162_v1 = vmul.f32 0.2, %v872_v63  ;;  %v1194_v2 = vmul.f32 0.2, %v952_v0 }
 0x136   : > { %v1353_v3 = vmax.f32 %v1029_v59, %v1225_v61  ;;  %v1385_v4 = vmax.f32 %v1109_v60, %v1257_v62 }
 0x137   : > { %v1290_v5 = vmax.f32 %v872_v63, %v1162_v1  ;;  %v1322_v6 = vmax.f32 %v952_v0, %v1194_v2 }
 0x138   : > { %v1481_v7 = vpack.c.bf16 %v1353_v3, %v1353_v3  ;;  %v1513_v8 = vpack.c.bf16 %v1385_v4, %v1385_v4 }
 0x139   : > { %v1418_v9 = vpack.c.bf16 %v1290_v5, %v1290_v5  ;;  %v1450_v10 = vpack.c.bf16 %v1322_v6, %v1322_v6 }
 0x13a   : > { %1610 = vst.msk [vmem:[%s2263_s24 + $0x14c] sm:$0xf] %vm1526_vm1, %v1481_v7 }
 0x13b   : > { %1642 = vst.msk [vmem:[%s2263_s24 + $0x1cc] sm:$0xf] %vm1526_vm1, %v1513_v8  ;;  %v1032_v11 = vpop.f32.mrf.mxu2  ;;  %v1112_v12 = vpop.f32.mrf.mxu3 }
 0x13c   : > { %1547 = vst.msk [vmem:[%s2263_s24 + $0x50] sm:$0xf] %vm1526_vm1, %v1418_v9  ;;  %v1226_v13 = vmul.f32 0.2, %v1032_v11  ;;  %v1258_v14 = vmul.f32 0.2, %v1112_v12  ;;  %v874_v15 = vpop.f32.mrf.mxu0  ;;  %v954_v16 = vpop.f32.mrf.mxu1 }
 0x13d   : > { %1579 = vst.msk [vmem:[%s2263_s24 + $0xd0] sm:$0xf] %vm1526_vm1, %v1450_v10  ;;  %v1163_v17 = vmul.f32 0.2, %v874_v15  ;;  %v1195_v18 = vmul.f32 0.2, %v954_v16 }
 0x13e   : > { %v1354_v19 = vmax.f32 %v1032_v11, %v1226_v13  ;;  %v1386_v20 = vmax.f32 %v1112_v12, %v1258_v14 }
 0x13f   : > { %v1291_v21 = vmax.f32 %v874_v15, %v1163_v17  ;;  %v1323_v22 = vmax.f32 %v954_v16, %v1195_v18 }
 0x140   : > { %v1482_v23 = vpack.c.bf16 %v1354_v19, %v1354_v19  ;;  %v1514_v24 = vpack.c.bf16 %v1386_v20, %v1386_v20 }
 0x141   : > { %v1419_v25 = vpack.c.bf16 %v1291_v21, %v1291_v21  ;;  %v1451_v26 = vpack.c.bf16 %v1323_v22, %v1323_v22 }
 0x142   : > { %1611 = vst.msk [vmem:[%s2263_s24 + $0x150] sm:$0xf] %vm1526_vm1, %v1482_v23 }
 0x143   : > { %1643 = vst.msk [vmem:[%s2263_s24 + $0x1d0] sm:$0xf] %vm1526_vm1, %v1514_v24  ;;  %v1034_v27 = vpop.f32.mrf.mxu2  ;;  %v1114_v28 = vpop.f32.mrf.mxu3 }
 0x144   : > { %1548 = vst.msk [vmem:[%s2263_s24 + $0x54] sm:$0xf] %vm1526_vm1, %v1419_v25  ;;  %v1227_v29 = vmul.f32 0.2, %v1034_v27  ;;  %v1259_v30 = vmul.f32 0.2, %v1114_v28  ;;  %v877_v31 = vpop.f32.mrf.mxu0  ;;  %v957_v32 = vpop.f32.mrf.mxu1 }
 0x145   : > { %1580 = vst.msk [vmem:[%s2263_s24 + $0xd4] sm:$0xf] %vm1526_vm1, %v1451_v26  ;;  %v1164_v33 = vmul.f32 0.2, %v877_v31  ;;  %v1196_v34 = vmul.f32 0.2, %v957_v32 }
 0x146   : > { %v1355_v35 = vmax.f32 %v1034_v27, %v1227_v29  ;;  %v1387_v36 = vmax.f32 %v1114_v28, %v1259_v30 }
 0x147   : > { %v1292_v37 = vmax.f32 %v877_v31, %v1164_v33  ;;  %v1324_v38 = vmax.f32 %v957_v32, %v1196_v34 }
 0x148   : > { %v1483_v39 = vpack.c.bf16 %v1355_v35, %v1355_v35  ;;  %v1515_v40 = vpack.c.bf16 %v1387_v36, %v1387_v36 }
 0x149   : > { %v1420_v41 = vpack.c.bf16 %v1292_v37, %v1292_v37  ;;  %v1452_v42 = vpack.c.bf16 %v1324_v38, %v1324_v38 }
 0x14a   : > { %1612 = vst.msk [vmem:[%s2263_s24 + $0x154] sm:$0xf] %vm1526_vm1, %v1483_v39 }
 0x14b   : > { %1644 = vst.msk [vmem:[%s2263_s24 + $0x1d4] sm:$0xf] %vm1526_vm1, %v1515_v40  ;;  %v1037_v43 = vpop.f32.mrf.mxu2  ;;  %v1117_v44 = vpop.f32.mrf.mxu3 }
 0x14c   : > { %1549 = vst.msk [vmem:[%s2263_s24 + $0x58] sm:$0xf] %vm1526_vm1, %v1420_v41  ;;  %v1228_v45 = vmul.f32 0.2, %v1037_v43  ;;  %v1260_v46 = vmul.f32 0.2, %v1117_v44  ;;  %v879_v47 = vpop.f32.mrf.mxu0  ;;  %v959_v48 = vpop.f32.mrf.mxu1 }
 0x14d   : > { %1581 = vst.msk [vmem:[%s2263_s24 + $0xd8] sm:$0xf] %vm1526_vm1, %v1452_v42  ;;  %v1165_v49 = vmul.f32 0.2, %v879_v47  ;;  %v1197_v50 = vmul.f32 0.2, %v959_v48 }
 0x14e   : > { %v1356_v51 = vmax.f32 %v1037_v43, %v1228_v45  ;;  %v1388_v52 = vmax.f32 %v1117_v44, %v1260_v46 }
 0x14f   : > { %v1293_v53 = vmax.f32 %v879_v47, %v1165_v49  ;;  %v1325_v54 = vmax.f32 %v959_v48, %v1197_v50 }
 0x150   : > { %v1484_v55 = vpack.c.bf16 %v1356_v51, %v1356_v51  ;;  %v1516_v56 = vpack.c.bf16 %v1388_v52, %v1388_v52 }
 0x151   : > { %v1421_v57 = vpack.c.bf16 %v1293_v53, %v1293_v53  ;;  %v1453_v58 = vpack.c.bf16 %v1325_v54, %v1325_v54 }
 0x152   : > { %1613 = vst.msk [vmem:[%s2263_s24 + $0x158] sm:$0xf] %vm1526_vm1, %v1484_v55 }
 0x153   : > { %1645 = vst.msk [vmem:[%s2263_s24 + $0x1d8] sm:$0xf] %vm1526_vm1, %v1516_v56  ;;  %v1039_v59 = vpop.f32.mrf.mxu2  ;;  %v1119_v60 = vpop.f32.mrf.mxu3 }
 0x154   : > { %1550 = vst.msk [vmem:[%s2263_s24 + $0x5c] sm:$0xf] %vm1526_vm1, %v1421_v57  ;;  %v1229_v61 = vmul.f32 0.2, %v1039_v59  ;;  %v1261_v62 = vmul.f32 0.2, %v1119_v60  ;;  %v882_v63 = vpop.f32.mrf.mxu0  ;;  %v962_v0 = vpop.f32.mrf.mxu1 }
 0x155   : > { %1582 = vst.msk [vmem:[%s2263_s24 + $0xdc] sm:$0xf] %vm1526_vm1, %v1453_v58  ;;  %v1166_v1 = vmul.f32 0.2, %v882_v63  ;;  %v1198_v2 = vmul.f32 0.2, %v962_v0 }
 0x156   : > { %v1357_v3 = vmax.f32 %v1039_v59, %v1229_v61  ;;  %v1389_v4 = vmax.f32 %v1119_v60, %v1261_v62 }
 0x157   : > { %v1294_v5 = vmax.f32 %v882_v63, %v1166_v1  ;;  %v1326_v6 = vmax.f32 %v962_v0, %v1198_v2 }
 0x158   : > { %v1485_v7 = vpack.c.bf16 %v1357_v3, %v1357_v3  ;;  %v1517_v8 = vpack.c.bf16 %v1389_v4, %v1389_v4 }
 0x159   : > { %v1422_v9 = vpack.c.bf16 %v1294_v5, %v1294_v5  ;;  %v1454_v10 = vpack.c.bf16 %v1326_v6, %v1326_v6 }
 0x15a   : > { %1614 = vst.msk [vmem:[%s2263_s24 + $0x15c] sm:$0xf] %vm1526_vm1, %v1485_v7 }
 0x15b   : > { %1646 = vst.msk [vmem:[%s2263_s24 + $0x1dc] sm:$0xf] %vm1526_vm1, %v1517_v8  ;;  %v1042_v11 = vpop.f32.mrf.mxu2  ;;  %v1122_v12 = vpop.f32.mrf.mxu3 }
 0x15c   : > { %1551 = vst.msk [vmem:[%s2263_s24 + $0x60] sm:$0xf] %vm1526_vm1, %v1422_v9  ;;  %v1230_v13 = vmul.f32 0.2, %v1042_v11  ;;  %v1262_v14 = vmul.f32 0.2, %v1122_v12  ;;  %v884_v15 = vpop.f32.mrf.mxu0  ;;  %v964_v16 = vpop.f32.mrf.mxu1 }
 0x15d   : > { %1583 = vst.msk [vmem:[%s2263_s24 + $0xe0] sm:$0xf] %vm1526_vm1, %v1454_v10  ;;  %v1167_v17 = vmul.f32 0.2, %v884_v15  ;;  %v1199_v18 = vmul.f32 0.2, %v964_v16 }
 0x15e   : > { %v1358_v19 = vmax.f32 %v1042_v11, %v1230_v13  ;;  %v1390_v20 = vmax.f32 %v1122_v12, %v1262_v14 }
 0x15f   : > { %v1295_v21 = vmax.f32 %v884_v15, %v1167_v17  ;;  %v1327_v22 = vmax.f32 %v964_v16, %v1199_v18 }
 0x160   : > { %v1486_v23 = vpack.c.bf16 %v1358_v19, %v1358_v19  ;;  %v1518_v24 = vpack.c.bf16 %v1390_v20, %v1390_v20 }
 0x161   : > { %v1423_v25 = vpack.c.bf16 %v1295_v21, %v1295_v21  ;;  %v1455_v26 = vpack.c.bf16 %v1327_v22, %v1327_v22 }
 0x162   : > { %1615 = vst.msk [vmem:[%s2263_s24 + $0x160] sm:$0xf] %vm1526_vm1, %v1486_v23 }
 0x163   : > { %1647 = vst.msk [vmem:[%s2263_s24 + $0x1e0] sm:$0xf] %vm1526_vm1, %v1518_v24  ;;  %v1044_v27 = vpop.f32.mrf.mxu2  ;;  %v1124_v28 = vpop.f32.mrf.mxu3 }
 0x164   : > { %1552 = vst.msk [vmem:[%s2263_s24 + $0x64] sm:$0xf] %vm1526_vm1, %v1423_v25  ;;  %v1231_v29 = vmul.f32 0.2, %v1044_v27  ;;  %v1263_v30 = vmul.f32 0.2, %v1124_v28  ;;  %v887_v31 = vpop.f32.mrf.mxu0  ;;  %v967_v32 = vpop.f32.mrf.mxu1 }
 0x165   : > { %1584 = vst.msk [vmem:[%s2263_s24 + $0xe4] sm:$0xf] %vm1526_vm1, %v1455_v26  ;;  %v1168_v33 = vmul.f32 0.2, %v887_v31  ;;  %v1200_v34 = vmul.f32 0.2, %v967_v32 }
 0x166   : > { %v1359_v35 = vmax.f32 %v1044_v27, %v1231_v29  ;;  %v1391_v36 = vmax.f32 %v1124_v28, %v1263_v30 }
 0x167   : > { %v1296_v37 = vmax.f32 %v887_v31, %v1168_v33  ;;  %v1328_v38 = vmax.f32 %v967_v32, %v1200_v34 }
 0x168   : > { %v1487_v39 = vpack.c.bf16 %v1359_v35, %v1359_v35  ;;  %v1519_v40 = vpack.c.bf16 %v1391_v36, %v1391_v36 }
 0x169   : > { %v1424_v41 = vpack.c.bf16 %v1296_v37, %v1296_v37  ;;  %v1456_v42 = vpack.c.bf16 %v1328_v38, %v1328_v38 }
 0x16a   : > { %1616 = vst.msk [vmem:[%s2263_s24 + $0x164] sm:$0xf] %vm1526_vm1, %v1487_v39 }
 0x16b   : > { %1648 = vst.msk [vmem:[%s2263_s24 + $0x1e4] sm:$0xf] %vm1526_vm1, %v1519_v40  ;;  %v1047_v43 = vpop.f32.mrf.mxu2  ;;  %v1127_v44 = vpop.f32.mrf.mxu3 }
 0x16c   : > { %1553 = vst.msk [vmem:[%s2263_s24 + $0x68] sm:$0xf] %vm1526_vm1, %v1424_v41  ;;  %v1232_v45 = vmul.f32 0.2, %v1047_v43  ;;  %v1264_v46 = vmul.f32 0.2, %v1127_v44  ;;  %v889_v47 = vpop.f32.mrf.mxu0  ;;  %v969_v48 = vpop.f32.mrf.mxu1 }
 0x16d   : > { %1585 = vst.msk [vmem:[%s2263_s24 + $0xe8] sm:$0xf] %vm1526_vm1, %v1456_v42  ;;  %v1169_v49 = vmul.f32 0.2, %v889_v47  ;;  %v1201_v50 = vmul.f32 0.2, %v969_v48 }
 0x16e   : > { %v1360_v51 = vmax.f32 %v1047_v43, %v1232_v45  ;;  %v1392_v52 = vmax.f32 %v1127_v44, %v1264_v46 }
 0x16f   : > { %v1297_v53 = vmax.f32 %v889_v47, %v1169_v49  ;;  %v1329_v54 = vmax.f32 %v969_v48, %v1201_v50 }
 0x170   : > { %v1488_v55 = vpack.c.bf16 %v1360_v51, %v1360_v51  ;;  %v1520_v56 = vpack.c.bf16 %v1392_v52, %v1392_v52 }
 0x171   : > { %v1425_v57 = vpack.c.bf16 %v1297_v53, %v1297_v53  ;;  %v1457_v58 = vpack.c.bf16 %v1329_v54, %v1329_v54 }
 0x172   : > { %1617 = vst.msk [vmem:[%s2263_s24 + $0x168] sm:$0xf] %vm1526_vm1, %v1488_v55 }
 0x173   : > { %1649 = vst.msk [vmem:[%s2263_s24 + $0x1e8] sm:$0xf] %vm1526_vm1, %v1520_v56  ;;  %v1049_v59 = vpop.f32.mrf.mxu2  ;;  %v1129_v60 = vpop.f32.mrf.mxu3 }
 0x174   : > { %1554 = vst.msk [vmem:[%s2263_s24 + $0x6c] sm:$0xf] %vm1526_vm1, %v1425_v57  ;;  %v1233_v61 = vmul.f32 0.2, %v1049_v59  ;;  %v1265_v62 = vmul.f32 0.2, %v1129_v60  ;;  %v892_v63 = vpop.f32.mrf.mxu0  ;;  %v972_v0 = vpop.f32.mrf.mxu1 }
 0x175   : > { %1586 = vst.msk [vmem:[%s2263_s24 + $0xec] sm:$0xf] %vm1526_vm1, %v1457_v58  ;;  %v1170_v1 = vmul.f32 0.2, %v892_v63  ;;  %v1202_v2 = vmul.f32 0.2, %v972_v0 }
 0x176   : > { %v1361_v3 = vmax.f32 %v1049_v59, %v1233_v61  ;;  %v1393_v4 = vmax.f32 %v1129_v60, %v1265_v62 }
 0x177   : > { %v1298_v5 = vmax.f32 %v892_v63, %v1170_v1  ;;  %v1330_v6 = vmax.f32 %v972_v0, %v1202_v2 }
 0x178   : > { %v1489_v7 = vpack.c.bf16 %v1361_v3, %v1361_v3  ;;  %v1521_v8 = vpack.c.bf16 %v1393_v4, %v1393_v4 }
 0x179   : > { %v1426_v9 = vpack.c.bf16 %v1298_v5, %v1298_v5  ;;  %v1458_v10 = vpack.c.bf16 %v1330_v6, %v1330_v6 }
 0x17a   : > { %1618 = vst.msk [vmem:[%s2263_s24 + $0x16c] sm:$0xf] %vm1526_vm1, %v1489_v7 }
 0x17b   : > { %1650 = vst.msk [vmem:[%s2263_s24 + $0x1ec] sm:$0xf] %vm1526_vm1, %v1521_v8  ;;  %v1052_v11 = vpop.f32.mrf.mxu2  ;;  %v1132_v12 = vpop.f32.mrf.mxu3 }
 0x17c   : > { %1555 = vst.msk [vmem:[%s2263_s24 + $0x70] sm:$0xf] %vm1526_vm1, %v1426_v9  ;;  %v1234_v13 = vmul.f32 0.2, %v1052_v11  ;;  %v1266_v14 = vmul.f32 0.2, %v1132_v12  ;;  %v894_v15 = vpop.f32.mrf.mxu0  ;;  %v974_v16 = vpop.f32.mrf.mxu1 }
 0x17d   : > { %1587 = vst.msk [vmem:[%s2263_s24 + $0xf0] sm:$0xf] %vm1526_vm1, %v1458_v10  ;;  %v1171_v17 = vmul.f32 0.2, %v894_v15  ;;  %v1203_v18 = vmul.f32 0.2, %v974_v16 }
 0x17e   : > { %v1362_v19 = vmax.f32 %v1052_v11, %v1234_v13  ;;  %v1394_v20 = vmax.f32 %v1132_v12, %v1266_v14 }
 0x17f   : > { %v1299_v21 = vmax.f32 %v894_v15, %v1171_v17  ;;  %v1331_v22 = vmax.f32 %v974_v16, %v1203_v18 }
 0x180   : > { %v1490_v23 = vpack.c.bf16 %v1362_v19, %v1362_v19  ;;  %v1522_v24 = vpack.c.bf16 %v1394_v20, %v1394_v20 }
 0x181   : > { %v1427_v25 = vpack.c.bf16 %v1299_v21, %v1299_v21  ;;  %v1459_v26 = vpack.c.bf16 %v1331_v22, %v1331_v22 }
 0x182   : > { %1619 = vst.msk [vmem:[%s2263_s24 + $0x170] sm:$0xf] %vm1526_vm1, %v1490_v23 }
 0x183   : > { %1651 = vst.msk [vmem:[%s2263_s24 + $0x1f0] sm:$0xf] %vm1526_vm1, %v1522_v24  ;;  %v1054_v27 = vpop.f32.mrf.mxu2  ;;  %v1134_v28 = vpop.f32.mrf.mxu3 }
 0x184   : > { %1556 = vst.msk [vmem:[%s2263_s24 + $0x74] sm:$0xf] %vm1526_vm1, %v1427_v25  ;;  %v1235_v29 = vmul.f32 0.2, %v1054_v27  ;;  %v1267_v30 = vmul.f32 0.2, %v1134_v28  ;;  %v897_v31 = vpop.f32.mrf.mxu0  ;;  %v977_v32 = vpop.f32.mrf.mxu1 }
 0x185   : > { %1588 = vst.msk [vmem:[%s2263_s24 + $0xf4] sm:$0xf] %vm1526_vm1, %v1459_v26  ;;  %v1172_v33 = vmul.f32 0.2, %v897_v31  ;;  %v1204_v34 = vmul.f32 0.2, %v977_v32 }
 0x186   : > { %v1363_v35 = vmax.f32 %v1054_v27, %v1235_v29  ;;  %v1395_v36 = vmax.f32 %v1134_v28, %v1267_v30 }
 0x187   : > { %v1300_v37 = vmax.f32 %v897_v31, %v1172_v33  ;;  %v1332_v38 = vmax.f32 %v977_v32, %v1204_v34 }
 0x188   : > { %v1491_v39 = vpack.c.bf16 %v1363_v35, %v1363_v35  ;;  %v1523_v40 = vpack.c.bf16 %v1395_v36, %v1395_v36 }
 0x189   : > { %v1428_v41 = vpack.c.bf16 %v1300_v37, %v1300_v37  ;;  %v1460_v42 = vpack.c.bf16 %v1332_v38, %v1332_v38 }
 0x18a   : > { %1620 = vst.msk [vmem:[%s2263_s24 + $0x174] sm:$0xf] %vm1526_vm1, %v1491_v39 }
 0x18b   : > { %1652 = vst.msk [vmem:[%s2263_s24 + $0x1f4] sm:$0xf] %vm1526_vm1, %v1523_v40  ;;  %v1057_v43 = vpop.f32.mrf.mxu2  ;;  %v1137_v44 = vpop.f32.mrf.mxu3 }
 0x18c   : > { %1557 = vst.msk [vmem:[%s2263_s24 + $0x78] sm:$0xf] %vm1526_vm1, %v1428_v41  ;;  %v1236_v45 = vmul.f32 0.2, %v1057_v43  ;;  %v1268_v46 = vmul.f32 0.2, %v1137_v44  ;;  %v899_v47 = vpop.f32.mrf.mxu0  ;;  %v979_v48 = vpop.f32.mrf.mxu1 }
 0x18d   : > { %1589 = vst.msk [vmem:[%s2263_s24 + $0xf8] sm:$0xf] %vm1526_vm1, %v1460_v42  ;;  %v1173_v49 = vmul.f32 0.2, %v899_v47  ;;  %v1205_v50 = vmul.f32 0.2, %v979_v48 }
 0x18e   : > { %v1364_v51 = vmax.f32 %v1057_v43, %v1236_v45  ;;  %v1396_v52 = vmax.f32 %v1137_v44, %v1268_v46 }
 0x18f   : > { %v1301_v53 = vmax.f32 %v899_v47, %v1173_v49  ;;  %v1333_v54 = vmax.f32 %v979_v48, %v1205_v50 }
 0x190   : > { %v1492_v55 = vpack.c.bf16 %v1364_v51, %v1364_v51  ;;  %v1524_v56 = vpack.c.bf16 %v1396_v52, %v1396_v52 }
 0x191   : > { %v1429_v57 = vpack.c.bf16 %v1301_v53, %v1301_v53  ;;  %v1461_v58 = vpack.c.bf16 %v1333_v54, %v1333_v54 }
 0x192   : > { %1621 = vst.msk [vmem:[%s2263_s24 + $0x178] sm:$0xf] %vm1526_vm1, %v1492_v55 }
 0x193   : > { %1653 = vst.msk [vmem:[%s2263_s24 + $0x1f8] sm:$0xf] %vm1526_vm1, %v1524_v56  ;;  %v1059_v59 = vpop.f32.mrf.mxu2  ;;  %v1139_v60 = vpop.f32.mrf.mxu3 }
 0x194   : > { %1558 = vst.msk [vmem:[%s2263_s24 + $0x7c] sm:$0xf] %vm1526_vm1, %v1429_v57  ;;  %v1237_v61 = vmul.f32 0.2, %v1059_v59  ;;  %v1269_v62 = vmul.f32 0.2, %v1139_v60 }
 0x195   : > { %1590 = vst.msk [vmem:[%s2263_s24 + $0xfc] sm:$0xf] %vm1526_vm1, %v1461_v58 }
 0x196   : > { %v1365_v63 = vmax.f32 %v1059_v59, %v1237_v61  ;;  %v1397_v0 = vmax.f32 %v1139_v60, %v1269_v62 }
 0x198   : > { %v1493_v1 = vpack.c.bf16 %v1365_v63, %v1365_v63  ;;  %v1525_v2 = vpack.c.bf16 %v1397_v0, %v1397_v0 }
 0x19a   : > { %1622 = vst.msk [vmem:[%s2263_s24 + $0x17c] sm:$0xf] %vm1526_vm1, %v1493_v1 }
 0x19b   : > { %1654 = vst.msk [vmem:[%s2263_s24 + $0x1fc] sm:$0xf] %vm1526_vm1, %v1525_v2 }
 0x19c PF: > { %s12_s9 = sadd.s32 1, %s2144_s9  }
 0x19d   : > { %p9_p4 = scmp.ge.s32.totalorder %s12_s9, 4  }
 0x19f   :  { %11 = sbr.rel (!%p9_p4) target bundleno = 1 (0x1), region = 58 }

// kernel: discriminator_forward.5
= control target key start
LH: loop header
LB: loop body
LE: loop exit
PB: predicated region body
PF: predicated region fallthrough
CT: control target
= control target key end

     0   :  { %s2749_s12 = smov 0   ;;  %s3383_s0 = inlined_call_operand.vmem [shape: bf16[2,17,17,32], index: 0, kind: input, shape index: {}]   ;;  %s3384_s1 = inlined_call_operand.vmem [shape: bf16[2,2,32,16], index: 1, kind: input, shape index: {}]   ;;  %s3385_s2 = inlined_call_operand.vmem [shape: bf16[2,16,16,16], index: 2, kind: output, shape index: {0}]   ;;  %s3386_s3 = inlined_call_operand.vmem [shape: f32[2,2,16], index: 3, kind: output, shape index: {1}]  }
   0x1 LB: > { %s2344_s13 = sadd.s32 4294967295, %s2727_s12   ;;  %p2348_p0 = scmp.ge.s32.totalorder %s2727_s12, 1  ;;  %s2727_s12 = sphi %s2749_s12, %s14_s12  }
   0x2   : > { %p140_p1 = scmp.lt.s32.totalorder %s2727_s12, 3 }
   0x4   : > { %p141_p2 = pnand %p2348_p0, %p140_p1 }
   0x5   : > { %p168_p3 = scmp.lt.s32.totalorder (!%p141_p2), %s2344_s13, 1 }
   0x6   : > { %144 = sbr.rel (%p141_p2) target bundleno = 433 (0x1b1), region = 28 }
   0xb   : > { %v2709_v0 = vld [vmem:[%s3384_s1 + $0x28] sm:$0xff]  ;;  %v2691_v2 = vld [vmem:[%s3384_s1 + $0x18] sm:$0xff]  ;;  %v2708_v4 = vld [vmem:[%s3384_s1 + $0x20] sm:$0xff]  ;;  %s3390_s13 = smov (!%p168_p3, %s2344_s13), 1  ;;  %vm687_vm0 = vcmask 261120   ;;  %vm2225_vm4 = vcmask 125952  }
   0xc   : > { %v2689_v1 = vld [vmem:[%s3384_s1 + $0x8] sm:$0xff]  ;;  %v2711_v3 = vld [vmem:[%s3384_s1 + $0x38] sm:$0xff]  ;;  %1238 = vmatpush.bf16.msra.mxu2 %v2709_v0  ;;  %v2688_v5 = vld [vmem:[%s3384_s1] sm:$0xff]  ;;  %742 = vmatpush.bf16.msra.mxu0 %v2691_v2  ;;  %s2712_s30 = smul.u32 204, %s3390_s13  ;;  %vm235_vm1 = vsmask.f32 3328 }
   0xd   : > { %971 = vmatpush.bf16.msra.mxu1 %v2689_v1  ;;  %1904 = vmatpush.bf16.msra.mxu3 %v2711_v3  ;;  %v2690_v6 = vld [vmem:[%s3384_s1 + $0x10] sm:$0xff]  ;;  %vm236_vm2 = vsmask.f32 7440  ;;  %s2671_s7 = sshll.u32 %s3390_s13, 7  ;;  %vm2019_vm5 = vcmask 130048   ;;  %s2352_s11 = sshll.u32 %s3390_s13, 1 }
   0xe   : > { %v2710_v7 = vld [vmem:[%s3384_s1 + $0x30] sm:$0xff]  ;;  %s2787_s6 = scalar_lea.vmem %s3383_s0, %s2712_s30  ;;  %vm2802_vm3 = vmor %vm235_vm1, %vm236_vm2  ;;  %s3017_s10 = scalar_lea.vmem %s3385_s2, %s2671_s7  ;;  %vm2089_vm6 = vcmask 122880  }
   0xf   : > { %v2692_v8 = vld [vmem:[%s2787_s6 + $0xc] sm:$0xff]  ;;  %v2672_v9 = vld [vmem:[%s2787_s6] sm:$0xff]  ;;  %v219_v12 = vld [vmem:[%s2787_s6 + $0x8] sm:$0x1]  ;;  %s181_s16 = scalar_lea.vmem %s3386_s3, %s2352_s11 }
  0x10   : > { %1239 = vmatpush.bf16.msra.mxu2 %v2708_v4  ;;  %743 = vmatpush.bf16.msra.mxu0 %v2690_v6  ;;  %v183_v10 = vld [vmem:[%s2787_s6] sm:$0xf]  ;;  %v184_v11 = vld [vmem:[%s2787_s6 + $0x4] sm:$0xf]  ;;  %v258_v17 = vshll.u32 %v219_v12, 16  ;;  %v2693_v6 = vld [vmem:[%s2787_s6 + $0x18] sm:$0xff] }
  0x11   : > { %972 = vmatpush.bf16.msra.mxu1 %v2688_v5  ;;  %1905 = vmatpush.bf16.msra.mxu3 %v2710_v7  ;;  %v239_v13 = vshrl.u32 %v183_v10, 16  ;;  %v242_v14 = vshll.u32 %v183_v10, 16  ;;  %v248_v15 = vshll.u32 %v184_v11, 16  ;;  %v252_v16 = vshrl.u32 %v184_v11, 16  ;;  %v2593_v18 = vld [vmem:[%s2787_s6 + $0xc] sm:$0xf] }
  0x12   : > { %v2594_v21 = vld [vmem:[%s2787_s6 + $0x10] sm:$0xf]  ;;  %v2595_v22 = vld [vmem:[%s2787_s6 + $0x14] sm:$0x1]  ;;  %v1402_v25 = vshrl.u32 %v2593_v18, 16  ;;  %v1405_v27 = vshll.u32 %v2593_v18, 16 }
  0x13   : > { %2577 = vmatmul.msk.bf16.vlgmr.msra.gmra.mxu2 %vm687_vm0, %v2692_v8  ;;  %v241_v19 = vrot.slane %v239_v13, 4  ;;  %v244_v20 = vrot.slane %v242_v14, 5  ;;  %v250_v23 = vrot.slane %v248_v15, 5  ;;  %v254_v24 = vrot.slane %v252_v16, 4  ;;  %v185_v30 = vld [vmem:[%s2787_s6 + $0xc] sm:$0xf] }
  0x14   : > { %2453 = vmatmul.msk.bf16.vlgmr.msra.gmra.mxu1 %vm687_vm0, %v2672_v9  ;;  %v1411_v28 = vshll.u32 %v2594_v21, 16  ;;  %v1415_v29 = vshrl.u32 %v2594_v21, 16  ;;  %v260_v33 = vrot.slane %v258_v17, 5  ;;  %v1404_v34 = vrot.slane %v1402_v25, 4  ;;  %v186_v36 = vld [vmem:[%s2787_s6 + $0x10] sm:$0xf] }
  0x15   : > { %v245_v26 = vor.u32 %v244_v20, %v241_v19  ;;  %v255_v32 = vor.u32 %v254_v24, %v250_v23  ;;  %v1421_v35 = vshll.u32 %v2595_v22, 16  ;;  %v1407_v38 = vrot.slane %v1405_v27, 5  ;;  %v220_v48 = vld [vmem:[%s2787_s6 + $0x14] sm:$0x1]  ;;  %v2596_v50 = vld [vmem:[%s2787_s6 + $0x18] sm:$0xf] }
  0x16   : > { %v1413_v39 = vrot.slane %v1411_v28, 5  ;;  %v1417_v40 = vrot.slane %v1415_v29, 4  ;;  %v263_v43 = vshrl.u32 %v185_v30, 16  ;;  %v266_v44 = vshll.u32 %v185_v30, 16  ;;  %v2597_v62 = vld [vmem:[%s2787_s6 + $0x1c] sm:$0xf] }
  0x17   : > { %v246_v37 = vrot.slane %v245_v26, 4  ;;  %v256_v41 = vrot.slane %v255_v32, 4  ;;  %v1423_v42 = vrot.slane %v1421_v35, 5  ;;  %v1408_v46 = vor.u32 %v1407_v38, %v1404_v34  ;;  %v2673_v7 = vld [vmem:[%s2787_s6 + $0xc] sm:$0xff]  ;;  %v2598_v9 = vld [vmem:[%s2787_s6 + $0x20] sm:$0x1] }
  0x18   : > { %v1418_v47 = vor.u32 %v1417_v40, %v1413_v39  ;;  %v272_v49 = vshll.u32 %v186_v36, 16  ;;  %v265_v53 = vrot.slane %v263_v43, 4  ;;  %v268_v54 = vrot.slane %v266_v44, 5  ;;  %v187_v14 = vld [vmem:[%s2787_s6 + $0x18] sm:$0xf] }
  0x19   : > { %v251_v45 = vsel %vm2802_vm3, %v246_v37, %v250_v23  ;;  %v261_v51 = vsel %vm2802_vm3, %v256_v41, %v260_v33  ;;  %v1409_v56 = vrot.slane %v1408_v46, 4  ;;  %v276_v60 = vshrl.u32 %v186_v36, 16  ;;  %v188_v22 = vld [vmem:[%s2787_s6 + $0x1c] sm:$0xf]  ;;  %v2599_v35 = vld [vmem:[%s2787_s6 + $0x24] sm:$0xf] }
  0x1a   : > { %v627_v52 = vunpack.c.l.b16 %v251_v45  ;;  %v628_v55 = vunpack.c.l.b16 %v261_v51  ;;  %v1419_v57 = vrot.slane %v1418_v47, 4  ;;  %v274_v58 = vrot.slane %v272_v49, 5  ;;  %v2600_v36 = vld [vmem:[%s2787_s6 + $0x28] sm:$0xf]  ;;  %v221_v49 = vld [vmem:[%s2787_s6 + $0x20] sm:$0x1] }
  0x1b   : > { %v269_v59 = vor.u32 %v268_v54, %v265_v53  ;;  %v282_v61 = vshll.u32 %v220_v48, 16  ;;  %v1426_v63 = vshrl.u32 %v2596_v50, 16  ;;  %v1414_v1 = vsel %vm2802_vm3, %v1409_v56, %v1413_v39 }
  0x1c   : > { %v659_v0 = vpack.c.b16 %v628_v55, %v627_v52  ;;  %v1424_v2 = vsel %vm2802_vm3, %v1419_v57, %v1423_v42  ;;  %v1429_v3 = vshll.u32 %v2596_v50, 16  ;;  %v1790_v4 = vunpack.c.l.b16 %v1414_v1 }
  0x1d   : > { %v1791_v5 = vunpack.c.l.b16 %v1424_v2  ;;  %v278_v8 = vrot.slane %v276_v60, 4  ;;  %v270_v10 = vrot.slane %v269_v59, 4  ;;  %v1428_v11 = vrot.slane %v1426_v63, 4  ;;  %v2601_v60 = vld [vmem:[%s2787_s6 + $0x2c] sm:$0x1] }
  0x1e   : > { %2365 = vmatmul.msk.bf16.vlgmr.msra.gmra.mxu0 %vm687_vm0, %v659_v0  ;;  %v1431_v12 = vrot.slane %v1429_v3, 5  ;;  %v1435_v13 = vshll.u32 %v2597_v62, 16  ;;  %v284_v17 = vrot.slane %v282_v61, 5  ;;  %v1439_v18 = vshrl.u32 %v2597_v62, 16  ;;  %v2694_v0 = vld [vmem:[%s2787_s6 + $0x24] sm:$0xff]  ;;  %v2674_v3 = vld [vmem:[%s2787_s6 + $0x18] sm:$0xff] }
  0x1f   : > { %v1822_v15 = vpack.c.b16 %v1791_v5, %v1790_v4  ;;  %v279_v16 = vor.u32 %v278_v8, %v274_v58  ;;  %v1445_v21 = vshll.u32 %v2598_v9, 16  ;;  %v287_v25 = vshrl.u32 %v187_v14, 16  ;;  %v189_v2 = vld [vmem:[%s2787_s6 + $0x24] sm:$0xf] }
  0x20   : > { %v1432_v19 = vor.u32 %v1431_v12, %v1428_v11  ;;  %v1437_v20 = vrot.slane %v1435_v13, 5  ;;  %v1441_v24 = vrot.slane %v1439_v18, 4  ;;  %v290_v26 = vshll.u32 %v187_v14, 16 }
  0x21   : > { %2653 = vmatmul.msk.bf16.vlgmr.msra.gmra.mxu3 %vm687_vm0, %v1822_v15  ;;  %v280_v23 = vrot.slane %v279_v16, 4  ;;  %v275_v27 = vsel %vm2802_vm3, %v270_v10, %v274_v58  ;;  %v1447_v29 = vrot.slane %v1445_v21, 5  ;;  %v296_v33 = vshll.u32 %v188_v22, 16 }
  0x22   : > { %v1433_v28 = vrot.slane %v1432_v19, 4  ;;  %v1442_v32 = vor.u32 %v1441_v24, %v1437_v20  ;;  %v300_v34 = vshrl.u32 %v188_v22, 16  ;;  %v629_v37 = vunpack.c.l.b16 %v275_v27  ;;  %v2603_v19 = vld [vmem:[%s2787_s6 + $0x34] sm:$0xf]  ;;  %v222_v24 = vld [vmem:[%s2787_s6 + $0x2c] sm:$0x1] }
  0x23   : > { %2578 = vmatmul.msk.bf16.gmra.mxu2 %vm687_vm0, %v2693_v6  ;;  %v285_v30 = vsel %vm2802_vm3, %v280_v23, %v284_v17  ;;  %v289_v39 = vrot.slane %v287_v25, 4  ;;  %v292_v40 = vrot.slane %v290_v26, 5  ;;  %v1450_v43 = vshrl.u32 %v2599_v35, 16  ;;  %v190_v6 = vld [vmem:[%s2787_s6 + $0x28] sm:$0xf] }
  0x24   : > { %2454 = vmatmul.msk.bf16.gmra.mxu1 %vm687_vm0, %v2673_v7  ;;  %v1443_v38 = vrot.slane %v1442_v32, 4  ;;  %v630_v41 = vunpack.c.l.b16 %v285_v30  ;;  %v1438_v42 = vsel %vm2802_vm3, %v1433_v28, %v1437_v20  ;;  %v1453_v44 = vshll.u32 %v2599_v35, 16  ;;  %v2602_v17 = vld [vmem:[%s2787_s6 + $0x30] sm:$0xf] }
  0x25   : > { %v298_v46 = vrot.slane %v296_v33, 5  ;;  %v302_v47 = vrot.slane %v300_v34, 4  ;;  %v1459_v48 = vshll.u32 %v2600_v36, 16  ;;  %v1452_v50 = vrot.slane %v1450_v43, 4 }
  0x26   : > { %v1448_v45 = vsel %vm2802_vm3, %v1443_v38, %v1447_v29  ;;  %v1455_v51 = vrot.slane %v1453_v44, 5  ;;  %v1792_v52 = vunpack.c.l.b16 %v1438_v42  ;;  %v293_v54 = vor.u32 %v292_v40, %v289_v39  ;;  %v2604_v39 = vld [vmem:[%s2787_s6 + $0x38] sm:$0x1] }
  0x27   : > { %v1793_v53 = vunpack.c.l.b16 %v1448_v45  ;;  %v1463_v55 = vshrl.u32 %v2600_v36, 16  ;;  %v660_v56 = vpack.c.b16 %v630_v41, %v629_v37  ;;  %v1461_v57 = vrot.slane %v1459_v48, 5  ;;  %v2695_v48 = vld [vmem:[%s2787_s6 + $0x30] sm:$0xff] }
  0x28   : > { %v303_v58 = vor.u32 %v302_v47, %v298_v46  ;;  %v306_v59 = vshll.u32 %v221_v49, 16  ;;  %v1456_v62 = vor.u32 %v1455_v51, %v1452_v50  ;;  %v294_v1 = vrot.slane %v293_v54, 4 }
  0x29   : > { %v1465_v61 = vrot.slane %v1463_v55, 4  ;;  %v1823_v63 = vpack.c.b16 %v1793_v53, %v1792_v52  ;;  %v1469_v5 = vshll.u32 %v2601_v60, 16  ;;  %v311_v10 = vshrl.u32 %v189_v2, 16  ;;  %v191_v52 = vld [vmem:[%s2787_s6 + $0x30] sm:$0xf]  ;;  %v2675_v53 = vld [vmem:[%s2787_s6 + $0x24] sm:$0xff] }
  0x2a   : > { %v304_v7 = vrot.slane %v303_v58, 4  ;;  %v308_v8 = vrot.slane %v306_v59, 5  ;;  %v1457_v9 = vrot.slane %v1456_v62, 4  ;;  %v314_v11 = vshll.u32 %v189_v2, 16  ;;  %v192_v55 = vld [vmem:[%s2787_s6 + $0x34] sm:$0xf] }
  0x2b   : > { %v1466_v4 = vor.u32 %v1465_v61, %v1461_v57  ;;  %v299_v12 = vsel %vm2802_vm3, %v294_v1, %v298_v46  ;;  %v320_v13 = vshll.u32 %v190_v6, 16  ;;  %v324_v14 = vshrl.u32 %v190_v6, 16  ;;  %v2605_v61 = vld [vmem:[%s2787_s6 + $0x3c] sm:$0xf]  ;;  %v2606_v2 = vld [vmem:[%s2787_s6 + $0x40] sm:$0xf] }
  0x2c   : > { %v1471_v16 = vrot.slane %v1469_v5, 5  ;;  %v309_v18 = vsel %vm2802_vm3, %v304_v7, %v308_v8  ;;  %v631_v20 = vunpack.c.l.b16 %v299_v12  ;;  %v1462_v21 = vsel %vm2802_vm3, %v1457_v9, %v1461_v57 }
  0x2d   : > { %v1467_v15 = vrot.slane %v1466_v4, 4  ;;  %v313_v22 = vrot.slane %v311_v10, 4  ;;  %v316_v23 = vrot.slane %v314_v11, 5  ;;  %v322_v25 = vrot.slane %v320_v13, 5 }
  0x2e   : > { %2366 = vmatmul.msk.bf16.gmra.mxu0 %vm687_vm0, %v660_v56  ;;  %v326_v26 = vrot.slane %v324_v14, 4  ;;  %v1474_v27 = vshrl.u32 %v2602_v17, 16  ;;  %v1477_v28 = vshll.u32 %v2602_v17, 16  ;;  %v632_v29 = vunpack.c.l.b16 %v309_v18 }
  0x2f   : > { %v1472_v30 = vsel %vm2802_vm3, %v1467_v15, %v1471_v16  ;;  %v1483_v32 = vshll.u32 %v2603_v19, 16  ;;  %v1487_v33 = vshrl.u32 %v2603_v19, 16  ;;  %v1794_v34 = vunpack.c.l.b16 %v1462_v21  ;;  %v223_v15 = vld [vmem:[%s2787_s6 + $0x38] sm:$0x1] }
  0x30   : > { %v317_v35 = vor.u32 %v316_v23, %v313_v22  ;;  %v330_v36 = vshll.u32 %v222_v24, 16  ;;  %v1795_v37 = vunpack.c.l.b16 %v1472_v30  ;;  %v327_v38 = vor.u32 %v326_v26, %v322_v25  ;;  %v2607_v26 = vld [vmem:[%s2787_s6 + $0x44] sm:$0x1] }
  0x31   : > { %2654 = vmatmul.msk.bf16.gmra.mxu3 %vm687_vm0, %v1823_v63  ;;  %v1476_v40 = vrot.slane %v1474_v27, 4  ;;  %v1479_v41 = vrot.slane %v1477_v28, 5  ;;  %v661_v42 = vpack.c.b16 %v632_v29, %v631_v20  ;;  %v1485_v43 = vrot.slane %v1483_v32, 5  ;;  %v2696_v28 = vld [vmem:[%s2787_s6 + $0x3c] sm:$0xff] }
  0x32   : > { %v1489_v44 = vrot.slane %v1487_v33, 4  ;;  %v332_v45 = vrot.slane %v330_v36, 5  ;;  %v1493_v46 = vshll.u32 %v2604_v39, 16  ;;  %v1824_v47 = vpack.c.b16 %v1795_v37, %v1794_v34  ;;  %v2676_v33 = vld [vmem:[%s2787_s6 + $0x30] sm:$0xff]  ;;  %v193_v37 = vld [vmem:[%s2787_s6 + $0x3c] sm:$0xf] }
  0x33   : > { %2579 = vmatmul.msk.bf16.gmra.mxu2 %vm687_vm0, %v2694_v0  ;;  %v318_v49 = vrot.slane %v317_v35, 4  ;;  %v328_v50 = vrot.slane %v327_v38, 4  ;;  %v1480_v51 = vor.u32 %v1479_v41, %v1476_v40  ;;  %v335_v56 = vshrl.u32 %v191_v52, 16  ;;  %v194_v38 = vld [vmem:[%s2787_s6 + $0x40] sm:$0xf] }
  0x34   : > { %2455 = vmatmul.msk.bf16.gmra.mxu1 %vm687_vm0, %v2674_v3  ;;  %v1490_v54 = vor.u32 %v1489_v44, %v1485_v43  ;;  %v1495_v60 = vrot.slane %v1493_v46, 5  ;;  %v338_v63 = vshll.u32 %v191_v52, 16  ;;  %v344_v0 = vshll.u32 %v192_v55, 16  ;;  %v2608_v39 = vld [vmem:[%s2787_s6 + $0x48] sm:$0xf] }
  0x35   : > { %v323_v57 = vsel %vm2802_vm3, %v318_v49, %v322_v25  ;;  %v333_v58 = vsel %vm2802_vm3, %v328_v50, %v332_v45  ;;  %v1481_v59 = vrot.slane %v1480_v51, 4  ;;  %v348_v1 = vshrl.u32 %v192_v55, 16  ;;  %v2609_v49 = vld [vmem:[%s2787_s6 + $0x4c] sm:$0xf] }
  0x36   : > { %v1491_v62 = vrot.slane %v1490_v54, 4  ;;  %v633_v3 = vunpack.c.l.b16 %v323_v57  ;;  %v634_v4 = vunpack.c.l.b16 %v333_v58  ;;  %v337_v5 = vrot.slane %v335_v56, 4 }
  0x37   : > { %v1498_v6 = vshrl.u32 %v2605_v61, 16  ;;  %v1486_v7 = vsel %vm2802_vm3, %v1481_v59, %v1485_v43  ;;  %v1501_v8 = vshll.u32 %v2605_v61, 16  ;;  %v1507_v9 = vshll.u32 %v2606_v2, 16 }
  0x38   : > { %v1511_v10 = vshrl.u32 %v2606_v2, 16  ;;  %v1496_v11 = vsel %vm2802_vm3, %v1491_v62, %v1495_v60  ;;  %v340_v12 = vrot.slane %v338_v63, 5  ;;  %v346_v13 = vrot.slane %v344_v0, 5  ;;  %v224_v0 = vld [vmem:[%s2787_s6 + $0x44] sm:$0x1] }
  0x39   : > { %v350_v14 = vrot.slane %v348_v1, 4  ;;  %v1796_v16 = vunpack.c.l.b16 %v1486_v7  ;;  %v1500_v17 = vrot.slane %v1498_v6, 4  ;;  %v1797_v18 = vunpack.c.l.b16 %v1496_v11 }
  0x3a   : > { %v1503_v19 = vrot.slane %v1501_v8, 5  ;;  %v1509_v20 = vrot.slane %v1507_v9, 5  ;;  %v1513_v21 = vrot.slane %v1511_v10, 4  ;;  %v662_v22 = vpack.c.b16 %v634_v4, %v633_v3  ;;  %v2610_v9 = vld [vmem:[%s2787_s6 + $0x50] sm:$0x1] }
  0x3b   : > { %v341_v23 = vor.u32 %v340_v12, %v337_v5  ;;  %v351_v24 = vor.u32 %v350_v14, %v346_v13  ;;  %v354_v25 = vshll.u32 %v223_v15, 16  ;;  %v1825_v27 = vpack.c.b16 %v1797_v18, %v1796_v16  ;;  %v2697_v12 = vld [vmem:[%s2787_s6 + $0x48] sm:$0xff]  ;;  %v2677_v14 = vld [vmem:[%s2787_s6 + $0x3c] sm:$0xff] }
  0x3c   : > { %v1504_v29 = vor.u32 %v1503_v19, %v1500_v17  ;;  %v1514_v30 = vor.u32 %v1513_v21, %v1509_v20  ;;  %v1517_v32 = vshll.u32 %v2607_v26, 16  ;;  %v359_v45 = vshrl.u32 %v193_v37, 16  ;;  %v196_v17 = vld [vmem:[%s2787_s6 + $0x4c] sm:$0xf]  ;;  %v2611_v26 = vld [vmem:[%s2787_s6 + $0x54] sm:$0xf] }
  0x3d   : > { %v342_v34 = vrot.slane %v341_v23, 4  ;;  %v352_v35 = vrot.slane %v351_v24, 4  ;;  %v356_v36 = vrot.slane %v354_v25, 5  ;;  %v362_v46 = vshll.u32 %v193_v37, 16 }
  0x3e   : > { %2367 = vmatmul.msk.bf16.gmra.mxu0 %vm687_vm0, %v661_v42  ;;  %v1505_v40 = vrot.slane %v1504_v29, 4  ;;  %v1515_v41 = vrot.slane %v1514_v30, 4  ;;  %v1519_v42 = vrot.slane %v1517_v32, 5  ;;  %v1522_v50 = vshrl.u32 %v2608_v39, 16 }
  0x3f   : > { %v347_v43 = vsel %vm2802_vm3, %v342_v34, %v346_v13  ;;  %v357_v44 = vsel %vm2802_vm3, %v352_v35, %v356_v36  ;;  %v1525_v51 = vshll.u32 %v2608_v39, 16  ;;  %v361_v56 = vrot.slane %v359_v45, 4  ;;  %v195_v13 = vld [vmem:[%s2787_s6 + $0x48] sm:$0xf]  ;;  %v225_v45 = vld [vmem:[%s2787_s6 + $0x50] sm:$0x1] }
  0x40   : > { %v635_v52 = vunpack.c.l.b16 %v347_v43  ;;  %v1510_v54 = vsel %vm2802_vm3, %v1505_v40, %v1509_v20  ;;  %v1520_v55 = vsel %vm2802_vm3, %v1515_v41, %v1519_v42  ;;  %v364_v57 = vrot.slane %v362_v46, 5 }
  0x41   : > { %2655 = vmatmul.msk.bf16.gmra.mxu3 %vm687_vm0, %v1824_v47  ;;  %v368_v47 = vshll.u32 %v194_v38, 16  ;;  %v1531_v58 = vshll.u32 %v2609_v49, 16  ;;  %v1535_v59 = vshrl.u32 %v2609_v49, 16  ;;  %v1524_v62 = vrot.slane %v1522_v50, 4 }
  0x42   : > { %v1527_v63 = vrot.slane %v1525_v51, 5  ;;  %v1798_v1 = vunpack.c.l.b16 %v1510_v54  ;;  %v1799_v2 = vunpack.c.l.b16 %v1520_v55  ;;  %v365_v6 = vor.u32 %v364_v57, %v361_v56  ;;  %v2613_v55 = vld [vmem:[%s2787_s6 + $0x5c] sm:$0x1] }
  0x43   : > { %2580 = vmatmul.msk.bf16.gmra.mxu2 %vm687_vm0, %v2695_v48  ;;  %v372_v48 = vshrl.u32 %v194_v38, 16  ;;  %v370_v60 = vrot.slane %v368_v47, 5  ;;  %v1533_v4 = vrot.slane %v1531_v58, 5  ;;  %v1537_v5 = vrot.slane %v1535_v59, 4 }
  0x44   : > { %2456 = vmatmul.msk.bf16.gmra.mxu1 %vm687_vm0, %v2675_v53  ;;  %v636_v53 = vunpack.c.l.b16 %v357_v44  ;;  %v378_v8 = vshll.u32 %v224_v0, 16  ;;  %v1528_v10 = vor.u32 %v1527_v63, %v1524_v62  ;;  %v1826_v11 = vpack.c.b16 %v1799_v2, %v1798_v1  ;;  %v2678_v1 = vld [vmem:[%s2787_s6 + $0x48] sm:$0xff]  ;;  %v197_v2 = vld [vmem:[%s2787_s6 + $0x54] sm:$0xf] }
  0x45   : > { %v374_v61 = vrot.slane %v372_v48, 4  ;;  %v1538_v15 = vor.u32 %v1537_v5, %v1533_v4  ;;  %v1541_v16 = vshll.u32 %v2610_v9, 16  ;;  %v366_v18 = vrot.slane %v365_v6, 4 }
  0x46   : > { %v663_v3 = vpack.c.b16 %v636_v53, %v635_v52  ;;  %v380_v20 = vrot.slane %v378_v8, 5  ;;  %v1529_v21 = vrot.slane %v1528_v10, 4  ;;  %v386_v23 = vshll.u32 %v195_v13, 16 }
  0x47   : > { %v375_v7 = vor.u32 %v374_v61, %v370_v60  ;;  %v392_v24 = vshll.u32 %v196_v17, 16  ;;  %v396_v25 = vshrl.u32 %v196_v17, 16  ;;  %v1543_v29 = vrot.slane %v1541_v16, 5  ;;  %v2698_v61 = vld [vmem:[%s2787_s6 + $0x54] sm:$0xff] }
  0x48   : > { %v371_v30 = vsel %vm2802_vm3, %v366_v18, %v370_v60  ;;  %v1546_v34 = vshrl.u32 %v2611_v26, 16  ;;  %v1549_v35 = vshll.u32 %v2611_v26, 16  ;;  %v388_v39 = vrot.slane %v386_v23, 5 }
  0x49   : > { %v376_v19 = vrot.slane %v375_v7, 4  ;;  %v394_v40 = vrot.slane %v392_v24, 5  ;;  %v398_v41 = vrot.slane %v396_v25, 4  ;;  %v637_v42 = vunpack.c.l.b16 %v371_v30 }
  0x4a   : > { %v1548_v47 = vrot.slane %v1546_v34, 4  ;;  %v1551_v48 = vrot.slane %v1549_v35, 5  ;;  %v402_v54 = vshll.u32 %v225_v45, 16  ;;  %v1565_v59 = vshll.u32 %v2613_v55, 16  ;;  %v2679_v45 = vld [vmem:[%s2787_s6 + $0x54] sm:$0xff] }
  0x4b   : > { %v381_v32 = vsel %vm2802_vm3, %v376_v19, %v380_v20  ;;  %v399_v53 = vor.u32 %v398_v41, %v394_v40  ;;  %v407_v9 = vshrl.u32 %v197_v2, 16  ;;  %v410_v10 = vshll.u32 %v197_v2, 16  ;;  %v2699_v41 = vld [vmem:[%s2787_s6 + $0x60] sm:$0xff]  ;;  %v2618_v55 = vld [vmem:[%s2787_s6 + $0x70] sm:$0xf] }
  0x4c   : > { %v638_v43 = vunpack.c.l.b16 %v381_v32  ;;  %v1552_v57 = vor.u32 %v1551_v48, %v1548_v47  ;;  %v404_v0 = vrot.slane %v402_v54, 5  ;;  %v1567_v6 = vrot.slane %v1565_v59, 5 }
  0x4d   : > { %v400_v63 = vrot.slane %v399_v53, 4  ;;  %v409_v19 = vrot.slane %v407_v9, 4  ;;  %v412_v20 = vrot.slane %v410_v10, 5 }
  0x4e   : > { %2368 = vmatmul.msk.bf16.gmra.mxu0 %vm687_vm0, %v662_v22  ;;  %v383_v22 = vshrl.u32 %v195_v13, 16  ;;  %v664_v56 = vpack.c.b16 %v638_v43, %v637_v42  ;;  %v2614_v13 = vld [vmem:[%s2787_s6 + $0x60] sm:$0xf] }
  0x4f   : > { %v405_v8 = vsel %vm2802_vm3, %v400_v63, %v404_v0  ;;  %v413_v32 = vor.u32 %v412_v20, %v409_v19  ;;  %v1603_v0 = vshll.u32 %v2618_v55, 16 }
  0x50   : > { %v385_v38 = vrot.slane %v383_v22, 4  ;;  %v640_v16 = vunpack.c.l.b16 %v405_v8  ;;  %v1573_v22 = vshll.u32 %v2614_v13, 16 }
  0x51   : > { %2656 = vmatmul.msk.bf16.gmra.mxu3 %vm687_vm0, %v1825_v27  ;;  %v2612_v27 = vld [vmem:[%s2787_s6 + $0x58] sm:$0xf]  ;;  %v414_v42 = vrot.slane %v413_v32, 4 }
  0x52   : > { %v1555_v36 = vshll.u32 %v2612_v27, 16  ;;  %v1559_v37 = vshrl.u32 %v2612_v27, 16  ;;  %v389_v52 = vor.u32 %v388_v39, %v385_v38  ;;  %v226_v27 = vld [vmem:[%s2787_s6 + $0x5c] sm:$0x1]  ;;  %v1575_v34 = vrot.slane %v1573_v22, 5 }
  0x53   : > { %2581 = vmatmul.msk.bf16.gmra.mxu2 %vm687_vm0, %v2696_v28  ;;  %v1539_v28 = vrot.slane %v1538_v15, 4  ;;  %v2620_v32 = vld [vmem:[%s2787_s6 + $0x78] sm:$0xf] }
  0x54   : > { %2457 = vmatmul.msk.bf16.gmra.mxu1 %vm687_vm0, %v2676_v33  ;;  %v1534_v33 = vsel %vm2802_vm3, %v1529_v21, %v1533_v4  ;;  %v1557_v49 = vrot.slane %v1555_v36, 5  ;;  %v1561_v50 = vrot.slane %v1559_v37, 4  ;;  %v390_v62 = vrot.slane %v389_v52, 4  ;;  %v2616_v37 = vld [vmem:[%s2787_s6 + $0x68] sm:$0x1] }
  0x55   : > { %v1544_v44 = vsel %vm2802_vm3, %v1539_v28, %v1543_v29  ;;  %v1800_v46 = vunpack.c.l.b16 %v1534_v33  ;;  %v1553_v4 = vrot.slane %v1552_v57, 4  ;;  %v1570_v21 = vshrl.u32 %v2614_v13, 16 }
  0x56   : > { %v1801_v51 = vunpack.c.l.b16 %v1544_v44  ;;  %v1562_v58 = vor.u32 %v1561_v50, %v1557_v49  ;;  %v395_v7 = vsel %vm2802_vm3, %v390_v62, %v394_v40  ;;  %v426_v36 = vshll.u32 %v226_v27, 16  ;;  %v200_v50 = vld [vmem:[%s2787_s6 + $0x64] sm:$0xf]  ;;  %v201_v27 = vld [vmem:[%s2787_s6 + $0x6c] sm:$0xf] }
  0x57   : > { %v639_v15 = vunpack.c.l.b16 %v395_v7  ;;  %v1558_v17 = vsel %vm2802_vm3, %v1553_v4, %v1557_v49  ;;  %v1572_v33 = vrot.slane %v1570_v21, 4  ;;  %v1589_v44 = vshll.u32 %v2616_v37, 16  ;;  %v199_v49 = vld [vmem:[%s2787_s6 + $0x60] sm:$0xf]  ;;  %v2621_v37 = vld [vmem:[%s2787_s6 + $0x7c] sm:$0xf] }
  0x58   : > { %v1827_v60 = vpack.c.b16 %v1801_v51, %v1800_v46  ;;  %v1563_v5 = vrot.slane %v1562_v58, 4  ;;  %v1802_v29 = vunpack.c.l.b16 %v1558_v17  ;;  %v428_v47 = vrot.slane %v426_v36, 5  ;;  %v2617_v51 = vld [vmem:[%s2787_s6 + $0x6c] sm:$0xf]  ;;  %v2619_v17 = vld [vmem:[%s2787_s6 + $0x74] sm:$0x1] }
  0x59   : > { %v665_v28 = vpack.c.b16 %v640_v16, %v639_v15  ;;  %v1576_v43 = vor.u32 %v1575_v34, %v1572_v33  ;;  %v1591_v54 = vrot.slane %v1589_v44, 5  ;;  %v431_v58 = vshrl.u32 %v199_v49, 16 }
  0x5a   : > { %v1568_v18 = vsel %vm2802_vm3, %v1563_v5, %v1567_v6  ;;  %v434_v59 = vshll.u32 %v199_v49, 16  ;;  %v1594_v62 = vshrl.u32 %v2617_v51, 16  ;;  %v1597_v63 = vshll.u32 %v2617_v51, 16 }
  0x5b   : > { %v1803_v30 = vunpack.c.l.b16 %v1568_v18  ;;  %v1577_v53 = vrot.slane %v1576_v43, 4  ;;  %v433_v6 = vrot.slane %v431_v58, 4  ;;  %v1605_v13 = vrot.slane %v1603_v0, 5 }
  0x5c   : > { %v436_v7 = vrot.slane %v434_v59, 5  ;;  %v1596_v10 = vrot.slane %v1594_v62, 4  ;;  %v1618_v44 = vshrl.u32 %v2620_v32, 16  ;;  %v228_v62 = vld [vmem:[%s2787_s6 + $0x74] sm:$0x1] }
  0x5d   : > { %v1828_v40 = vpack.c.b16 %v1803_v30, %v1802_v29  ;;  %v2680_v29 = vld [vmem:[%s2787_s6 + $0x60] sm:$0xff]  ;;  %v202_v30 = vld [vmem:[%s2787_s6 + $0x70] sm:$0xf] }
  0x5e   : > { %2369 = vmatmul.msk.bf16.gmra.mxu0 %vm687_vm0, %v663_v3  ;;  %v198_v3 = vld [vmem:[%s2787_s6 + $0x58] sm:$0xf]  ;;  %v437_v19 = vor.u32 %v436_v7, %v433_v6  ;;  %v468_v43 = vshrl.u32 %v202_v30, 16  ;;  %v474_v6 = vshll.u32 %v228_v62, 16 }
  0x60   : > { %v438_v33 = vrot.slane %v437_v19, 4 }
  0x61   : > { %2657 = vmatmul.msk.bf16.gmra.mxu3 %vm687_vm0, %v1826_v11  ;;  %v416_v11 = vshll.u32 %v198_v3, 16 }
  0x63   : > { %2582 = vmatmul.msk.bf16.gmra.mxu2 %vm687_vm0, %v2697_v12  ;;  %v420_v12 = vshrl.u32 %v198_v3, 16  ;;  %v418_v23 = vrot.slane %v416_v11, 5  ;;  %v1599_v11 = vrot.slane %v1597_v63, 5 }
  0x64   : > { %2458 = vmatmul.msk.bf16.gmra.mxu1 %vm687_vm0, %v2677_v14  ;;  %v2615_v14 = vld [vmem:[%s2787_s6 + $0x64] sm:$0xf] }
  0x65   : > { %v422_v24 = vrot.slane %v420_v12, 4  ;;  %v1579_v25 = vshll.u32 %v2615_v14, 16  ;;  %v1583_v26 = vshrl.u32 %v2615_v14, 16  ;;  %v419_v52 = vsel %vm2802_vm3, %v414_v42, %v418_v23  ;;  %v227_v12 = vld [vmem:[%s2787_s6 + $0x68] sm:$0x1] }
  0x66   : > { %v641_v2 = vunpack.c.l.b16 %v419_v52  ;;  %v450_v21 = vshll.u32 %v227_v12, 16  ;;  %v1600_v22 = vor.u32 %v1599_v11, %v1596_v10  ;;  %v464_v42 = vshll.u32 %v202_v30, 16 }
  0x67   : > { %v423_v35 = vor.u32 %v422_v24, %v418_v23  ;;  %v1581_v38 = vrot.slane %v1579_v25, 5  ;;  %v1585_v39 = vrot.slane %v1583_v26, 4  ;;  %v1613_v24 = vshll.u32 %v2619_v17, 16  ;;  %v2700_v26 = vld [vmem:[%s2787_s6 + $0x6c] sm:$0xff] }
  0x68   : > { %v1601_v36 = vrot.slane %v1600_v22, 4  ;;  %v476_v22 = vrot.slane %v474_v6, 5  ;;  %v206_v6 = vld [vmem:[%s2787_s6 + $0x88] sm:$0xf] }
  0x69   : > { %v424_v46 = vrot.slane %v423_v35, 4  ;;  %v1586_v48 = vor.u32 %v1585_v39, %v1581_v38  ;;  %v1582_v4 = vsel %vm2802_vm3, %v1577_v53, %v1581_v38  ;;  %v452_v35 = vrot.slane %v450_v21, 5 }
  0x6a   : > { %v1804_v15 = vunpack.c.l.b16 %v1582_v4  ;;  %v1615_v39 = vrot.slane %v1613_v24, 5  ;;  %v1606_v51 = vsel %vm2802_vm3, %v1601_v36, %v1605_v13  ;;  %v2681_v24 = vld [vmem:[%s2787_s6 + $0x6c] sm:$0xff] }
  0x6b   : > { %v1587_v57 = vrot.slane %v1586_v48, 4 }
  0x6d   : > { %v1592_v5 = vsel %vm2802_vm3, %v1587_v57, %v1591_v54  ;;  %v1620_v57 = vrot.slane %v1618_v44, 4 }
  0x6e   : > { %2370 = vmatmul.msk.bf16.gmra.mxu0 %vm687_vm0, %v664_v56  ;;  %v429_v56 = vsel %vm2802_vm3, %v424_v46, %v428_v47  ;;  %v1805_v16 = vunpack.c.l.b16 %v1592_v5  ;;  %v1627_v46 = vshll.u32 %v2621_v37, 16  ;;  %v1631_v47 = vshrl.u32 %v2621_v37, 16 }
  0x6f   : > { %v642_v3 = vunpack.c.l.b16 %v429_v56  ;;  %v470_v56 = vrot.slane %v468_v43, 4 }
  0x70   : > { %v1829_v25 = vpack.c.b16 %v1805_v16, %v1804_v15  ;;  %v1629_v63 = vrot.slane %v1627_v46, 5  ;;  %v1633_v0 = vrot.slane %v1631_v47, 4  ;;  %v204_v16 = vld [vmem:[%s2787_s6 + $0x7c] sm:$0xf] }
  0x71   : > { %2658 = vmatmul.msk.bf16.gmra.mxu3 %vm687_vm0, %v1827_v60  ;;  %v440_v60 = vshll.u32 %v200_v50, 16  ;;  %v666_v18 = vpack.c.b16 %v642_v3, %v641_v2  ;;  %v1806_v2 = vunpack.c.l.b16 %v1606_v51  ;;  %v488_v30 = vshll.u32 %v204_v16, 16 }
  0x72   : > { %v1634_v10 = vor.u32 %v1633_v0, %v1629_v63 }
  0x73   : > { %2583 = vmatmul.msk.bf16.gmra.mxu2 %vm687_vm0, %v2698_v61  ;;  %v444_v61 = vshrl.u32 %v200_v50, 16  ;;  %v442_v8 = vrot.slane %v440_v60, 5  ;;  %v3009_v46 = vrot.slane %v488_v30, 5 }
  0x74   : > { %2459 = vmatmul.msk.bf16.gmra.mxu1 %vm687_vm0, %v2678_v1  ;;  %v1607_v1 = vshrl.u32 %v2618_v55, 16  ;;  %v2977_v55 = vrot.slane %v464_v42, 5 }
  0x75   : > { %v446_v9 = vrot.slane %v444_v61, 4  ;;  %v443_v48 = vsel %vm2802_vm3, %v438_v33, %v442_v8  ;;  %v2624_v33 = vld [vmem:[%s2787_s6 + $0x88] sm:$0xf] }
  0x76   : > { %v1609_v14 = vrot.slane %v1607_v1, 4  ;;  %v643_v60 = vunpack.c.l.b16 %v443_v48  ;;  %v2622_v1 = vld [vmem:[%s2787_s6 + $0x80] sm:$0x1]  ;;  %v471_v5 = vor.u32 %v470_v56, %v2977_v55  ;;  %v1651_v42 = vshll.u32 %v2624_v33, 16 }
  0x77   : > { %v447_v20 = vor.u32 %v446_v9, %v442_v8  ;;  %v203_v8 = vld [vmem:[%s2787_s6 + $0x78] sm:$0xf]  ;;  %v1637_v11 = vshll.u32 %v2622_v1, 16  ;;  %v1655_v43 = vshrl.u32 %v2624_v33, 16 }
  0x78   : > { %v1610_v23 = vor.u32 %v1609_v14, %v1605_v13  ;;  %v479_v17 = vshrl.u32 %v203_v8, 16  ;;  %v472_v21 = vrot.slane %v471_v5, 4  ;;  %v205_v5 = vld [vmem:[%s2787_s6 + $0x84] sm:$0xf] }
  0x79   : > { %v448_v34 = vrot.slane %v447_v20, 4  ;;  %v2701_v20 = vld [vmem:[%s2787_s6 + $0x78] sm:$0xff]  ;;  %v1657_v62 = vrot.slane %v1655_v43, 4 }
  0x7a   : > { %v1611_v38 = vrot.slane %v1610_v23, 4  ;;  %v477_v37 = vsel %vm2802_vm3, %v472_v21, %v476_v22  ;;  %v506_v21 = vshll.u32 %v205_v5, 16  ;;  %v512_v22 = vshll.u32 %v206_v6, 16 }
  0x7b   : > { %v453_v49 = vsel %vm2802_vm3, %v448_v34, %v452_v35  ;;  %v481_v34 = vrot.slane %v479_v17, 4  ;;  %v646_v51 = vunpack.c.l.b16 %v477_v37 }
  0x7c   : > { %v1616_v52 = vsel %vm2802_vm3, %v1611_v38, %v1615_v39  ;;  %v644_v61 = vunpack.c.l.b16 %v453_v49 }
  0x7d   : > { %v1807_v3 = vunpack.c.l.b16 %v1616_v52 }
  0x7e   : > { %2371 = vmatmul.msk.bf16.gmra.mxu0 %vm687_vm0, %v665_v28  ;;  %v667_v9 = vpack.c.b16 %v644_v61, %v643_v60  ;;  %v3019_v61 = vrot.slane %v1651_v42, 5  ;;  %v3046_v42 = vrot.slane %v512_v22, 5 }
  0x7f   : > { %v1830_v13 = vpack.c.b16 %v1807_v3, %v1806_v2 }
  0x81   : > { %2659 = vmatmul.msk.bf16.gmra.mxu3 %vm687_vm0, %v1828_v40  ;;  %v455_v40 = vshrl.u32 %v201_v27, 16 }
  0x83   : > { %2584 = vmatmul.msk.bf16.gmra.mxu2 %vm687_vm0, %v2699_v41  ;;  %v458_v41 = vshll.u32 %v201_v27, 16  ;;  %v457_v53 = vrot.slane %v455_v40, 4  ;;  %v2623_v27 = vld [vmem:[%s2787_s6 + $0x84] sm:$0xf] }
  0x84   : > { %2460 = vmatmul.msk.bf16.gmra.mxu1 %vm687_vm0, %v2679_v45  ;;  %v1621_v45 = vshll.u32 %v2620_v32, 16  ;;  %v492_v32 = vshrl.u32 %v204_v16, 16  ;;  %v1642_v39 = vshrl.u32 %v2623_v27, 16  ;;  %v2626_v16 = vld [vmem:[%s2787_s6 + $0x90] sm:$0xf] }
  0x85   : > { %v460_v54 = vrot.slane %v458_v41, 5  ;;  %v1645_v41 = vshll.u32 %v2623_v27, 16  ;;  %v2682_v27 = vld [vmem:[%s2787_s6 + $0x78] sm:$0xff]  ;;  %v1666_v33 = vshrl.u32 %v2626_v16, 16 }
  0x86   : > { %v1623_v58 = vrot.slane %v1621_v45, 5  ;;  %v229_v45 = vld [vmem:[%s2787_s6 + $0x80] sm:$0x1]  ;;  %v494_v47 = vrot.slane %v492_v32, 4 }
  0x87   : > { %v461_v4 = vor.u32 %v460_v54, %v457_v53  ;;  %v2625_v53 = vld [vmem:[%s2787_s6 + $0x8c] sm:$0x1]  ;;  %v1647_v60 = vrot.slane %v1645_v41, 5  ;;  %v508_v41 = vrot.slane %v506_v21, 5 }
  0x88   : > { %v1624_v7 = vor.u32 %v1623_v58, %v1620_v57  ;;  %v1644_v57 = vrot.slane %v1642_v39, 4  ;;  %v498_v58 = vshll.u32 %v229_v45, 16  ;;  %v495_v2 = vor.u32 %v494_v47, %v3009_v46 }
  0x89   : > { %v462_v15 = vrot.slane %v461_v4, 4  ;;  %v1661_v3 = vshll.u32 %v2625_v53, 16 }
  0x8a   : > { %v1625_v23 = vrot.slane %v1624_v7, 4 }
  0x8c   : > { %v1630_v38 = vsel %vm2802_vm3, %v1625_v23, %v1629_v63 }
  0x8e   : > { %2372 = vmatmul.msk.bf16.gmra.mxu0 %vm687_vm0, %v666_v18  ;;  %v482_v18 = vshll.u32 %v203_v8, 16 }
  0x90   : > { %v484_v35 = vrot.slane %v482_v18, 5 }
  0x91   : > { %v974_v28 = vpop.f32.mrf.mxu1  ;;  %2660 = vmatmul.msk.bf16.gmra.mxu3 %vm687_vm0, %v1829_v25  ;;  %v1635_v25 = vrot.slane %v1634_v10, 4  ;;  %v1658_v10 = vor.u32 %v1657_v62, %v3019_v61 }
  0x92   : > { %v485_v52 = vor.u32 %v484_v35, %v481_v34 }
  0x93   : > { %2585 = vmatmul.msk.bf16.gmra.mxu2 %vm687_vm0, %v2700_v26  ;;  %v1639_v26 = vrot.slane %v1637_v11, 5  ;;  %v1659_v32 = vrot.slane %v1658_v10, 4 }
  0x94   : > { %2461 = vmatmul.msk.bf16.gmra.mxu1 %vm687_vm0, %v2680_v29  ;;  %v486_v4 = vrot.slane %v485_v52, 4 }
  0x95   : > { %v1640_v40 = vsel %vm2802_vm3, %v1635_v25, %v1639_v26  ;;  %v2702_v25 = vld [vmem:[%s2787_s6 + $0x84] sm:$0xff]  ;;  %v516_v26 = vshrl.u32 %v206_v6, 16 }
  0x96   : > { %v1241_v50 = vpop.f32.mrf.mxu2  ;;  %v1809_v56 = vunpack.c.l.b16 %v1640_v40 }
  0x99   : > { %v2979_v59 = vpop.f32.mrf.mxu1 }
  0x9b   : > { %v745_v12 = vpop.f32.mrf.mxu0 }
  0x9c   : > { %v975_v19 = vadd.f32 %v974_v28, %v745_v12  ;;  %v467_v28 = vsel %vm2802_vm3, %v462_v15, %v2977_v55  ;;  %v1808_v55 = vunpack.c.l.b16 %v1630_v38  ;;  %v496_v12 = vrot.slane %v495_v2, 4 }
  0x9d   : > { %v1663_v15 = vrot.slane %v1661_v3, 5 }
  0x9e   : > { %v2985_v14 = vpop.f32.mrf.mxu2  ;;  %2373 = vmatmul.msk.bf16.gmra.mxu0 %vm687_vm0, %v667_v9  ;;  %v1321_v36 = vadd.f32 %v1241_v50, %v975_v19  ;;  %v645_v50 = vunpack.c.l.b16 %v467_v28  ;;  %v1831_v8 = vpack.c.b16 %v1809_v56, %v1808_v55  ;;  %v1648_v9 = vor.u32 %v1647_v60, %v1644_v57 }
  0x9f   : > { %v491_v19 = vsel %vm2802_vm3, %v486_v4, %v3009_v46  ;;  %v1669_v28 = vshll.u32 %v2626_v16, 16  ;;  %v518_v46 = vrot.slane %v516_v26, 4  ;;  %v1668_v60 = vrot.slane %v1666_v33, 4  ;;  %v2628_v4 = vld [vmem:[%s2787_s6 + $0x98] sm:$0x1] }
  0xa0   : > { %v668_v7 = vpack.c.b16 %v646_v51, %v645_v50  ;;  %v1649_v30 = vrot.slane %v1648_v9, 4  ;;  %v230_v50 = vld [vmem:[%s2787_s6 + $0x8c] sm:$0x1]  ;;  %v647_v57 = vunpack.c.l.b16 %v491_v19  ;;  %v1685_v16 = vshll.u32 %v2628_v4, 16 }
  0xa1   : > { %v2992_v29 = vpop.f32.mrf.mxu1  ;;  %2661 = vmatmul.msk.bf16.gmra.mxu3 %vm687_vm0, %v1830_v13  ;;  %v500_v13 = vrot.slane %v498_v58, 5  ;;  %v1671_v62 = vrot.slane %v1669_v28, 5  ;;  %v519_v2 = vor.u32 %v518_v46, %v3046_v42  ;;  %v522_v3 = vshll.u32 %v230_v50, 16 }
  0xa2   : > { %v1687_v28 = vrot.slane %v1685_v16, 5 }
  0xa3   : > { %2586 = vmatmul.msk.bf16.gmra.mxu2 %vm687_vm0, %v2701_v20  ;;  %v747_v44 = vpop.f32.mrf.mxu0  ;;  %v503_v20 = vshrl.u32 %v205_v5, 16  ;;  %v520_v19 = vrot.slane %v519_v2, 4 }
  0xa4   : > { %2462 = vmatmul.msk.bf16.gmra.mxu1 %vm687_vm0, %v2681_v24  ;;  %v1907_v48 = vpop.f32.mrf.mxu3  ;;  %v977_v0 = vadd.f32 %v2979_v59, %v747_v44 }
  0xa5   : > { %v1987_v54 = vadd.f32 %v1907_v48, %v1321_v36  ;;  %v505_v40 = vrot.slane %v503_v20, 4  ;;  %v501_v48 = vsel %vm2802_vm3, %v496_v12, %v500_v13  ;;  %v524_v20 = vrot.slane %v522_v3, 5 }
  0xa6   : > { %v3011_v49 = vpop.f32.mrf.mxu2  ;;  %v1322_v59 = vadd.f32 %v2985_v14, %v977_v0  ;;  %v648_v0 = vunpack.c.l.b16 %v501_v48 }
  0xa7   : > { %v2193_v63 = vpack.c.bf16 %v1987_v54, %v1987_v54  ;;  %v2091_v23 = vmul.f32 %v1987_v54, %v1987_v54  ;;  %v2020_v34 = vsel %vm2019_vm5, %v1987_v54, 0.0  ;;  %v1654_v54 = vsel %vm2802_vm3, %v1649_v30, %v3019_v61 }
  0xa8   : > { %v509_v58 = vor.u32 %v508_v41, %v505_v40  ;;  %v1810_v5 = vunpack.c.l.b16 %v1654_v54  ;;  %v669_v22 = vpack.c.b16 %v648_v0, %v647_v57  ;;  %v2683_v40 = vld [vmem:[%s2787_s6 + $0x84] sm:$0xff] }
  0xa9   : > { %v3022_v1 = vpop.f32.mrf.mxu1  ;;  %2226 = vst.msk [vmem:[%s3017_s10] sm:$0xf] %vm2225_vm4, %v2193_v63  ;;  %v2123_v43 = vsel %vm2019_vm5, %v2091_v23, 0.0  ;;  %v207_v23 = vld [vmem:[%s2787_s6 + $0x90] sm:$0xf] }
  0xaa   : > { %v3074_v13 = vrot.slane %v509_v58, 4 }
  0xab   : > { %v750_v11 = vpop.f32.mrf.mxu0 }
  0xac   : > { %v1909_v17 = vpop.f32.mrf.mxu3  ;;  %v980_v14 = vadd.f32 %v2992_v29, %v750_v11  ;;  %v2627_v29 = vld [vmem:[%s2787_s6 + $0x94] sm:$0xf] }
  0xad   : > { %v1988_v24 = vadd.f32 %v1909_v17, %v1322_v59  ;;  %v1675_v51 = vshll.u32 %v2627_v29, 16  ;;  %v1679_v52 = vshrl.u32 %v2627_v29, 16  ;;  %v527_v29 = vshrl.u32 %v207_v23, 16 }
  0xae   : > { %v3032_v18 = vpop.f32.mrf.mxu2  ;;  %2374 = vmatmul.msk.bf16.gmra.mxu0 %vm687_vm0, %v668_v7  ;;  %v1323_v45 = vadd.f32 %v3011_v49, %v980_v14  ;;  %v1664_v49 = vsel %vm2802_vm3, %v1659_v32, %v1663_v15  ;;  %v1672_v15 = vor.u32 %v1671_v62, %v1668_v60  ;;  %v515_v32 = vsel %vm2802_vm3, %v3074_v13, %v3046_v42 }
  0xaf   : > { %v2021_v35 = vsel %vm2019_vm5, %v1988_v24, 0.0  ;;  %v2092_v36 = vmul.f32 %v1988_v24, %v1988_v24  ;;  %v2194_v37 = vpack.c.bf16 %v1988_v24, %v1988_v24  ;;  %v1811_v6 = vunpack.c.l.b16 %v1664_v49 }
  0xb0   : > { %v2022_v39 = vadd.f32 %v2021_v35, %v2020_v34  ;;  %v3068_v61 = vrot.slane %v1675_v51, 5  ;;  %v1681_v7 = vrot.slane %v1679_v52, 4  ;;  %v1673_v33 = vrot.slane %v1672_v15, 4  ;;  %v2629_v34 = vld [vmem:[%s2787_s6 + $0x9c] sm:$0xf] }
  0xb1   : > { %v3043_v38 = vpop.f32.mrf.mxu1  ;;  %v2124_v44 = vsel %vm2019_vm5, %v2092_v36, 0.0  ;;  %2227 = vst.msk [vmem:[%s3017_s10 + $0x4] sm:$0xf] %vm2225_vm4, %v2194_v37  ;;  %2662 = vmatmul.msk.bf16.gmra.mxu3 %vm687_vm0, %v1831_v8  ;;  %v2703_v37 = vld [vmem:[%s2787_s6 + $0x90] sm:$0xff]  ;;  %v1693_v51 = vshll.u32 %v2629_v34, 16  ;;  %v529_v57 = vrot.slane %v527_v29, 4 }
  0xb2   : > { %v2125_v47 = vadd.f32 %v2124_v44, %v2123_v43  ;;  %v530_v43 = vshll.u32 %v207_v23, 16 }
  0xb3   : > { %2587 = vmatmul.msk.bf16.gmra.mxu2 %vm687_vm0, %v2702_v25  ;;  %v752_v53 = vpop.f32.mrf.mxu0  ;;  %v208_v25 = vld [vmem:[%s2787_s6 + $0x94] sm:$0xf] }
  0xb4   : > { %2463 = vmatmul.msk.bf16.gmra.mxu1 %vm687_vm0, %v2682_v27  ;;  %v1912_v55 = vpop.f32.mrf.mxu3  ;;  %v982_v59 = vadd.f32 %v3022_v1, %v752_v53  ;;  %v1682_v1 = vor.u32 %v1681_v7, %v3068_v61  ;;  %v1832_v27 = vpack.c.b16 %v1811_v6, %v1810_v5  ;;  %v536_v44 = vshll.u32 %v208_v25, 16 }
  0xb5   : > { %v1989_v63 = vadd.f32 %v1912_v55, %v1323_v45  ;;  %v540_v42 = vshrl.u32 %v208_v25, 16  ;;  %v1678_v55 = vsel %vm2802_vm3, %v1673_v33, %v3068_v61  ;;  %v532_v60 = vrot.slane %v530_v43, 5  ;;  %v209_v33 = vld [vmem:[%s2787_s6 + $0x9c] sm:$0xf] }
  0xb6   : > { %v3064_v56 = vpop.f32.mrf.mxu2  ;;  %v1324_v24 = vadd.f32 %v3032_v18, %v982_v59  ;;  %v525_v18 = vsel %vm2802_vm3, %v520_v19, %v524_v20  ;;  %v1683_v41 = vrot.slane %v1682_v1, 4  ;;  %v3110_v62 = vrot.slane %v536_v44, 5 }
  0xb7   : > { %v2023_v8 = vsel %vm2019_vm5, %v1989_v63, 0.0  ;;  %v2093_v9 = vmul.f32 %v1989_v63, %v1989_v63  ;;  %v2195_v10 = vpack.c.bf16 %v1989_v63, %v1989_v63  ;;  %v542_v63 = vrot.slane %v540_v42, 4 }
  0xb8   : > { %v2024_v12 = vadd.f32 %v2023_v8, %v2022_v39  ;;  %v2630_v39 = vld [vmem:[%s2787_s6 + $0xa0] sm:$0xf]  ;;  %v1688_v2 = vsel %vm2802_vm3, %v1683_v41, %v1687_v28  ;;  %v1695_v6 = vrot.slane %v1693_v51, 5  ;;  %v1812_v59 = vunpack.c.l.b16 %v1678_v55 }
  0xb9   : > { %v3072_v11 = vpop.f32.mrf.mxu1  ;;  %v2126_v17 = vsel %vm2019_vm5, %v2093_v9, 0.0  ;;  %2228 = vst.msk [vmem:[%s3017_s10 + $0x8] sm:$0xf] %vm2225_vm4, %v2195_v10  ;;  %v1699_v52 = vshll.u32 %v2630_v39, 16  ;;  %v1703_v53 = vshrl.u32 %v2630_v39, 16  ;;  %v649_v9 = vunpack.c.l.b16 %v515_v32 }
  0xba   : > { %v2127_v21 = vadd.f32 %v2126_v17, %v2125_v47  ;;  %v650_v10 = vunpack.c.l.b16 %v525_v18  ;;  %v1813_v13 = vunpack.c.l.b16 %v1688_v2  ;;  %v533_v15 = vor.u32 %v532_v60, %v529_v57 }
  0xbb   : > { %v755_v14 = vpop.f32.mrf.mxu0  ;;  %v3117_v61 = vrot.slane %v1699_v52, 5  ;;  %v1705_v7 = vrot.slane %v1703_v53, 4  ;;  %v543_v16 = vor.u32 %v542_v63, %v3110_v62  ;;  %v2633_v63 = vld [vmem:[%s2787_s6 + $0xac] sm:$0xf] }
  0xbc   : > { %v1914_v26 = vpop.f32.mrf.mxu3  ;;  %v985_v36 = vadd.f32 %v3043_v38, %v755_v14  ;;  %v1690_v38 = vshrl.u32 %v2629_v34, 16  ;;  %v670_v32 = vpack.c.b16 %v650_v10, %v649_v9 }
  0xbd   : > { %v1990_v35 = vadd.f32 %v1914_v26, %v1324_v24  ;;  %v1706_v14 = vor.u32 %v1705_v7, %v3117_v61  ;;  %v544_v39 = vrot.slane %v543_v16, 4 }
  0xbe   : > { %v3083_v30 = vpop.f32.mrf.mxu2  ;;  %2375 = vmatmul.msk.bf16.gmra.mxu0 %vm687_vm0, %v669_v22  ;;  %v1325_v49 = vadd.f32 %v3064_v56, %v985_v36  ;;  %v231_v56 = vld [vmem:[%s2787_s6 + $0x98] sm:$0x1]  ;;  %v1692_v5 = vrot.slane %v1690_v38, 4 }
  0xbf   : > { %v2025_v45 = vsel %vm2019_vm5, %v1990_v35, 0.0  ;;  %v2094_v46 = vmul.f32 %v1990_v35, %v1990_v35  ;;  %v2196_v47 = vpack.c.bf16 %v1990_v35, %v1990_v35  ;;  %v546_v17 = vshll.u32 %v231_v56, 16 }
  0xc0   : > { %v2026_v50 = vadd.f32 %v2025_v45, %v2024_v12  ;;  %v2631_v12 = vld [vmem:[%s2787_s6 + $0xa4] sm:$0x1]  ;;  %v1696_v24 = vor.u32 %v1695_v6, %v1692_v5  ;;  %v534_v35 = vrot.slane %v533_v15, 4  ;;  %v1707_v41 = vrot.slane %v1706_v14, 4  ;;  %v2704_v45 = vld [vmem:[%s2787_s6 + $0x9c] sm:$0xff] }
  0xc1   : > { %v3098_v48 = vpop.f32.mrf.mxu1  ;;  %v2128_v54 = vsel %vm2019_vm5, %v2094_v46, 0.0  ;;  %2229 = vst.msk [vmem:[%s3017_s10 + $0xc] sm:$0xf] %vm2225_vm4, %v2196_v47  ;;  %2663 = vmatmul.msk.bf16.gmra.mxu3 %vm687_vm0, %v1832_v27  ;;  %v1709_v25 = vshll.u32 %v2631_v12, 16  ;;  %v548_v36 = vrot.slane %v546_v17, 5  ;;  %v551_v46 = vshrl.u32 %v209_v33, 16 }
  0xc2   : > { %v2129_v58 = vadd.f32 %v2128_v54, %v2127_v21  ;;  %v2684_v47 = vld [vmem:[%s2787_s6 + $0x90] sm:$0xff] }
  0xc3   : > { %2588 = vmatmul.msk.bf16.gmra.mxu2 %vm687_vm0, %v2703_v37  ;;  %v757_v0 = vpop.f32.mrf.mxu0  ;;  %v210_v37 = vld [vmem:[%s2787_s6 + $0xa0] sm:$0xf]  ;;  %v1711_v43 = vrot.slane %v1709_v25, 5  ;;  %v549_v57 = vsel %vm2802_vm3, %v544_v39, %v548_v36  ;;  %v553_v2 = vrot.slane %v551_v46, 4  ;;  %v211_v39 = vld [vmem:[%s2787_s6 + $0xa8] sm:$0xf] }
  0xc4   : > { %2464 = vmatmul.msk.bf16.gmra.mxu1 %vm687_vm0, %v2683_v40  ;;  %v1917_v3 = vpop.f32.mrf.mxu3  ;;  %v987_v22 = vadd.f32 %v3072_v11, %v757_v0  ;;  %v1833_v11 = vpack.c.b16 %v1813_v13, %v1812_v59  ;;  %v1697_v40 = vrot.slane %v1696_v24, 4  ;;  %v560_v38 = vshll.u32 %v210_v37, 16 }
  0xc5   : > { %v1991_v8 = vadd.f32 %v1917_v3, %v1325_v49  ;;  %v2632_v49 = vld [vmem:[%s2787_s6 + $0xa8] sm:$0xf]  ;;  %v1712_v60 = vsel %vm2802_vm3, %v1707_v41, %v1711_v43  ;;  %v1723_v13 = vshll.u32 %v2633_v63, 16  ;;  %v652_v16 = vunpack.c.l.b16 %v549_v57 }
  0xc6   : > { %v3115_v4 = vpop.f32.mrf.mxu2  ;;  %v1326_v28 = vadd.f32 %v3083_v30, %v987_v22  ;;  %v554_v30 = vshll.u32 %v209_v33, 16  ;;  %v3160_v5 = vrot.slane %v560_v38, 5  ;;  %v1717_v12 = vshll.u32 %v2632_v49, 16 }
  0xc7   : > { %v2027_v19 = vsel %vm2019_vm5, %v1991_v8, 0.0  ;;  %v2095_v20 = vmul.f32 %v1991_v8, %v1991_v8  ;;  %v2197_v21 = vpack.c.bf16 %v1991_v8, %v1991_v8  ;;  %v232_v8 = vld [vmem:[%s2787_s6 + $0xa4] sm:$0x1] }
  0xc8   : > { %v2028_v23 = vadd.f32 %v2027_v19, %v2026_v50  ;;  %v564_v50 = vshrl.u32 %v210_v37, 16  ;;  %v556_v56 = vrot.slane %v554_v30, 5  ;;  %v1815_v19 = vunpack.c.l.b16 %v1712_v60 }
  0xc9   : > { %v3123_v1 = vpop.f32.mrf.mxu1  ;;  %v2130_v26 = vsel %vm2019_vm5, %v2095_v20, 0.0  ;;  %2230 = vst.msk [vmem:[%s3017_s10 + $0x10] sm:$0xf] %vm2225_vm4, %v2197_v21  ;;  %v570_v22 = vshll.u32 %v232_v8, 16  ;;  %v1719_v33 = vrot.slane %v1717_v12, 5 }
  0xca   : > { %v2131_v27 = vadd.f32 %v2130_v26, %v2129_v58  ;;  %v1702_v58 = vsel %vm2802_vm3, %v1697_v40, %v3117_v61  ;;  %v566_v6 = vrot.slane %v564_v50, 4  ;;  %v1714_v61 = vshrl.u32 %v2632_v49, 16 }
  0xcb   : > { %v760_v34 = vpop.f32.mrf.mxu0  ;;  %v1814_v17 = vunpack.c.l.b16 %v1702_v58  ;;  %v557_v20 = vor.u32 %v556_v56, %v553_v2  ;;  %v572_v43 = vrot.slane %v570_v22, 5 }
  0xcc   : > { %v1919_v18 = vpop.f32.mrf.mxu3  ;;  %v990_v42 = vadd.f32 %v3098_v48, %v760_v34  ;;  %v539_v48 = vsel %vm2802_vm3, %v534_v35, %v3110_v62  ;;  %v567_v21 = vor.u32 %v566_v6, %v3160_v5  ;;  %v2634_v35 = vld [vmem:[%s2787_s6 + $0xb0] sm:$0x1] }
  0xcd   : > { %v1992_v44 = vadd.f32 %v1919_v18, %v1326_v28  ;;  %v651_v59 = vunpack.c.l.b16 %v539_v48  ;;  %v3170_v28 = vrot.slane %v1723_v13, 5  ;;  %v558_v18 = vrot.slane %v557_v20, 4  ;;  %v2685_v48 = vld [vmem:[%s2787_s6 + $0x9c] sm:$0xff] }
  0xce   : > { %v3132_v29 = vpop.f32.mrf.mxu2  ;;  %2376 = vmatmul.msk.bf16.gmra.mxu0 %vm687_vm0, %v670_v32  ;;  %v1327_v62 = vadd.f32 %v3115_v4, %v990_v42  ;;  %v1727_v4 = vshrl.u32 %v2633_v63, 16  ;;  %v568_v41 = vrot.slane %v567_v21, 4  ;;  %v1733_v38 = vshll.u32 %v2634_v35, 16 }
  0xcf   : > { %v2029_v51 = vsel %vm2019_vm5, %v1992_v44, 0.0  ;;  %v2096_v52 = vmul.f32 %v1992_v44, %v1992_v44  ;;  %v2198_v53 = vpack.c.bf16 %v1992_v44, %v1992_v44  ;;  %v671_v37 = vpack.c.b16 %v652_v16, %v651_v59  ;;  %v212_v44 = vld [vmem:[%s2787_s6 + $0xac] sm:$0xf]  ;;  %v233_v16 = vld [vmem:[%s2787_s6 + $0xb0] sm:$0x1] }
  0xd0   : > { %v2030_v55 = vadd.f32 %v2029_v51, %v2028_v23  ;;  %v1716_v23 = vrot.slane %v1714_v61, 4  ;;  %v1729_v34 = vrot.slane %v1727_v4, 4  ;;  %v563_v49 = vsel %vm2802_vm3, %v558_v18, %v3160_v5  ;;  %v2636_v61 = vld [vmem:[%s2787_s6 + $0xb8] sm:$0xf] }
  0xd1   : > { %v3139_v54 = vpop.f32.mrf.mxu1  ;;  %v2132_v0 = vsel %vm2019_vm5, %v2096_v52, 0.0  ;;  %2231 = vst.msk [vmem:[%s3017_s10 + $0x14] sm:$0xf] %vm2225_vm4, %v2198_v53  ;;  %2664 = vmatmul.msk.bf16.gmra.mxu3 %vm687_vm0, %v1833_v11  ;;  %v2705_v52 = vld [vmem:[%s2787_s6 + $0xa8] sm:$0xff]  ;;  %v575_v53 = vshrl.u32 %v211_v39, 16  ;;  %v588_v57 = vshrl.u32 %v212_v44, 16  ;;  %v653_v20 = vunpack.c.l.b16 %v563_v49 }
  0xd2   : > { %v2133_v3 = vadd.f32 %v2132_v0, %v2131_v27  ;;  %v1720_v30 = vor.u32 %v1719_v33, %v1716_v23  ;;  %v1735_v6 = vrot.slane %v1733_v38, 5  ;;  %v1747_v22 = vshll.u32 %v2636_v61, 16 }
  0xd3   : > { %2589 = vmatmul.msk.bf16.gmra.mxu2 %vm687_vm0, %v2704_v45  ;;  %v762_v7 = vpop.f32.mrf.mxu0  ;;  %v1834_v45 = vpack.c.b16 %v1815_v19, %v1814_v17  ;;  %v577_v8 = vrot.slane %v575_v53, 4  ;;  %v590_v13 = vrot.slane %v588_v57, 4  ;;  %v594_v33 = vshll.u32 %v233_v16, 16 }
  0xd4   : > { %2465 = vmatmul.msk.bf16.gmra.mxu1 %vm687_vm0, %v2684_v47  ;;  %v1922_v9 = vpop.f32.mrf.mxu3  ;;  %v992_v26 = vadd.f32 %v3123_v1, %v762_v7  ;;  %v1730_v47 = vor.u32 %v1729_v34, %v3170_v28  ;;  %v1721_v56 = vrot.slane %v1720_v30, 4 }
  0xd5   : > { %v1993_v15 = vadd.f32 %v1922_v9, %v1327_v62  ;;  %v2635_v62 = vld [vmem:[%s2787_s6 + $0xb4] sm:$0xf]  ;;  %v596_v38 = vrot.slane %v594_v33, 5 }
  0xd6   : > { %v3163_v10 = vpop.f32.mrf.mxu2  ;;  %v1328_v1 = vadd.f32 %v3132_v29, %v992_v26  ;;  %v578_v29 = vshll.u32 %v211_v39, 16  ;;  %v1738_v4 = vshrl.u32 %v2635_v62, 16  ;;  %v1741_v21 = vshll.u32 %v2635_v62, 16 }
  0xd7   : > { %v2031_v24 = vsel %vm2019_vm5, %v1993_v15, 0.0  ;;  %v2097_v14 = vmul.f32 %v1993_v15, %v1993_v15  ;;  %v2199_v25 = vpack.c.bf16 %v1993_v15, %v1993_v15 }
  0xd8   : > { %v2032_v32 = vadd.f32 %v2031_v24, %v2030_v55  ;;  %v584_v55 = vshll.u32 %v212_v44, 16  ;;  %v580_v9 = vrot.slane %v578_v29, 5  ;;  %v1740_v34 = vrot.slane %v1738_v4, 4 }
  0xd9   : > { %v3168_v27 = vpop.f32.mrf.mxu1  ;;  %v2134_v11 = vsel %vm2019_vm5, %v2097_v14, 0.0  ;;  %2232 = vst.msk [vmem:[%s3017_s10 + $0x18] sm:$0xf] %vm2225_vm4, %v2199_v25  ;;  %v1726_v14 = vsel %vm2802_vm3, %v1721_v56, %v3170_v28  ;;  %v1743_v28 = vrot.slane %v1741_v21, 5 }
  0xda   : > { %v2135_v36 = vadd.f32 %v2134_v11, %v2133_v3  ;;  %v1731_v3 = vrot.slane %v1730_v47, 4  ;;  %v3203_v12 = vrot.slane %v584_v55, 5  ;;  %v581_v26 = vor.u32 %v580_v9, %v577_v8 }
  0xdb   : > { %v765_v40 = vpop.f32.mrf.mxu0 }
  0xdc   : > { %v1924_v42 = vpop.f32.mrf.mxu3  ;;  %v995_v51 = vadd.f32 %v3139_v54, %v765_v40  ;;  %v573_v54 = vsel %vm2802_vm3, %v568_v41, %v572_v43  ;;  %v1736_v25 = vsel %vm2802_vm3, %v1731_v3, %v1735_v6  ;;  %v3217_v40 = vrot.slane %v1747_v22, 5  ;;  %v2639_v22 = vld [vmem:[%s2787_s6 + $0xc4] sm:$0xf] }
  0xdd   : > { %v1994_v50 = vadd.f32 %v1924_v42, %v1328_v1  ;;  %v654_v24 = vunpack.c.l.b16 %v573_v54  ;;  %v2637_v1 = vld [vmem:[%s2787_s6 + $0xbc] sm:$0x1]  ;;  %v1816_v42 = vunpack.c.l.b16 %v1726_v14  ;;  %v582_v47 = vrot.slane %v581_v26, 4  ;;  %v2686_v54 = vld [vmem:[%s2787_s6 + $0xa8] sm:$0xff] }
  0xde   : > { %v3179_v46 = vpop.f32.mrf.mxu2  ;;  %2377 = vmatmul.msk.bf16.gmra.mxu0 %vm687_vm0, %v671_v37  ;;  %v1329_v7 = vadd.f32 %v3163_v10, %v995_v51  ;;  %v1751_v10 = vshrl.u32 %v2636_v61, 16 }
  0xdf   : > { %v2033_v58 = vsel %vm2019_vm5, %v1994_v50, 0.0  ;;  %v2098_v60 = vmul.f32 %v1994_v50, %v1994_v50  ;;  %v2200_v63 = vpack.c.bf16 %v1994_v50, %v1994_v50  ;;  %v672_v44 = vpack.c.b16 %v654_v24, %v653_v20 }
  0xe0   : > { %v2034_v2 = vadd.f32 %v2033_v58, %v2032_v32  ;;  %v591_v32 = vor.u32 %v590_v13, %v3203_v12  ;;  %v1753_v41 = vrot.slane %v1751_v10, 4 }
  0xe1   : > { %v3190_v0 = vpop.f32.mrf.mxu1  ;;  %v2136_v5 = vsel %vm2019_vm5, %v2098_v60, 0.0  ;;  %2233 = vst.msk [vmem:[%s3017_s10 + $0x1c] sm:$0xf] %vm2225_vm4, %v2200_v63  ;;  %2665 = vmatmul.msk.bf16.gmra.mxu3 %vm687_vm0, %v1834_v45  ;;  %v1817_v45 = vunpack.c.l.b16 %v1736_v25  ;;  %v2706_v60 = vld [vmem:[%s2787_s6 + $0xb4] sm:$0xff] }
  0xe2   : > { %v2137_v59 = vadd.f32 %v2136_v5, %v2135_v36  ;;  %v1754_v49 = vor.u32 %v1753_v41, %v3217_v40  ;;  %v213_v63 = vld [vmem:[%s2787_s6 + $0xb4] sm:$0xf] }
  0xe3   : > { %2590 = vmatmul.msk.bf16.gmra.mxu2 %vm687_vm0, %v2705_v52  ;;  %v767_v15 = vpop.f32.mrf.mxu0  ;;  %v1757_v52 = vshll.u32 %v2637_v1, 16  ;;  %v1835_v58 = vpack.c.b16 %v1817_v45, %v1816_v42  ;;  %v599_v9 = vshrl.u32 %v213_v63, 16  ;;  %v602_v13 = vshll.u32 %v213_v63, 16 }
  0xe4   : > { %2466 = vmatmul.msk.bf16.gmra.mxu1 %vm687_vm0, %v2685_v48  ;;  %v1927_v17 = vpop.f32.mrf.mxu3  ;;  %v997_v37 = vadd.f32 %v3168_v27, %v767_v15  ;;  %v592_v27 = vrot.slane %v591_v32, 4  ;;  %v1744_v48 = vor.u32 %v1743_v28, %v1740_v34  ;;  %v1755_v8 = vrot.slane %v1754_v49, 4 }
  0xe5   : > { %v1995_v23 = vadd.f32 %v1927_v17, %v1329_v7  ;;  %v1759_v61 = vrot.slane %v1757_v52, 5  ;;  %v2638_v17 = vld [vmem:[%s2787_s6 + $0xc0] sm:$0xf]  ;;  %v601_v25 = vrot.slane %v599_v9, 4  ;;  %v604_v32 = vrot.slane %v602_v13, 5 }
  0xe6   : > { %v1266_v19 = vpop.f32.mrf.mxu2  ;;  %v1330_v50 = vadd.f32 %v3179_v46, %v997_v37  ;;  %v587_v46 = vsel %vm2802_vm3, %v582_v47, %v3203_v12  ;;  %v597_v62 = vsel %vm2802_vm3, %v592_v27, %v596_v38  ;;  %v1745_v7 = vrot.slane %v1744_v48, 4 }
  0xe7   : > { %v2035_v11 = vsel %vm2019_vm5, %v1995_v23, 0.0  ;;  %v2099_v35 = vmul.f32 %v1995_v23, %v1995_v23  ;;  %v2201_v36 = vpack.c.bf16 %v1995_v23, %v1995_v23  ;;  %v655_v21 = vunpack.c.l.b16 %v587_v46 }
  0xe8   : > { %v2036_v39 = vadd.f32 %v2035_v11, %v2034_v2  ;;  %v214_v2 = vld [vmem:[%s2787_s6 + $0xb8] sm:$0xf]  ;;  %v656_v24 = vunpack.c.l.b16 %v597_v62  ;;  %v1760_v14 = vsel %vm2802_vm3, %v1755_v8, %v1759_v61  ;;  %v1762_v34 = vshrl.u32 %v2638_v17, 16  ;;  %v234_v11 = vld [vmem:[%s2787_s6 + $0xbc] sm:$0x1]  ;;  %v2707_v62 = vld [vmem:[%s2787_s6 + $0xc0] sm:$0xff] }
  0xe9   : > { %v3214_v18 = vpop.f32.mrf.mxu1  ;;  %v2138_v43 = vsel %vm2019_vm5, %v2099_v35, 0.0  ;;  %2234 = vst.msk [vmem:[%s3017_s10 + $0x20] sm:$0xf] %vm2225_vm4, %v2201_v36  ;;  %v608_v4 = vshll.u32 %v214_v2, 16  ;;  %v612_v16 = vshrl.u32 %v214_v2, 16  ;;  %v1765_v36 = vshll.u32 %v2638_v17, 16 }
  0xea   : > { %v2139_v30 = vadd.f32 %v2138_v43, %v2137_v59  ;;  %v1771_v37 = vshll.u32 %v2639_v22, 16  ;;  %v673_v42 = vpack.c.b16 %v656_v24, %v655_v21  ;;  %v605_v27 = vor.u32 %v604_v32, %v601_v25 }
  0xeb   : > { %v770_v51 = vpop.f32.mrf.mxu0  ;;  %v3251_v33 = vrot.slane %v608_v4, 5  ;;  %v614_v35 = vrot.slane %v612_v16, 4  ;;  %v618_v38 = vshll.u32 %v234_v11, 16  ;;  %v1767_v52 = vrot.slane %v1765_v36, 5 }
  0xec   : > { %v1929_v53 = vpop.f32.mrf.mxu3  ;;  %v1000_v57 = vadd.f32 %v3190_v0, %v770_v51  ;;  %v606_v2 = vrot.slane %v605_v27, 4 }
  0xed   : > { %v1996_v55 = vadd.f32 %v1929_v53, %v1330_v50  ;;  %v1764_v50 = vrot.slane %v1762_v34, 4  ;;  %v1773_v53 = vrot.slane %v1771_v37, 5 }
  0xee   : > { %v3223_v29 = vpop.f32.mrf.mxu2  ;;  %2378 = vmatmul.msk.bf16.gmra.mxu0 %vm687_vm0, %v672_v44  ;;  %v1331_v12 = vadd.f32 %v1266_v19, %v1000_v57  ;;  %v1750_v19 = vsel %vm2802_vm3, %v1745_v7, %v3217_v40  ;;  %v2640_v57 = vld [vmem:[%s2787_s6 + $0xc8] sm:$0x1]  ;;  %v611_v21 = vsel %vm2802_vm3, %v606_v2, %v3251_v33 }
  0xef   : > { %v2037_v56 = vsel %vm2019_vm5, %v1996_v55, 0.0  ;;  %v2100_v3 = vmul.f32 %v1996_v55, %v1996_v55  ;;  %v2202_v6 = vpack.c.bf16 %v1996_v55, %v1996_v55  ;;  %v1818_v45 = vunpack.c.l.b16 %v1750_v19 }
  0xf0   : > { %v2038_v5 = vadd.f32 %v2037_v56, %v2036_v39  ;;  %v1775_v39 = vshrl.u32 %v2639_v22, 16  ;;  %v615_v55 = vor.u32 %v614_v35, %v3251_v33  ;;  %v2687_v56 = vld [vmem:[%s2787_s6 + $0xb4] sm:$0xff]  ;;  %v657_v19 = vunpack.c.l.b16 %v611_v21 }
  0xf1   : > { %v1004_v0 = vpop.f32.mrf.mxu1  ;;  %v2140_v59 = vsel %vm2019_vm5, %v2100_v3, 0.0  ;;  %2235 = vst.msk [vmem:[%s3017_s10 + $0x24] sm:$0xf] %vm2225_vm4, %v2202_v6  ;;  %2666 = vmatmul.msk.bf16.gmra.mxu3 %vm687_vm0, %v1835_v58  ;;  %v620_v3 = vrot.slane %v618_v38, 5  ;;  %v1768_v6 = vor.u32 %v1767_v52, %v1764_v50 }
  0xf2   : > { %v2141_v15 = vadd.f32 %v2140_v59, %v2139_v30  ;;  %v1819_v30 = vunpack.c.l.b16 %v1760_v14  ;;  %v1777_v48 = vrot.slane %v1775_v39, 4  ;;  %v616_v59 = vrot.slane %v615_v55, 4 }
  0xf3   : > { %2591 = vmatmul.msk.bf16.gmra.mxu2 %vm687_vm0, %v2706_v60  ;;  %v772_v20 = vpop.f32.mrf.mxu0 }
  0xf4   : > { %2467 = vmatmul.msk.bf16.gmra.mxu1 %vm687_vm0, %v2686_v54  ;;  %v1932_v10 = vpop.f32.mrf.mxu3  ;;  %v1002_v40 = vadd.f32 %v3214_v18, %v772_v20  ;;  %v1836_v46 = vpack.c.b16 %v1819_v30, %v1818_v45  ;;  %v1778_v61 = vor.u32 %v1777_v48, %v1773_v53  ;;  %v621_v22 = vsel %vm2802_vm3, %v616_v59, %v620_v3 }
  0xf5   : > { %v1997_v26 = vadd.f32 %v1932_v10, %v1331_v12  ;;  %v658_v14 = vunpack.c.l.b16 %v621_v22 }
  0xf6   : > { %v1271_v23 = vpop.f32.mrf.mxu2  ;;  %v1332_v18 = vadd.f32 %v3223_v29, %v1002_v40  ;;  %v1779_v16 = vrot.slane %v1778_v61, 4 }
  0xf7   : > { %v2039_v1 = vsel %vm2019_vm5, %v1997_v26, 0.0  ;;  %v2101_v28 = vmul.f32 %v1997_v26, %v1997_v26  ;;  %v2203_v41 = vpack.c.bf16 %v1997_v26, %v1997_v26 }
  0xf8   : > { %v2040_v44 = vadd.f32 %v2039_v1, %v2038_v5  ;;  %v1781_v5 = vshll.u32 %v2640_v57, 16 }
  0xf9   : > { %v1006_v43 = vpop.f32.mrf.mxu1  ;;  %v2142_v47 = vsel %vm2019_vm5, %v2101_v28, 0.0  ;;  %2236 = vst.msk [vmem:[%s3017_s10 + $0x28] sm:$0xf] %vm2225_vm4, %v2203_v41  ;;  %v674_v41 = vpack.c.b16 %v658_v14, %v657_v19 }
  0xfa   : > { %v2143_v51 = vadd.f32 %v2142_v47, %v2141_v15  ;;  %v1769_v15 = vrot.slane %v1768_v6, 4  ;;  %v1783_v17 = vrot.slane %v1781_v5, 5 }
  0xfb   : > { %v775_v49 = vpop.f32.mrf.mxu0 }
  0xfc   : > { %v1934_v58 = vpop.f32.mrf.mxu3  ;;  %v1005_v54 = vadd.f32 %v1004_v0, %v775_v49  ;;  %v1774_v25 = vsel %vm2802_vm3, %v1769_v15, %v1773_v53  ;;  %v1784_v26 = vsel %vm2802_vm3, %v1779_v16, %v1783_v17 }
  0xfd   : > { %v1998_v63 = vadd.f32 %v1934_v58, %v1332_v18  ;;  %v1820_v39 = vunpack.c.l.b16 %v1774_v25  ;;  %v1821_v1 = vunpack.c.l.b16 %v1784_v26 }
  0xfe   : > { %v1273_v60 = vpop.f32.mrf.mxu2  ;;  %2379 = vmatmul.msk.bf16.gmra.mxu0 %vm687_vm0, %v673_v42  ;;  %v1333_v13 = vadd.f32 %v1271_v23, %v1005_v54 }
  0xff   : > { %v2041_v29 = vsel %vm2019_vm5, %v1998_v63, 0.0  ;;  %v2102_v7 = vmul.f32 %v1998_v63, %v1998_v63  ;;  %v2204_v8 = vpack.c.bf16 %v1998_v63, %v1998_v63  ;;  %v1837_v47 = vpack.c.b16 %v1821_v1, %v1820_v39 }
 0x100   : > { %v2042_v12 = vadd.f32 %v2041_v29, %v2040_v44 }
 0x101   : > { %v1009_v9 = vpop.f32.mrf.mxu1  ;;  %v2144_v0 = vsel %vm2019_vm5, %v2102_v7, 0.0  ;;  %2237 = vst.msk [vmem:[%s3017_s10 + $0x2c] sm:$0xf] %vm2225_vm4, %v2204_v8  ;;  %2667 = vmatmul.msk.bf16.gmra.mxu3 %vm687_vm0, %v1836_v46 }
 0x102   : > { %v2145_v4 = vadd.f32 %v2144_v0, %v2143_v51 }
 0x103   : > { %2592 = vmatmul.msk.bf16.gmra.mxu2 %vm687_vm0, %v2707_v62  ;;  %v777_v20 = vpop.f32.mrf.mxu0 }
 0x104   : > { %2468 = vmatmul.msk.bf16.gmra.mxu1 %vm687_vm0, %v2687_v56  ;;  %v1937_v10 = vpop.f32.mrf.mxu3  ;;  %v1007_v33 = vadd.f32 %v1006_v43, %v777_v20 }
 0x105   : > { %v1999_v23 = vadd.f32 %v1937_v10, %v1333_v13 }
 0x106   : > { %v1276_v24 = vpop.f32.mrf.mxu2  ;;  %v1334_v40 = vadd.f32 %v1273_v60, %v1007_v33 }
 0x107   : > { %v2043_v32 = vsel %vm2019_vm5, %v1999_v23, 0.0  ;;  %v2103_v34 = vmul.f32 %v1999_v23, %v1999_v23  ;;  %v2205_v11 = vpack.c.bf16 %v1999_v23, %v1999_v23 }
 0x108   : > { %v2044_v36 = vadd.f32 %v2043_v32, %v2042_v12 }
 0x109   : > { %v1011_v35 = vpop.f32.mrf.mxu1  ;;  %v2146_v37 = vsel %vm2019_vm5, %v2103_v34, 0.0  ;;  %2238 = vst.msk [vmem:[%s3017_s10 + $0x30] sm:$0xf] %vm2225_vm4, %v2205_v11 }
 0x10a   : > { %v2147_v28 = vadd.f32 %v2146_v37, %v2145_v4 }
 0x10b   : > { %v780_v44 = vpop.f32.mrf.mxu0 }
 0x10c   : > { %v1939_v31 = vpop.f32.mrf.mxu3  ;;  %v1010_v30 = vadd.f32 %v1009_v9, %v780_v44 }
 0x10d   : > { %v2000_v45 = vadd.f32 %v1939_v31, %v1334_v40 }
 0x10e   : > { %v1278_v42 = vpop.f32.mrf.mxu2  ;;  %2380 = vmatmul.msk.bf16.gmra.mxu0 %vm687_vm0, %v674_v41  ;;  %v1335_v53 = vadd.f32 %v1276_v24, %v1010_v30 }
 0x10f   : > { %v2045_v43 = vsel %vm2019_vm5, %v2000_v45, 0.0  ;;  %v2104_v27 = vmul.f32 %v2000_v45, %v2000_v45  ;;  %v2206_v38 = vpack.c.bf16 %v2000_v45, %v2000_v45 }
 0x110   : > { %v2046_v51 = vadd.f32 %v2045_v43, %v2044_v36 }
 0x111   : > { %v1014_v50 = vpop.f32.mrf.mxu1  ;;  %v2148_v52 = vsel %vm2019_vm5, %v2104_v27, 0.0  ;;  %2239 = vst.msk [vmem:[%s3017_s10 + $0x34] sm:$0xf] %vm2225_vm4, %v2206_v38  ;;  %2668 = vmatmul.msk.bf16.gmra.mxu3 %vm687_vm0, %v1837_v47 }
 0x112   : > { %v2149_v48 = vadd.f32 %v2148_v52, %v2147_v28 }
 0x113   : > { %v782_v18 = vpop.f32.mrf.mxu0 }
 0x114   : > { %v1942_v49 = vpop.f32.mrf.mxu3  ;;  %v1012_v54 = vadd.f32 %v1011_v35, %v782_v18 }
 0x115   : > { %v2001_v57 = vadd.f32 %v1942_v49, %v1335_v53 }
 0x116   : > { %v1281_v55 = vpop.f32.mrf.mxu2  ;;  %v1336_v3 = vadd.f32 %v1278_v42, %v1012_v54 }
 0x117   : > { %v2047_v58 = vsel %vm2019_vm5, %v2001_v57, 0.0  ;;  %v2105_v60 = vmul.f32 %v2001_v57, %v2001_v57  ;;  %v2207_v63 = vpack.c.bf16 %v2001_v57, %v2001_v57 }
 0x118   : > { %v2048_v62 = vadd.f32 %v2047_v58, %v2046_v51 }
 0x119   : > { %v1016_v46 = vpop.f32.mrf.mxu1  ;;  %v2150_v2 = vsel %vm2019_vm5, %v2105_v60, 0.0  ;;  %2240 = vst.msk [vmem:[%s3017_s10 + $0x38] sm:$0xf] %vm2225_vm4, %v2207_v63 }
 0x11a   : > { %v2151_v56 = vadd.f32 %v2150_v2, %v2149_v48 }
 0x11b   : > { %v785_v6 = vpop.f32.mrf.mxu0 }
 0x11c   : > { %v1944_v61 = vpop.f32.mrf.mxu3  ;;  %v1015_v7 = vadd.f32 %v1014_v50, %v785_v6 }
 0x11d   : > { %v2002_v29 = vadd.f32 %v1944_v61, %v1336_v3 }
 0x11e   : > { %v1283_v5 = vpop.f32.mrf.mxu2  ;;  %v1337_v4 = vadd.f32 %v1281_v55, %v1015_v7 }
 0x11f   : > { %v2049_v8 = vsel %vm2019_vm5, %v2002_v29, 0.0  ;;  %v2106_v9 = vmul.f32 %v2002_v29, %v2002_v29  ;;  %v2208_v59 = vpack.c.bf16 %v2002_v29, %v2002_v29 }
 0x120   : > { %v2050_v0 = vadd.f32 %v2049_v8, %v2048_v62 }
 0x121   : > { %v1019_v12 = vpop.f32.mrf.mxu1  ;;  %v2152_v13 = vsel %vm2019_vm5, %v2106_v9, 0.0  ;;  %2241 = vst.msk [vmem:[%s3017_s10 + $0x3c] sm:$0xf] %vm2225_vm4, %v2208_v59 }
 0x122   : > { %v2153_v15 = vadd.f32 %v2152_v13, %v2151_v56 }
 0x123   : > { %v787_v16 = vpop.f32.mrf.mxu0 }
 0x124   : > { %v1947_v17 = vpop.f32.mrf.mxu3  ;;  %v1017_v23 = vadd.f32 %v1016_v46, %v787_v16 }
 0x125   : > { %v2003_v21 = vadd.f32 %v1947_v17, %v1337_v4 }
 0x126   : > { %v1286_v20 = vpop.f32.mrf.mxu2  ;;  %v1338_v32 = vadd.f32 %v1283_v5, %v1017_v23 }
 0x127   : > { %v2051_v22 = vsel %vm2019_vm5, %v2003_v21, 0.0  ;;  %v2107_v10 = vmul.f32 %v2003_v21, %v2003_v21  ;;  %v2209_v24 = vpack.c.bf16 %v2003_v21, %v2003_v21 }
 0x128   : > { %v2052_v14 = vadd.f32 %v2051_v22, %v2050_v0 }
 0x129   : > { %v1021_v19 = vpop.f32.mrf.mxu1  ;;  %v2154_v25 = vsel %vm2019_vm5, %v2107_v10, 0.0  ;;  %2242 = vst.msk [vmem:[%s3017_s10 + $0x40] sm:$0xf] %vm2225_vm4, %v2209_v24 }
 0x12a   : > { %v2155_v26 = vadd.f32 %v2154_v25, %v2153_v15 }
 0x12b   : > { %v790_v34 = vpop.f32.mrf.mxu0 }
 0x12c   : > { %v1949_v11 = vpop.f32.mrf.mxu3  ;;  %v1020_v36 = vadd.f32 %v1019_v12, %v790_v34 }
 0x12d   : > { %v2004_v35 = vadd.f32 %v1949_v11, %v1338_v32 }
 0x12e   : > { %v1288_v33 = vpop.f32.mrf.mxu2  ;;  %v1339_v44 = vadd.f32 %v1286_v20, %v1020_v36 }
 0x12f   : > { %v2053_v37 = vsel %vm2019_vm5, %v2004_v35, 0.0  ;;  %v2108_v39 = vmul.f32 %v2004_v35, %v2004_v35  ;;  %v2210_v1 = vpack.c.bf16 %v2004_v35, %v2004_v35 }
 0x130   : > { %v2054_v41 = vadd.f32 %v2053_v37, %v2052_v14 }
 0x131   : > { %v1024_v28 = vpop.f32.mrf.mxu1  ;;  %v2156_v40 = vsel %vm2019_vm5, %v2108_v39, 0.0  ;;  %2243 = vst.msk [vmem:[%s3017_s10 + $0x44] sm:$0xf] %vm2225_vm4, %v2210_v1 }
 0x132   : > { %v2157_v31 = vadd.f32 %v2156_v40, %v2155_v26 }
 0x133   : > { %v792_v42 = vpop.f32.mrf.mxu0 }
 0x134   : > { %v1952_v45 = vpop.f32.mrf.mxu3  ;;  %v1022_v50 = vadd.f32 %v1021_v19, %v792_v42 }
 0x135   : > { %v2005_v47 = vadd.f32 %v1952_v45, %v1339_v44 }
 0x136   : > { %v1291_v30 = vpop.f32.mrf.mxu2  ;;  %v1340_v18 = vadd.f32 %v1288_v33, %v1022_v50 }
 0x137   : > { %v2055_v43 = vsel %vm2019_vm5, %v2005_v47, 0.0  ;;  %v2109_v27 = vmul.f32 %v2005_v47, %v2005_v47  ;;  %v2211_v38 = vpack.c.bf16 %v2005_v47, %v2005_v47 }
 0x138   : > { %v2056_v52 = vadd.f32 %v2055_v43, %v2054_v41 }
 0x139   : > { %v1026_v51 = vpop.f32.mrf.mxu1  ;;  %v2158_v53 = vsel %vm2019_vm5, %v2109_v27, 0.0  ;;  %2244 = vst.msk [vmem:[%s3017_s10 + $0x48] sm:$0xf] %vm2225_vm4, %v2211_v38 }
 0x13a   : > { %v2159_v48 = vadd.f32 %v2158_v53, %v2157_v31 }
 0x13b   : > { %v795_v49 = vpop.f32.mrf.mxu0 }
 0x13c   : > { %v1954_v55 = vpop.f32.mrf.mxu3  ;;  %v1025_v60 = vadd.f32 %v1024_v28, %v795_v49 }
 0x13d   : > { %v2006_v58 = vadd.f32 %v1954_v55, %v1340_v18 }
 0x13e   : > { %v1293_v57 = vpop.f32.mrf.mxu2  ;;  %v1341_v3 = vadd.f32 %v1291_v30, %v1025_v60 }
 0x13f   : > { %v2057_v63 = vsel %vm2019_vm5, %v2006_v58, 0.0  ;;  %v2110_v54 = vmul.f32 %v2006_v58, %v2006_v58  ;;  %v2212_v46 = vpack.c.bf16 %v2006_v58, %v2006_v58 }
 0x140   : > { %v2058_v2 = vadd.f32 %v2057_v63, %v2056_v52 }
 0x141   : > { %v1029_v62 = vpop.f32.mrf.mxu1  ;;  %v2160_v56 = vsel %vm2019_vm5, %v2110_v54, 0.0  ;;  %2245 = vst.msk [vmem:[%s3017_s10 + $0x4c] sm:$0xf] %vm2225_vm4, %v2212_v46 }
 0x142   : > { %v2161_v6 = vadd.f32 %v2160_v56, %v2159_v48 }
 0x143   : > { %v797_v61 = vpop.f32.mrf.mxu0 }
 0x144   : > { %v1957_v5 = vpop.f32.mrf.mxu3  ;;  %v1027_v12 = vadd.f32 %v1026_v51, %v797_v61 }
 0x145   : > { %v2007_v7 = vadd.f32 %v1957_v5, %v1341_v3 }
 0x146   : > { %v1296_v29 = vpop.f32.mrf.mxu2  ;;  %v1342_v16 = vadd.f32 %v1293_v57, %v1027_v12 }
 0x147   : > { %v2059_v8 = vsel %vm2019_vm5, %v2007_v7, 0.0  ;;  %v2111_v9 = vmul.f32 %v2007_v7, %v2007_v7  ;;  %v2213_v59 = vpack.c.bf16 %v2007_v7, %v2007_v7 }
 0x148   : > { %v3316_v13 = vadd.f32 %v2059_v8, %v2058_v2 }
 0x149   : > { %v1031_v0 = vpop.f32.mrf.mxu1  ;;  %v2162_v4 = vsel %vm2019_vm5, %v2111_v9, 0.0  ;;  %2246 = vst.msk [vmem:[%s3017_s10 + $0x50] sm:$0xf] %vm2225_vm4, %v2213_v59 }
 0x14a   : > { %v3321_v15 = vadd.f32 %v2162_v4, %v2161_v6 }
 0x14b   : > { %v800_v17 = vpop.f32.mrf.mxu0 }
 0x14c   : > { %v1959_v20 = vpop.f32.mrf.mxu3  ;;  %v1030_v10 = vadd.f32 %v1029_v62, %v800_v17 }
 0x14d   : > { %v3323_v22 = vadd.f32 %v1959_v20, %v1342_v16 }
 0x14e   : > { %v1298_v21 = vpop.f32.mrf.mxu2  ;;  %v1343_v19 = vadd.f32 %v1296_v29, %v1030_v10 }
 0x14f   : > { %v2214_v24 = vpack.c.bf16 %v3323_v22, %v3323_v22  ;;  %v2112_v12 = vmul.f32 %v3323_v22, %v3323_v22  ;;  %v2061_v17 = vsel %vm2019_vm5, %v3323_v22, 0.0 }
 0x151   : > { %v1034_v23 = vpop.f32.mrf.mxu1  ;;  %2247 = vst.msk [vmem:[%s3017_s10 + $0x54] sm:$0xf] %vm2225_vm4, %v2214_v24  ;;  %v2164_v20 = vsel %vm2019_vm5, %v2112_v12, 0.0 }
 0x153   : > { %v802_v14 = vpop.f32.mrf.mxu0 }
 0x154   : > { %v1962_v25 = vpop.f32.mrf.mxu3  ;;  %v1032_v11 = vadd.f32 %v1031_v0, %v802_v14 }
 0x155   : > { %v2009_v32 = vadd.f32 %v1962_v25, %v1343_v19  ;;  %v2062_v19 = vadd.f32 %v2061_v17, %v3316_v13 }
 0x156   : > { %v1301_v26 = vpop.f32.mrf.mxu2  ;;  %v1344_v35 = vadd.f32 %v1298_v21, %v1032_v11 }
 0x157   : > { %v2215_v34 = vpack.c.bf16 %v2009_v32, %v2009_v32  ;;  %v2113_v16 = vmul.f32 %v2009_v32, %v2009_v32  ;;  %v2063_v21 = vsel %vm2019_vm5, %v2009_v32, 0.0 }
 0x159   : > { %2248 = vst.msk [vmem:[%s3017_s10 + $0x58] sm:$0xf] %vm2225_vm4, %v2215_v34  ;;  %v1036_v33 = vpop.f32.mrf.mxu1  ;;  %v2166_v14 = vsel %vm2019_vm5, %v2113_v16, 0.0 }
 0x15b   : > { %v805_v36 = vpop.f32.mrf.mxu0 }
 0x15c   : > { %v1964_v37 = vpop.f32.mrf.mxu3  ;;  %v1035_v1 = vadd.f32 %v1034_v23, %v805_v36  ;;  %v2064_v36 = vadd.f32 %v2063_v21, %v2062_v19 }
 0x15d   : > { %v2010_v39 = vadd.f32 %v1964_v37, %v1344_v35  ;;  %v2165_v35 = vadd.f32 %v2164_v20, %v3321_v15 }
 0x15e   : > { %v1303_v28 = vpop.f32.mrf.mxu2  ;;  %v1345_v40 = vadd.f32 %v1301_v26, %v1035_v1 }
 0x15f   : > { %v2216_v41 = vpack.c.bf16 %v2010_v39, %v2010_v39  ;;  %v2114_v10 = vmul.f32 %v2010_v39, %v2010_v39  ;;  %v2065_v34 = vsel %vm2019_vm5, %v2010_v39, 0.0  ;;  %v2167_v13 = vadd.f32 %v2166_v14, %v2165_v35 }
 0x161   : > { %2249 = vst.msk [vmem:[%s3017_s10 + $0x5c] sm:$0xf] %vm2225_vm4, %v2216_v41  ;;  %v1039_v42 = vpop.f32.mrf.mxu1  ;;  %v2168_v32 = vsel %vm2019_vm5, %v2114_v10, 0.0  ;;  %v2066_v41 = vadd.f32 %v2065_v34, %v2064_v36 }
 0x163   : > { %v807_v44 = vpop.f32.mrf.mxu0 }
 0x164   : > { %v1967_v31 = vpop.f32.mrf.mxu3  ;;  %v1037_v47 = vadd.f32 %v1036_v33, %v807_v44 }
 0x165   : > { %v2011_v45 = vadd.f32 %v1967_v31, %v1345_v40 }
 0x166   : > { %v1306_v43 = vpop.f32.mrf.mxu2  ;;  %v1346_v27 = vadd.f32 %v1303_v28, %v1037_v47 }
 0x167   : > { %v2217_v30 = vpack.c.bf16 %v2011_v45, %v2011_v45  ;;  %v2115_v11 = vmul.f32 %v2011_v45, %v2011_v45  ;;  %v2067_v37 = vsel %vm2019_vm5, %v2011_v45, 0.0 }
 0x168   : > { %v2068_v15 = vadd.f32 %v2067_v37, %v2066_v41 }
 0x169   : > { %2250 = vst.msk [vmem:[%s3017_s10 + $0x60] sm:$0xf] %vm2225_vm4, %v2217_v30  ;;  %v1041_v53 = vpop.f32.mrf.mxu1  ;;  %v2170_v44 = vsel %vm2019_vm5, %v2115_v11, 0.0  ;;  %v2169_v30 = vadd.f32 %v2168_v32, %v2167_v13 }
 0x16b   : > { %v810_v38 = vpop.f32.mrf.mxu0 }
 0x16c   : > { %v1969_v50 = vpop.f32.mrf.mxu3  ;;  %v1040_v52 = vadd.f32 %v1039_v42, %v810_v38 }
 0x16d   : > { %v2012_v51 = vadd.f32 %v1969_v50, %v1346_v27  ;;  %v2171_v27 = vadd.f32 %v2170_v44, %v2169_v30 }
 0x16e   : > { %v1347_v18 = vadd.f32 %v1306_v43, %v1040_v52  ;;  %v1308_v49 = vpop.f32.mrf.mxu2 }
 0x16f   : > { %v2218_v48 = vpack.c.bf16 %v2012_v51, %v2012_v51  ;;  %v2116_v1 = vmul.f32 %v2012_v51, %v2012_v51  ;;  %v2069_v39 = vsel %vm2019_vm5, %v2012_v51, 0.0 }
 0x170   : > { %v2070_v38 = vadd.f32 %v2069_v39, %v2068_v15 }
 0x171   : > { %2251 = vst.msk [vmem:[%s3017_s10 + $0x64] sm:$0xf] %vm2225_vm4, %v2218_v48  ;;  %v1044_v54 = vpop.f32.mrf.mxu1  ;;  %v2172_v43 = vsel %vm2019_vm5, %v2116_v1, 0.0 }
 0x173   : > { %v812_v55 = vpop.f32.mrf.mxu0 }
 0x174   : > { %v1972_v57 = vpop.f32.mrf.mxu3  ;;  %v1042_v63 = vadd.f32 %v1041_v53, %v812_v55 }
 0x175   : > { %v2013_v58 = vadd.f32 %v1972_v57, %v1347_v18 }
 0x176   : > { %v1348_v46 = vadd.f32 %v1308_v49, %v1042_v63  ;;  %v1311_v2 = vpop.f32.mrf.mxu2  ;;  %v2173_v49 = vadd.f32 %v2172_v43, %v2171_v27 }
 0x177   : > { %v2219_v60 = vpack.c.bf16 %v2013_v58, %v2013_v58  ;;  %v2117_v31 = vmul.f32 %v2013_v58, %v2013_v58  ;;  %v2071_v45 = vsel %vm2019_vm5, %v2013_v58, 0.0 }
 0x178   : > { %v2072_v55 = vadd.f32 %v2071_v45, %v2070_v38 }
 0x179   : > { %2252 = vst.msk [vmem:[%s3017_s10 + $0x68] sm:$0xf] %vm2225_vm4, %v2219_v60  ;;  %v1046_v29 = vpop.f32.mrf.mxu1  ;;  %v2174_v53 = vsel %vm2019_vm5, %v2117_v31, 0.0 }
 0x17b   : > { %v815_v62 = vpop.f32.mrf.mxu0 }
 0x17c   : > { %v1974_v56 = vpop.f32.mrf.mxu3  ;;  %v1045_v6 = vadd.f32 %v1044_v54, %v815_v62  ;;  %v2175_v62 = vadd.f32 %v2174_v53, %v2173_v49 }
 0x17d   : > { %v2014_v3 = vadd.f32 %v1974_v56, %v1348_v46 }
 0x17e   : > { %v1349_v5 = vadd.f32 %v1311_v2, %v1045_v6  ;;  %v1313_v59 = vpop.f32.mrf.mxu2 }
 0x17f   : > { %v2220_v61 = vpack.c.bf16 %v2014_v3, %v2014_v3  ;;  %v2118_v47 = vmul.f32 %v2014_v3, %v2014_v3  ;;  %v2073_v48 = vsel %vm2019_vm5, %v2014_v3, 0.0 }
 0x180   : > { %v2074_v2 = vadd.f32 %v2073_v48, %v2072_v55 }
 0x181   : > { %2253 = vst.msk [vmem:[%s3017_s10 + $0x6c] sm:$0xf] %vm2225_vm4, %v2220_v61  ;;  %v1049_v25 = vpop.f32.mrf.mxu1  ;;  %v2176_v57 = vsel %vm2019_vm5, %v2118_v47, 0.0 }
 0x182   : > { %v2177_v61 = vadd.f32 %v2176_v57, %v2175_v62 }
 0x183   : > { %v817_v7 = vpop.f32.mrf.mxu0 }
 0x184   : > { %v1977_v8 = vpop.f32.mrf.mxu3  ;;  %v1047_v4 = vadd.f32 %v1046_v29, %v817_v7 }
 0x185   : > { %v2015_v9 = vadd.f32 %v1977_v8, %v1349_v5 }
 0x186   : > { %v1350_v24 = vadd.f32 %v1313_v59, %v1047_v4  ;;  %v1316_v40 = vpop.f32.mrf.mxu2 }
 0x187   : > { %v2221_v0 = vpack.c.bf16 %v2015_v9, %v2015_v9  ;;  %v2119_v51 = vmul.f32 %v2015_v9, %v2015_v9  ;;  %v2075_v63 = vsel %vm2019_vm5, %v2015_v9, 0.0 }
 0x188   : > { %v2076_v5 = vadd.f32 %v2075_v63, %v2074_v2 }
 0x189   : > { %2254 = vst.msk [vmem:[%s3017_s10 + $0x70] sm:$0xf] %vm2225_vm4, %v2221_v0  ;;  %v1051_v60 = vpop.f32.mrf.mxu1  ;;  %v2178_v56 = vsel %vm2019_vm5, %v2119_v51, 0.0 }
 0x18a   : > { %v2179_v59 = vadd.f32 %v2178_v56, %v2177_v61 }
 0x18b   : > { %v820_v23 = vpop.f32.mrf.mxu0 }
 0x18c   : > { %v1979_v26 = vpop.f32.mrf.mxu3  ;;  %v1050_v33 = vadd.f32 %v1049_v25, %v820_v23 }
 0x18d   : > { %v2016_v22 = vadd.f32 %v1979_v26, %v1350_v24 }
 0x18e   : > { %v1351_v42 = vadd.f32 %v1316_v40, %v1050_v33  ;;  %v1318_v29 = vpop.f32.mrf.mxu2 }
 0x18f   : > { %v2222_v28 = vpack.c.bf16 %v2016_v22, %v2016_v22  ;;  %v2120_v54 = vmul.f32 %v2016_v22, %v2016_v22  ;;  %v2077_v6 = vsel %vm2019_vm5, %v2016_v22, 0.0 }
 0x190   : > { %v2078_v12 = vadd.f32 %v2077_v6, %v2076_v5 }
 0x191   : > { %2255 = vst.msk [vmem:[%s3017_s10 + $0x74] sm:$0xf] %vm2225_vm4, %v2222_v28  ;;  %v2180_v7 = vsel %vm2019_vm5, %v2120_v54, 0.0 }
 0x192   : > { %v2181_v17 = vadd.f32 %v2180_v7, %v2179_v59 }
 0x193   : > { %v822_v52 = vpop.f32.mrf.mxu0 }
 0x194   : > { %v1982_v50 = vpop.f32.mrf.mxu3  ;;  %v1052_v46 = vadd.f32 %v1051_v60, %v822_v52 }
 0x195   : > { %v2017_v18 = vadd.f32 %v1982_v50, %v1351_v42 }
 0x196   : > { %v1352_v9 = vadd.f32 %v1318_v29, %v1052_v46 }
 0x197   : > { %v2223_v58 = vpack.c.bf16 %v2017_v18, %v2017_v18  ;;  %v2121_v3 = vmul.f32 %v2017_v18, %v2017_v18  ;;  %v2079_v8 = vsel %vm2019_vm5, %v2017_v18, 0.0 }
 0x198   : > { %v2080_v20 = vadd.f32 %v2079_v8, %v2078_v12 }
 0x199   : > { %2256 = vst.msk [vmem:[%s3017_s10 + $0x78] sm:$0xf] %vm2225_vm4, %v2223_v58  ;;  %v2182_v4 = vsel %vm2019_vm5, %v2121_v3, 0.0 }
 0x19a   : > { %v2183_v23 = vadd.f32 %v2182_v4, %v2181_v17 }
 0x19c   : > { %v1984_v0 = vpop.f32.mrf.mxu3 }
 0x19d   : > { %v2018_v16 = vadd.f32 %v1984_v0, %v1352_v9 }
 0x19f   : > { %v2081_v21 = vsel %vm2019_vm5, %v2018_v16, 0.0  ;;  %v2122_v10 = vmul.f32 %v2018_v16, %v2018_v16  ;;  %v2224_v24 = vpack.c.bf16 %v2018_v16, %v2018_v16 }
 0x1a0   : > { %v2082_v19 = vadd.f32 %v2081_v21, %v2080_v20 }
 0x1a1   : > { %v2184_v14 = vsel %vm2019_vm5, %v2122_v10, 0.0  ;;  %2257 = vst.msk [vmem:[%s3017_s10 + $0x7c] sm:$0xf] %vm2225_vm4, %v2224_v24 }
 0x1a2   : > { %v2083_v25 = vrot.slane %v2082_v19, 4  ;;  %v2185_v26 = vadd.f32 %v2184_v14, %v2183_v23 }
 0x1a4   : > { %v2084_v34 = vadd.f32 %v2083_v25, %v2082_v19  ;;  %v2186_v11 = vrot.slane %v2185_v26, 4 }
 0x1a6   : > { %v2085_v22 = vrot.slane %v2084_v34, 2  ;;  %v2187_v33 = vadd.f32 %v2186_v11, %v2185_v26 }
 0x1a8   : > { %v2086_v35 = vadd.f32 %v2085_v22, %v2084_v34  ;;  %v2188_v36 = vrot.slane %v2187_v33, 2 }
 0x1aa   : > { %v2087_v32 = vrot.slane %v2086_v35, 1  ;;  %v2189_v37 = vadd.f32 %v2188_v36, %v2187_v33 }
 0x1ac   : > { %v2088_v1 = vadd.f32 %v2087_v32, %v2086_v35  ;;  %v2190_v28 = vrot.slane %v2189_v37, 1 }
 0x1ae   : > { %2090 = vst.msk [vmem:[%s181_s16] sm:$0x1] %vm2089_vm6, %v2088_v1  ;;  %v2191_v13 = vadd.f32 %v2190_v28, %v2189_v37 }
 0x1b0   : > { %2192 = vst.msk [vmem:[%s181_s16 + $0x1] sm:$0x1] %vm2089_vm6, %v2191_v13 }
 0x1b1 PF: > { %s14_s12 = sadd.s32 1, %s2727_s12  }
 0x1b2   : > { %p11_p4 = scmp.ge.s32.totalorder %s14_s12, 4  }
 0x1b4   :  { %13 = sbr.rel (!%p11_p4) target bundleno = 1 (0x1), region = 74 }

// kernel: discriminator_forward.6
= control target key start
LH: loop header
LB: loop body
LE: loop exit
PB: predicated region body
PF: predicated region fallthrough
CT: control target
= control target key end

     0   :  { %s1217_s12 = smov 0   ;;  %s1428_s0 = inlined_call_operand.vmem [shape: bf16[2,9,9,64], index: 0, kind: input, shape index: {}]   ;;  %s1429_s1 = inlined_call_operand.vmem [shape: bf16[2,2,64,32], index: 1, kind: input, shape index: {}]   ;;  %s1430_s2 = inlined_call_operand.vmem [shape: bf16[2,8,8,32], index: 2, kind: output, shape index: {0}]   ;;  %s1431_s3 = inlined_call_operand.vmem [shape: f32[2,2,32], index: 3, kind: output, shape index: {1}]  }
   0x1 LB: > { %s984_s13 = sadd.s32 4294967295, %s1195_s12   ;;  %p988_p0 = scmp.ge.s32.totalorder %s1195_s12, 1  ;;  %s1195_s12 = sphi %s1217_s12, %s14_s12  }
   0x2   : > { %p140_p1 = scmp.lt.s32.totalorder %s1195_s12, 3 }
   0x4   : > { %p141_p2 = pnand %p988_p0, %p140_p1 }
   0x5   : > { %p168_p3 = scmp.lt.s32.totalorder (!%p141_p2), %s984_s13, 1 }
   0x6   : > { %144 = sbr.rel (%p141_p2) target bundleno = 244 (0xf4), region = 28 }
   0xb   : > { %v1163_v0 = vld [vmem:[%s1429_s1 + $0x18] sm:$0xff]  ;;  %v1162_v4 = vld [vmem:[%s1429_s1 + $0x10] sm:$0xff]  ;;  %s1435_s13 = smov (!%p168_p3, %s984_s13), 1  ;;  %v1161_v8 = vld [vmem:[%s1429_s1 + $0x8] sm:$0xff]  ;;  %vm207_vm0 = vsmask.f32 3328 }
   0xc   : > { %v1175_v1 = vld [vmem:[%s1429_s1 + $0x58] sm:$0xff]  ;;  %469 = vmatpush.bf16.msra.mxu1 %v1163_v0  ;;  %v1174_v5 = vld [vmem:[%s1429_s1 + $0x50] sm:$0xff]  ;;  %s1180_s30 = smul.u32 72, %s1435_s13  ;;  %v1173_v9 = vld [vmem:[%s1429_s1 + $0x48] sm:$0xff]  ;;  %vm367_vm1 = vcmask 523264   ;;  %s1155_s25 = sshll.u32 %s1435_s13, 5 }
   0xd   : > { %v1167_v2 = vld [vmem:[%s1429_s1 + $0x38] sm:$0xff]  ;;  %572 = vmatpush.bf16.msra.mxu2 %v1175_v1  ;;  %v1166_v6 = vld [vmem:[%s1429_s1 + $0x30] sm:$0xff]  ;;  %v1165_v10 = vld [vmem:[%s1429_s1 + $0x28] sm:$0xff]  ;;  %vm208_vm2 = vsmask.f32 7440  ;;  %s1387_s28 = scalar_lea.vmem %s1430_s2, %s1155_s25  ;;  %vm889_vm4 = vcmask 257024  }
   0xe   : > { %v1179_v3 = vld [vmem:[%s1429_s1 + $0x78] sm:$0xff]  ;;  %384 = vmatpush.bf16.msra.mxu0 %v1167_v2  ;;  %v1178_v7 = vld [vmem:[%s1429_s1 + $0x70] sm:$0xff]  ;;  %v1177_v11 = vld [vmem:[%s1429_s1 + $0x68] sm:$0xff]  ;;  %s1267_s16 = scalar_lea.vmem %s1428_s0, %s1180_s30  ;;  %vm827_vm5 = vcmask 261120   ;;  %s992_s29 = sshll.u32 %s1435_s13, 1  ;;  %vm849_vm6 = vcmask 253952  }
   0xf   : > { %794 = vmatpush.bf16.msra.mxu3 %v1179_v3  ;;  %v1023_v12 = vld [vmem:[%s1267_s16] sm:$0xf]  ;;  %v1156_v13 = vld [vmem:[%s1267_s16 + $0x4] sm:$0xf0]  ;;  %v1168_v17 = vld [vmem:[%s1267_s16 + $0xc] sm:$0xf0]  ;;  %s181_s5 = scalar_lea.vmem %s1431_s3, %s992_s29 }
  0x10   : > { %470 = vmatpush.bf16.msra.mxu1 %v1162_v4  ;;  %v1075_v14 = vld [vmem:[%s1267_s16 + $0x8] sm:$0xf]  ;;  %v1160_v15 = vld [vmem:[%s1429_s1] sm:$0xff]  ;;  %v200_v23 = vld [vmem:[%s1267_s16 + $0xc] sm:$0x1]  ;;  %v1024_v31 = vor.u32 %v1156_v13, %v1023_v12 }
  0x11   : > { %573 = vmatpush.bf16.msra.mxu2 %v1174_v5  ;;  %v1172_v16 = vld [vmem:[%s1429_s1 + $0x40] sm:$0xff]  ;;  %v184_v19 = vld [vmem:[%s1267_s16 + $0x8] sm:$0xf]  ;;  %v234_v29 = vshll.u32 %v200_v23, 16  ;;  %v1076_v32 = vor.u32 %v1168_v17, %v1075_v14  ;;  %v1110_v35 = vld [vmem:[%s1267_s16 + $0xc] sm:$0x1] }
  0x12   : > { %385 = vmatpush.bf16.msra.mxu0 %v1166_v6  ;;  %v183_v18 = vld [vmem:[%s1267_s16] sm:$0xf]  ;;  %v199_v22 = vld [vmem:[%s1267_s16 + $0x4] sm:$0x1]  ;;  %v225_v27 = vshrl.u32 %v184_v19, 16  ;;  %v228_v28 = vshll.u32 %v184_v19, 16  ;;  %vm1295_vm3 = vmor %vm207_vm0, %vm208_vm2 }
  0x13   : > { %795 = vmatpush.bf16.msra.mxu3 %v1178_v7  ;;  %v1164_v20 = vld [vmem:[%s1429_s1 + $0x20] sm:$0xff]  ;;  %v211_v24 = vshrl.u32 %v183_v18, 16  ;;  %v214_v25 = vshll.u32 %v183_v18, 16  ;;  %v220_v26 = vshll.u32 %v199_v22, 16  ;;  %v1109_v30 = vld [vmem:[%s1267_s16 + $0x8] sm:$0xf] }
  0x14   : > { %v1176_v21 = vld [vmem:[%s1429_s1 + $0x60] sm:$0xff]  ;;  %471 = vmatpush.bf16.msra.mxu1 %v1161_v8  ;;  %v1111_v36 = vld [vmem:[%s1267_s16 + $0x10] sm:$0xf]  ;;  %v227_v38 = vrot.slane %v225_v27, 4  ;;  %v230_v39 = vrot.slane %v228_v28, 5  ;;  %v236_v40 = vrot.slane %v234_v29, 5 }
  0x15   : > { %574 = vmatpush.bf16.msra.mxu2 %v1173_v9  ;;  %v213_v33 = vrot.slane %v211_v24, 4  ;;  %v216_v34 = vrot.slane %v214_v25, 5  ;;  %v222_v37 = vrot.slane %v220_v26, 5  ;;  %v1112_v41 = vld [vmem:[%s1267_s16 + $0x14] sm:$0x1]  ;;  %v622_v43 = vshrl.u32 %v1109_v30, 16 }
  0x16   : > { %386 = vmatpush.bf16.msra.mxu0 %v1165_v10  ;;  %v625_v44 = vshll.u32 %v1109_v30, 16  ;;  %v631_v45 = vshll.u32 %v1110_v35, 16  ;;  %v231_v47 = vor.u32 %v230_v39, %v227_v38  ;;  %v636_v48 = vshrl.u32 %v1111_v36, 16  ;;  %v185_v60 = vld [vmem:[%s1267_s16 + $0x10] sm:$0xf] }
  0x17   : > { %796 = vmatpush.bf16.msra.mxu3 %v1177_v11  ;;  %v217_v42 = vor.u32 %v216_v34, %v213_v33  ;;  %v639_v49 = vshll.u32 %v1111_v36, 16  ;;  %v645_v50 = vshll.u32 %v1112_v41, 16  ;;  %v624_v52 = vrot.slane %v622_v43, 4  ;;  %v186_v61 = vld [vmem:[%s1267_s16 + $0x18] sm:$0xf] }
  0x18   : > { %472 = vmatpush.bf16.msra.mxu1 %v1160_v15  ;;  %v627_v53 = vrot.slane %v625_v44, 5  ;;  %v232_v54 = vrot.slane %v231_v47, 4  ;;  %v633_v55 = vrot.slane %v631_v45, 5  ;;  %v638_v56 = vrot.slane %v636_v48, 4  ;;  %v201_v62 = vld [vmem:[%s1267_s16 + $0x14] sm:$0x1] }
  0x19   : > { %575 = vmatpush.bf16.msra.mxu2 %v1172_v16  ;;  %v218_v51 = vrot.slane %v217_v42, 4  ;;  %v641_v57 = vrot.slane %v639_v49, 5  ;;  %v647_v2 = vrot.slane %v645_v50, 5  ;;  %v202_v5 = vld [vmem:[%s1267_s16 + $0x1c] sm:$0x1]  ;;  %v239_v6 = vshrl.u32 %v185_v60, 16 }
  0x1a   : > { %387 = vmatpush.bf16.msra.mxu0 %v1164_v20  ;;  %v628_v59 = vor.u32 %v627_v53, %v624_v52  ;;  %v237_v63 = vsel %vm1295_vm3, %v232_v54, %v236_v40  ;;  %v242_v7 = vshll.u32 %v185_v60, 16  ;;  %v248_v9 = vshll.u32 %v201_v62, 16  ;;  %v1113_v12 = vld [vmem:[%s1267_s16 + $0x18] sm:$0xf]  ;;  %v1114_v17 = vld [vmem:[%s1267_s16 + $0x1c] sm:$0x1] }
  0x1b   : > { %797 = vmatpush.bf16.msra.mxu3 %v1176_v21  ;;  %1053 = vmatmul.msk.bf16.vlgmr.msra.gmra.mxu1 %vm367_vm1, %v1024_v31  ;;  %v223_v58 = vsel %vm1295_vm3, %v218_v51, %v222_v37  ;;  %v642_v1 = vor.u32 %v641_v57, %v638_v56  ;;  %v332_v3 = vunpack.c.l.b16 %v237_v63  ;;  %v253_v10 = vshrl.u32 %v186_v61, 16  ;;  %v1115_v18 = vld [vmem:[%s1267_s16 + $0x20] sm:$0xf]  ;;  %v1027_v24 = vld [vmem:[%s1267_s16 + $0x10] sm:$0xf] }
  0x1c   : > { %1105 = vmatmul.msk.bf16.vlgmr.msra.gmra.mxu2 %vm367_vm1, %v1076_v32  ;;  %v331_v0 = vunpack.c.l.b16 %v223_v58  ;;  %v629_v4 = vrot.slane %v628_v59, 4  ;;  %v256_v11 = vshll.u32 %v186_v61, 16  ;;  %v241_v15 = vrot.slane %v239_v6, 4  ;;  %v1157_v25 = vld [vmem:[%s1267_s16 + $0x14] sm:$0xf0] }
  0x1d   : > { %v643_v8 = vrot.slane %v642_v1, 4  ;;  %v244_v16 = vrot.slane %v242_v7, 5  ;;  %v250_v21 = vrot.slane %v248_v9, 5  ;;  %v255_v22 = vrot.slane %v253_v10, 4  ;;  %v1116_v29 = vld [vmem:[%s1267_s16 + $0x24] sm:$0x1] }
  0x1e   : > { %v339_v13 = vpack.c.b16 %v332_v3, %v331_v0  ;;  %v634_v14 = vsel %vm1295_vm3, %v629_v4, %v633_v55  ;;  %v258_v27 = vrot.slane %v256_v11, 5  ;;  %v262_v28 = vshll.u32 %v202_v5, 16  ;;  %v1079_v35 = vld [vmem:[%s1267_s16 + $0x18] sm:$0xf]  ;;  %v1169_v36 = vld [vmem:[%s1267_s16 + $0x1c] sm:$0xf0] }
  0x1f   : > { %v648_v19 = vsel %vm1295_vm3, %v643_v8, %v647_v2  ;;  %v742_v20 = vunpack.c.l.b16 %v634_v14  ;;  %v245_v26 = vor.u32 %v244_v16, %v241_v15  ;;  %v650_v30 = vshrl.u32 %v1113_v12, 16  ;;  %v187_v43 = vld [vmem:[%s1267_s16 + $0x20] sm:$0xf]  ;;  %v188_v53 = vld [vmem:[%s1267_s16 + $0x28] sm:$0xf] }
  0x20   : > { %1017 = vmatmul.msk.bf16.vlgmr.msra.gmra.mxu0 %vm367_vm1, %v339_v13  ;;  %v743_v23 = vunpack.c.l.b16 %v648_v19  ;;  %v653_v31 = vshll.u32 %v1113_v12, 16  ;;  %v659_v32 = vshll.u32 %v1114_v17, 16  ;;  %v664_v33 = vshrl.u32 %v1115_v18, 16  ;;  %v203_v57 = vld [vmem:[%s1267_s16 + $0x24] sm:$0x1] }
  0x21   : > { %v246_v37 = vrot.slane %v245_v26, 4  ;;  %v259_v38 = vor.u32 %v258_v27, %v255_v22  ;;  %v264_v39 = vrot.slane %v262_v28, 5  ;;  %v652_v40 = vrot.slane %v650_v30, 4  ;;  %v204_v62 = vld [vmem:[%s1267_s16 + $0x2c] sm:$0x1] }
  0x22   : > { %v750_v34 = vpack.c.b16 %v743_v23, %v742_v20  ;;  %v655_v41 = vrot.slane %v653_v31, 5  ;;  %v666_v42 = vrot.slane %v664_v33, 4  ;;  %v667_v47 = vshll.u32 %v1115_v18, 16  ;;  %v1117_v4 = vld [vmem:[%s1267_s16 + $0x28] sm:$0xf] }
  0x23   : > { %v251_v44 = vsel %vm1295_vm3, %v246_v37, %v250_v21  ;;  %v260_v45 = vrot.slane %v259_v38, 4  ;;  %v673_v48 = vshll.u32 %v1116_v29, 16  ;;  %v1028_v49 = vor.u32 %v1157_v25, %v1027_v24  ;;  %v1119_v8 = vld [vmem:[%s1267_s16 + $0x30] sm:$0xf]  ;;  %v1118_v15 = vld [vmem:[%s1267_s16 + $0x2c] sm:$0x1] }
  0x24   : > { %1149 = vmatmul.msk.bf16.vlgmr.msra.gmra.mxu3 %vm367_vm1, %v750_v34  ;;  %v1080_v50 = vor.u32 %v1169_v36, %v1079_v35  ;;  %v656_v51 = vor.u32 %v655_v41, %v652_v40  ;;  %v661_v52 = vrot.slane %v659_v32, 5  ;;  %v333_v55 = vunpack.c.l.b16 %v251_v44  ;;  %v1120_v26 = vld [vmem:[%s1267_s16 + $0x34] sm:$0x1]  ;;  %v189_v37 = vld [vmem:[%s1267_s16 + $0x30] sm:$0xf] }
  0x25   : > { %v265_v54 = vsel %vm1295_vm3, %v260_v45, %v264_v39  ;;  %v669_v56 = vrot.slane %v667_v47, 5  ;;  %v267_v58 = vshrl.u32 %v187_v43, 16  ;;  %v675_v61 = vrot.slane %v673_v48, 5  ;;  %v190_v38 = vld [vmem:[%s1267_s16 + $0x38] sm:$0xf] }
  0x26   : > { %v334_v59 = vunpack.c.l.b16 %v265_v54  ;;  %v657_v60 = vrot.slane %v656_v51, 4  ;;  %v270_v63 = vshll.u32 %v187_v43, 16  ;;  %v281_v2 = vshrl.u32 %v188_v53, 16  ;;  %v1031_v39 = vld [vmem:[%s1267_s16 + $0x20] sm:$0xf] }
  0x27   : > { %v670_v0 = vor.u32 %v669_v56, %v666_v42  ;;  %v269_v1 = vrot.slane %v267_v58, 4  ;;  %v284_v3 = vshll.u32 %v188_v53, 16  ;;  %v276_v7 = vshll.u32 %v203_v57, 16  ;;  %v1158_v40 = vld [vmem:[%s1267_s16 + $0x24] sm:$0xf0] }
  0x28   : > { %v662_v5 = vsel %vm1295_vm3, %v657_v60, %v661_v52  ;;  %v272_v6 = vrot.slane %v270_v63, 5  ;;  %v340_v9 = vpack.c.b16 %v334_v59, %v333_v55  ;;  %v283_v11 = vrot.slane %v281_v2, 4  ;;  %v1083_v42 = vld [vmem:[%s1267_s16 + $0x28] sm:$0xf]  ;;  %v1170_v43 = vld [vmem:[%s1267_s16 + $0x2c] sm:$0xf0] }
  0x29   : > { %v671_v10 = vrot.slane %v670_v0, 4  ;;  %v286_v12 = vrot.slane %v284_v3, 5  ;;  %v290_v14 = vshll.u32 %v204_v62, 16  ;;  %v678_v16 = vshrl.u32 %v1117_v4, 16  ;;  %v1121_v57 = vld [vmem:[%s1267_s16 + $0x38] sm:$0xf] }
  0x2a   : > { %v273_v13 = vor.u32 %v272_v6, %v269_v1  ;;  %v681_v17 = vshll.u32 %v1117_v4, 16  ;;  %v744_v19 = vunpack.c.l.b16 %v662_v5  ;;  %v692_v21 = vshrl.u32 %v1119_v8, 16  ;;  %v1123_v58 = vld [vmem:[%s1267_s16 + $0x40] sm:$0xf]  ;;  %v205_v62 = vld [vmem:[%s1267_s16 + $0x34] sm:$0x1] }
  0x2b   : > { %1054 = vmatmul.msk.bf16.gmra.mxu1 %vm367_vm1, %v1028_v49  ;;  %v676_v18 = vsel %vm1295_vm3, %v671_v10, %v675_v61  ;;  %v287_v20 = vor.u32 %v286_v12, %v283_v11  ;;  %v680_v23 = vrot.slane %v678_v16, 4  ;;  %v278_v25 = vrot.slane %v276_v7, 5  ;;  %v206_v4 = vld [vmem:[%s1267_s16 + $0x3c] sm:$0x1] }
  0x2c   : > { %1106 = vmatmul.msk.bf16.gmra.mxu2 %vm367_vm1, %v1080_v50  ;;  %v745_v22 = vunpack.c.l.b16 %v676_v18  ;;  %v274_v24 = vrot.slane %v273_v13, 4  ;;  %v683_v27 = vrot.slane %v681_v17, 5  ;;  %v687_v28 = vshll.u32 %v1118_v15, 16  ;;  %v1122_v16 = vld [vmem:[%s1267_s16 + $0x3c] sm:$0x1] }
  0x2d   : > { %v288_v29 = vrot.slane %v287_v20, 4  ;;  %v292_v30 = vrot.slane %v290_v14, 5  ;;  %v694_v31 = vrot.slane %v692_v21, 4  ;;  %v695_v32 = vshll.u32 %v1119_v8, 16  ;;  %v1124_v21 = vld [vmem:[%s1267_s16 + $0x44] sm:$0x1] }
  0x2e   : > { %v751_v33 = vpack.c.b16 %v745_v22, %v744_v19  ;;  %v684_v34 = vor.u32 %v683_v27, %v680_v23  ;;  %v701_v36 = vshll.u32 %v1120_v26, 16  ;;  %v689_v41 = vrot.slane %v687_v28, 5 }
  0x2f   : > { %v697_v35 = vrot.slane %v695_v32, 5  ;;  %v279_v44 = vsel %vm1295_vm3, %v274_v24, %v278_v25  ;;  %v293_v45 = vsel %vm1295_vm3, %v288_v29, %v292_v30  ;;  %v295_v49 = vshrl.u32 %v189_v37, 16  ;;  %v1159_v32 = vld [vmem:[%s1267_s16 + $0x34] sm:$0xf0] }
  0x30   : > { %1018 = vmatmul.msk.bf16.gmra.mxu0 %vm367_vm1, %v340_v9  ;;  %v685_v47 = vrot.slane %v684_v34, 4  ;;  %v298_v50 = vshll.u32 %v189_v37, 16  ;;  %v309_v51 = vshrl.u32 %v190_v38, 16  ;;  %v312_v52 = vshll.u32 %v190_v38, 16  ;;  %v1171_v34 = vld [vmem:[%s1267_s16 + $0x3c] sm:$0xf0] }
  0x31   : > { %v698_v48 = vor.u32 %v697_v35, %v694_v31  ;;  %v703_v54 = vrot.slane %v701_v36, 5  ;;  %v1032_v55 = vor.u32 %v1158_v40, %v1031_v39  ;;  %v1084_v56 = vor.u32 %v1170_v43, %v1083_v42  ;;  %v1035_v31 = vld [vmem:[%s1267_s16 + $0x30] sm:$0xf] }
  0x32   : > { %v335_v59 = vunpack.c.l.b16 %v279_v44  ;;  %v336_v60 = vunpack.c.l.b16 %v293_v45  ;;  %v690_v61 = vsel %vm1295_vm3, %v685_v47, %v689_v41  ;;  %v297_v63 = vrot.slane %v295_v49, 4 }
  0x33   : > { %v699_v53 = vrot.slane %v698_v48, 4  ;;  %v300_v0 = vrot.slane %v298_v50, 5  ;;  %v311_v1 = vrot.slane %v309_v51, 4  ;;  %v314_v2 = vrot.slane %v312_v52, 5 }
  0x34   : > { %1150 = vmatmul.msk.bf16.gmra.mxu3 %vm367_vm1, %v751_v33  ;;  %v706_v5 = vshrl.u32 %v1121_v57, 16  ;;  %v709_v6 = vshll.u32 %v1121_v57, 16  ;;  %v720_v7 = vshrl.u32 %v1123_v58, 16  ;;  %v723_v8 = vshll.u32 %v1123_v58, 16  ;;  %v1087_v33 = vld [vmem:[%s1267_s16 + $0x38] sm:$0xf] }
  0x35   : > { %v704_v3 = vsel %vm1295_vm3, %v699_v53, %v703_v54  ;;  %v341_v9 = vpack.c.b16 %v336_v60, %v335_v59  ;;  %v746_v10 = vunpack.c.l.b16 %v690_v61  ;;  %v304_v11 = vshll.u32 %v205_v62, 16 }
  0x36   : > { %v747_v12 = vunpack.c.l.b16 %v704_v3  ;;  %v301_v13 = vor.u32 %v300_v0, %v297_v63  ;;  %v315_v14 = vor.u32 %v314_v2, %v311_v1  ;;  %v318_v15 = vshll.u32 %v206_v4, 16 }
  0x37   : > { %v708_v17 = vrot.slane %v706_v5, 4  ;;  %v711_v18 = vrot.slane %v709_v6, 5  ;;  %v722_v19 = vrot.slane %v720_v7, 4  ;;  %v725_v20 = vrot.slane %v723_v8, 5 }
  0x38   : > { %v306_v22 = vrot.slane %v304_v11, 5  ;;  %v752_v23 = vpack.c.b16 %v747_v12, %v746_v10  ;;  %v302_v24 = vrot.slane %v301_v13, 4  ;;  %v320_v25 = vrot.slane %v318_v15, 5 }
  0x39   : > { %v715_v26 = vshll.u32 %v1122_v16, 16  ;;  %v316_v27 = vrot.slane %v315_v14, 4  ;;  %v712_v28 = vor.u32 %v711_v18, %v708_v17  ;;  %v726_v29 = vor.u32 %v725_v20, %v722_v19 }
  0x3a   : > { %v729_v30 = vshll.u32 %v1124_v21, 16  ;;  %v307_v35 = vsel %vm1295_vm3, %v302_v24, %v306_v22  ;;  %v1036_v41 = vor.u32 %v1159_v32, %v1035_v31  ;;  %v1088_v42 = vor.u32 %v1171_v34, %v1087_v33 }
  0x3b   : > { %1055 = vmatmul.msk.bf16.gmra.mxu1 %vm367_vm1, %v1032_v55  ;;  %v717_v36 = vrot.slane %v715_v26, 5  ;;  %v321_v37 = vsel %vm1295_vm3, %v316_v27, %v320_v25  ;;  %v713_v38 = vrot.slane %v712_v28, 4  ;;  %v727_v39 = vrot.slane %v726_v29, 4 }
  0x3c   : > { %1107 = vmatmul.msk.bf16.gmra.mxu2 %vm367_vm1, %v1084_v56  ;;  %v731_v40 = vrot.slane %v729_v30, 5  ;;  %v337_v43 = vunpack.c.l.b16 %v307_v35  ;;  %v338_v44 = vunpack.c.l.b16 %v321_v37 }
  0x3d   : > { %v718_v45 = vsel %vm1295_vm3, %v713_v38, %v717_v36 }
  0x3e   : > { %v732_v47 = vsel %vm1295_vm3, %v727_v39, %v731_v40  ;;  %v342_v48 = vpack.c.b16 %v338_v44, %v337_v43  ;;  %v748_v49 = vunpack.c.l.b16 %v718_v45 }
  0x3f   : > { %v749_v50 = vunpack.c.l.b16 %v732_v47 }
  0x40   : > { %1019 = vmatmul.msk.bf16.gmra.mxu0 %vm367_vm1, %v341_v9 }
  0x41   : > { %v753_v51 = vpack.c.b16 %v749_v50, %v748_v49 }
  0x44   : > { %1151 = vmatmul.msk.bf16.gmra.mxu3 %vm367_vm1, %v752_v23 }
  0x4b   : > { %1056 = vmatmul.msk.bf16.gmra.mxu1 %vm367_vm1, %v1036_v41 }
  0x4c   : > { %1108 = vmatmul.msk.bf16.gmra.mxu2 %vm367_vm1, %v1088_v42 }
  0x50   : > { %1020 = vmatmul.msk.bf16.gmra.mxu0 %vm367_vm1, %v342_v48 }
  0x54   : > { %1152 = vmatmul.msk.bf16.gmra.mxu3 %vm367_vm1, %v753_v51 }
  0x98   : > { %v474_v52 = vpop.f32.mrf.mxu1 }
  0x9d   : > { %v389_v53 = vpop.f32.mrf.mxu0 }
  0x9e   : > { %v475_v56 = vadd.f32 %v474_v52, %v389_v53 }
  0x9f   : > { %v577_v54 = vpop.f32.mrf.mxu2 }
  0xa0   : > { %v476_v55 = vpop.f32.mrf.mxu1  ;;  %v597_v46 = vadd.f32 %v577_v54, %v475_v56 }
  0xa5   : > { %v391_v57 = vpop.f32.mrf.mxu0 }
  0xa6   : > { %v477_v63 = vadd.f32 %v476_v55, %v391_v57 }
  0xa7   : > { %v579_v58 = vpop.f32.mrf.mxu2  ;;  %v799_v59 = vpop.f32.mrf.mxu3 }
  0xa8   : > { %v479_v60 = vpop.f32.mrf.mxu1  ;;  %v819_v61 = vadd.f32 %v799_v59, %v597_v46  ;;  %v598_v2 = vadd.f32 %v579_v58, %v477_v63 }
  0xaa   : > { %v881_v62 = vpack.c.bf16 %v819_v61, %v819_v61  ;;  %v851_v40 = vmul.f32 %v819_v61, %v819_v61  ;;  %v828_v45 = vsel %vm827_vm5, %v819_v61, 0.0 }
  0xac   : > { %890 = vst.msk [vmem:[%s1387_s28] sm:$0xf] %vm889_vm4, %v881_v62  ;;  %v859_v49 = vsel %vm827_vm5, %v851_v40, 0.0 }
  0xad   : > { %v394_v0 = vpop.f32.mrf.mxu0 }
  0xae   : > { %v480_v5 = vadd.f32 %v479_v60, %v394_v0 }
  0xaf   : > { %v582_v1 = vpop.f32.mrf.mxu2  ;;  %v801_v3 = vpop.f32.mrf.mxu3 }
  0xb0   : > { %v820_v4 = vadd.f32 %v801_v3, %v598_v2  ;;  %v481_v6 = vpop.f32.mrf.mxu1  ;;  %v599_v8 = vadd.f32 %v582_v1, %v480_v5 }
  0xb2   : > { %v882_v7 = vpack.c.bf16 %v820_v4, %v820_v4  ;;  %v852_v38 = vmul.f32 %v820_v4, %v820_v4  ;;  %v829_v41 = vsel %vm827_vm5, %v820_v4, 0.0 }
  0xb3   : > { %v830_v50 = vadd.f32 %v829_v41, %v828_v45 }
  0xb4   : > { %891 = vst.msk [vmem:[%s1387_s28 + $0x4] sm:$0xf] %vm889_vm4, %v882_v7  ;;  %v860_v47 = vsel %vm827_vm5, %v852_v38, 0.0 }
  0xb5   : > { %v396_v9 = vpop.f32.mrf.mxu0  ;;  %v861_v46 = vadd.f32 %v860_v47, %v859_v49 }
  0xb6   : > { %v482_v14 = vadd.f32 %v481_v6, %v396_v9 }
  0xb7   : > { %v584_v10 = vpop.f32.mrf.mxu2  ;;  %v804_v11 = vpop.f32.mrf.mxu3 }
  0xb8   : > { %v821_v12 = vadd.f32 %v804_v11, %v599_v8  ;;  %v484_v15 = vpop.f32.mrf.mxu1  ;;  %v600_v18 = vadd.f32 %v584_v10, %v482_v14 }
  0xba   : > { %v883_v13 = vpack.c.bf16 %v821_v12, %v821_v12  ;;  %v853_v42 = vmul.f32 %v821_v12, %v821_v12  ;;  %v831_v48 = vsel %vm827_vm5, %v821_v12, 0.0 }
  0xbb   : > { %v832_v57 = vadd.f32 %v831_v48, %v830_v50 }
  0xbc   : > { %892 = vst.msk [vmem:[%s1387_s28 + $0x8] sm:$0xf] %vm889_vm4, %v883_v13  ;;  %v862_v53 = vsel %vm827_vm5, %v853_v42, 0.0 }
  0xbd   : > { %v399_v16 = vpop.f32.mrf.mxu0  ;;  %v863_v0 = vadd.f32 %v862_v53, %v861_v46 }
  0xbe   : > { %v485_v21 = vadd.f32 %v484_v15, %v399_v16 }
  0xbf   : > { %v587_v17 = vpop.f32.mrf.mxu2  ;;  %v806_v19 = vpop.f32.mrf.mxu3 }
  0xc0   : > { %v822_v20 = vadd.f32 %v806_v19, %v600_v18  ;;  %v601_v23 = vadd.f32 %v587_v17, %v485_v21  ;;  %v486_v24 = vpop.f32.mrf.mxu1 }
  0xc2   : > { %v884_v22 = vpack.c.bf16 %v822_v20, %v822_v20  ;;  %v854_v44 = vmul.f32 %v822_v20, %v822_v20  ;;  %v833_v54 = vsel %vm827_vm5, %v822_v20, 0.0 }
  0xc3   : > { %v834_v1 = vadd.f32 %v833_v54, %v832_v57 }
  0xc4   : > { %893 = vst.msk [vmem:[%s1387_s28 + $0xc] sm:$0xf] %vm889_vm4, %v884_v22  ;;  %v864_v58 = vsel %vm827_vm5, %v854_v44, 0.0 }
  0xc5   : > { %v401_v25 = vpop.f32.mrf.mxu0  ;;  %v865_v6 = vadd.f32 %v864_v58, %v863_v0 }
  0xc6   : > { %v487_v30 = vadd.f32 %v486_v24, %v401_v25 }
  0xc7   : > { %v809_v26 = vpop.f32.mrf.mxu3  ;;  %v589_v27 = vpop.f32.mrf.mxu2 }
  0xc8   : > { %v823_v28 = vadd.f32 %v809_v26, %v601_v23  ;;  %v602_v32 = vadd.f32 %v589_v27, %v487_v30  ;;  %v489_v33 = vpop.f32.mrf.mxu1 }
  0xca   : > { %v885_v29 = vpack.c.bf16 %v823_v28, %v823_v28  ;;  %v855_v55 = vmul.f32 %v823_v28, %v823_v28  ;;  %v835_v60 = vsel %vm827_vm5, %v823_v28, 0.0 }
  0xcb   : > { %v836_v7 = vadd.f32 %v835_v60, %v834_v1 }
  0xcc   : > { %894 = vst.msk [vmem:[%s1387_s28 + $0x10] sm:$0xf] %vm889_vm4, %v885_v29  ;;  %v866_v3 = vsel %vm827_vm5, %v855_v55, 0.0 }
  0xcd   : > { %v404_v31 = vpop.f32.mrf.mxu0  ;;  %v867_v11 = vadd.f32 %v866_v3, %v865_v6 }
  0xce   : > { %v490_v36 = vadd.f32 %v489_v33, %v404_v31 }
  0xcf   : > { %v811_v34 = vpop.f32.mrf.mxu3  ;;  %v592_v37 = vpop.f32.mrf.mxu2 }
  0xd0   : > { %v824_v35 = vadd.f32 %v811_v34, %v602_v32  ;;  %v603_v43 = vadd.f32 %v592_v37, %v490_v36  ;;  %v491_v59 = vpop.f32.mrf.mxu1 }
  0xd2   : > { %v886_v39 = vpack.c.bf16 %v824_v35, %v824_v35  ;;  %v856_v61 = vmul.f32 %v824_v35, %v824_v35  ;;  %v837_v4 = vsel %vm827_vm5, %v824_v35, 0.0 }
  0xd3   : > { %v838_v12 = vadd.f32 %v837_v4, %v836_v7 }
  0xd4   : > { %895 = vst.msk [vmem:[%s1387_s28 + $0x14] sm:$0xf] %vm889_vm4, %v886_v39  ;;  %v868_v8 = vsel %vm827_vm5, %v856_v61, 0.0 }
  0xd5   : > { %v406_v52 = vpop.f32.mrf.mxu0  ;;  %v869_v16 = vadd.f32 %v868_v8, %v867_v11 }
  0xd6   : > { %v492_v63 = vadd.f32 %v491_v59, %v406_v52 }
  0xd7   : > { %v814_v51 = vpop.f32.mrf.mxu3  ;;  %v594_v2 = vpop.f32.mrf.mxu2 }
  0xd8   : > { %v825_v56 = vadd.f32 %v814_v51, %v603_v43  ;;  %v604_v10 = vadd.f32 %v594_v2, %v492_v63 }
  0xda   : > { %v887_v62 = vpack.c.bf16 %v825_v56, %v825_v56  ;;  %v857_v5 = vmul.f32 %v825_v56, %v825_v56  ;;  %v839_v9 = vsel %vm827_vm5, %v825_v56, 0.0 }
  0xdb   : > { %v840_v17 = vadd.f32 %v839_v9, %v838_v12 }
  0xdc   : > { %896 = vst.msk [vmem:[%s1387_s28 + $0x18] sm:$0xf] %vm889_vm4, %v887_v62  ;;  %v870_v14 = vsel %vm827_vm5, %v857_v5, 0.0 }
  0xdd   : > { %v871_v21 = vadd.f32 %v870_v14, %v869_v16 }
  0xdf   : > { %v816_v13 = vpop.f32.mrf.mxu3 }
  0xe0   : > { %v826_v15 = vadd.f32 %v816_v13, %v604_v10 }
  0xe2   : > { %v841_v18 = vsel %vm827_vm5, %v826_v15, 0.0  ;;  %v858_v19 = vmul.f32 %v826_v15, %v826_v15  ;;  %v888_v20 = vpack.c.bf16 %v826_v15, %v826_v15 }
  0xe3   : > { %v842_v22 = vadd.f32 %v841_v18, %v840_v17 }
  0xe4   : > { %v872_v23 = vsel %vm827_vm5, %v858_v19, 0.0  ;;  %897 = vst.msk [vmem:[%s1387_s28 + $0x1c] sm:$0xf] %vm889_vm4, %v888_v20 }
  0xe5   : > { %v843_v24 = vrot.slane %v842_v22, 4  ;;  %v873_v25 = vadd.f32 %v872_v23, %v871_v21 }
  0xe7   : > { %v844_v26 = vadd.f32 %v843_v24, %v842_v22  ;;  %v874_v27 = vrot.slane %v873_v25, 4 }
  0xe9   : > { %v845_v28 = vrot.slane %v844_v26, 2  ;;  %v875_v29 = vadd.f32 %v874_v27, %v873_v25 }
  0xeb   : > { %v846_v30 = vadd.f32 %v845_v28, %v844_v26  ;;  %v876_v31 = vrot.slane %v875_v29, 2 }
  0xed   : > { %v847_v32 = vrot.slane %v846_v30, 1  ;;  %v877_v33 = vadd.f32 %v876_v31, %v875_v29 }
  0xef   : > { %v848_v34 = vadd.f32 %v847_v32, %v846_v30  ;;  %v878_v35 = vrot.slane %v877_v33, 1 }
  0xf1   : > { %850 = vst.msk [vmem:[%s181_s5] sm:$0x1] %vm849_vm6, %v848_v34  ;;  %v879_v36 = vadd.f32 %v878_v35, %v877_v33 }
  0xf3   : > { %880 = vst.msk [vmem:[%s181_s5 + $0x1] sm:$0x1] %vm849_vm6, %v879_v36 }
  0xf4 PF: > { %s14_s12 = sadd.s32 1, %s1195_s12  }
  0xf5   : > { %p11_p4 = scmp.ge.s32.totalorder %s14_s12, 4  }
  0xf7   :  { %13 = sbr.rel (!%p11_p4) target bundleno = 1 (0x1), region = 74 }

// kernel: discriminator_forward.7
= control target key start
LH: loop header
LB: loop body
LE: loop exit
PB: predicated region body
PF: predicated region fallthrough
CT: control target
= control target key end

     0   :  { %s1137_s12 = smov 0   ;;  %s1332_s0 = inlined_call_operand.vmem [shape: bf16[2,5,5,128], index: 0, kind: input, shape index: {}]   ;;  %s1333_s1 = inlined_call_operand.vmem [shape: bf16[2,2,128,64], index: 1, kind: input, shape index: {}]   ;;  %s1334_s2 = inlined_call_operand.vmem [shape: bf16[2,4,4,64], index: 2, kind: output, shape index: {0}]   ;;  %s1335_s3 = inlined_call_operand.vmem [shape: f32[2,2,64], index: 3, kind: output, shape index: {1}]  }
   0x1 LB: > { %s872_s13 = sadd.s32 4294967295, %s1115_s12   ;;  %p876_p0 = scmp.ge.s32.totalorder %s1115_s12, 1  ;;  %s1115_s12 = sphi %s1137_s12, %s14_s12  }
   0x2   : > { %p140_p1 = scmp.lt.s32.totalorder %s1115_s12, 3 }
   0x4   : > { %p141_p2 = pnand %p876_p0, %p140_p1 }
   0x5   : > { %p168_p3 = scmp.lt.s32.totalorder (!%p141_p2), %s872_s13, 1 }
   0x6   : > { %144 = sbr.rel (%p141_p2) target bundleno = 236 (0xec), region = 28 }
   0xb   : > { %v1091_v0 = vld [vmem:[%s1333_s1 + $0xb8] sm:$0xff]  ;;  %v1090_v3 = vld [vmem:[%s1333_s1 + $0xb0] sm:$0xff]  ;;  %s1343_s13 = smov (!%p168_p3, %s872_s13), 1  ;;  %v1089_v8 = vld [vmem:[%s1333_s1 + $0xa8] sm:$0xff]  ;;  %vm214_vm0 = vcmask 1041408   ;;  %vm218_vm1 = vcmask 1043458  }
   0xc   : > { %v1083_v1 = vld [vmem:[%s1333_s1 + $0x78] sm:$0xff]  ;;  %549 = vmatpush.bf16.msra.mxu2 %v1091_v0  ;;  %v1082_v4 = vld [vmem:[%s1333_s1 + $0x70] sm:$0xff]  ;;  %s1100_s30 = smul.u32 20, %s1343_s13  ;;  %v1081_v9 = vld [vmem:[%s1333_s1 + $0x68] sm:$0xff]  ;;  %vm240_vm2 = vsmask.f32 1280 }
   0xd   : > { %v1075_v2 = vld [vmem:[%s1333_s1 + $0x38] sm:$0xff]  ;;  %377 = vmatpush.bf16.msra.mxu0 %v1083_v1  ;;  %v1074_v6 = vld [vmem:[%s1333_s1 + $0x30] sm:$0xff]  ;;  %v1073_v10 = vld [vmem:[%s1333_s1 + $0x28] sm:$0xff]  ;;  %vm241_vm3 = vsmask.f32 3336  ;;  %vm781_vm9 = vcmask 517120  }
   0xe   : > { %v1099_v5 = vld [vmem:[%s1333_s1 + $0xf8] sm:$0xff]  ;;  %452 = vmatpush.bf16.msra.mxu1 %v1075_v2  ;;  %v1098_v7 = vld [vmem:[%s1333_s1 + $0xf0] sm:$0xff]  ;;  %v1097_v11 = vld [vmem:[%s1333_s1 + $0xe8] sm:$0xff]  ;;  %s1187_s16 = scalar_lea.vmem %s1332_s0, %s1100_s30  ;;  %vm243_vm4 = vsmask.f32 5392  ;;  %vm747_vm10 = vcmask 523264  }
   0xf   : > { %731 = vmatpush.bf16.msra.mxu3 %v1099_v5  ;;  %v1088_v12 = vld [vmem:[%s1333_s1 + $0xa0] sm:$0xff]  ;;  %v204_v18 = vld [vmem:[%s1187_s16 + $0x8] sm:$0x7]  ;;  %v205_v19 = vld [vmem:[%s1187_s16 + $0xc] sm:$0x7]  ;;  %s880_s9 = sshll.u32 %s1343_s13, 1 }
  0x10   : > { %550 = vmatpush.bf16.msra.mxu2 %v1090_v3  ;;  %v1080_v13 = vld [vmem:[%s1333_s1 + $0x60] sm:$0xff]  ;;  %v212_v22 = vrot.slane %v204_v18, 2  ;;  %v213_v23 = vrot.slane %v205_v19, 2  ;;  %v1087_v24 = vld [vmem:[%s1333_s1 + $0x98] sm:$0xff]  ;;  %vm1227_vm5 = vmor %vm240_vm2, %vm241_vm3  ;;  %vm245_vm7 = vsmask.f32 7448  ;;  %s181_s14 = scalar_lea.vmem %s1335_s3, %s880_s9 }
  0x11   : > { %378 = vmatpush.bf16.msra.mxu0 %v1082_v4  ;;  %v1072_v14 = vld [vmem:[%s1333_s1 + $0x20] sm:$0xff]  ;;  %v1079_v25 = vld [vmem:[%s1333_s1 + $0x58] sm:$0xff]  ;;  %v1086_v44 = vld [vmem:[%s1333_s1 + $0x90] sm:$0xff]  ;;  %vm757_vm11 = vcmask 516096  }
  0x12   : > { %453 = vmatpush.bf16.msra.mxu1 %v1074_v6  ;;  %v1096_v15 = vld [vmem:[%s1333_s1 + $0xe0] sm:$0xff]  ;;  %v1071_v29 = vld [vmem:[%s1333_s1 + $0x18] sm:$0xff]  ;;  %v230_v32 = vsel %vm214_vm0, %v204_v18, %v212_v22  ;;  %v231_v33 = vsel %vm218_vm1, %v204_v18, %v212_v22  ;;  %v236_v37 = vsel %vm214_vm0, %v205_v19, %v213_v23  ;;  %v237_v38 = vsel %vm218_vm1, %v205_v19, %v213_v23  ;;  %v1078_v45 = vld [vmem:[%s1333_s1 + $0x50] sm:$0xff] }
  0x13   : > { %732 = vmatpush.bf16.msra.mxu3 %v1098_v7  ;;  %v202_v16 = vld [vmem:[%s1187_s16] sm:$0x7]  ;;  %v203_v17 = vld [vmem:[%s1187_s16 + $0x4] sm:$0x7]  ;;  %v1095_v34 = vld [vmem:[%s1333_s1 + $0xd8] sm:$0xff]  ;;  %v233_v36 = vrot.slane %v231_v33, 2 }
  0x14   : > { %551 = vmatpush.bf16.msra.mxu2 %v1089_v8  ;;  %v210_v20 = vrot.slane %v202_v16, 2  ;;  %v211_v21 = vrot.slane %v203_v17, 2  ;;  %v239_v40 = vrot.slane %v237_v38, 2  ;;  %v273_v49 = vshrl.u32 %v230_v32, 16  ;;  %v1070_v50 = vld [vmem:[%s1333_s1 + $0x10] sm:$0xff]  ;;  %vm1243_vm6 = vmor %vm1227_vm5, %vm243_vm4  ;;  %v1085_v0 = vld [vmem:[%s1333_s1 + $0x88] sm:$0xff] }
  0x15   : > { %379 = vmatpush.bf16.msra.mxu0 %v1081_v9  ;;  %v276_v54 = vshll.u32 %v230_v32, 16  ;;  %v1094_v55 = vld [vmem:[%s1333_s1 + $0xd0] sm:$0xff]  ;;  %v282_v62 = vshll.u32 %v233_v36, 16  ;;  %v286_v63 = vshrl.u32 %v236_v37, 16  ;;  %v1077_v1 = vld [vmem:[%s1333_s1 + $0x48] sm:$0xff]  ;;  %vm1259_vm8 = vmor %vm1243_vm6, %vm245_vm7  ;;  %v289_v5 = vshll.u32 %v236_v37, 16 }
  0x16   : > { %454 = vmatpush.bf16.msra.mxu1 %v1073_v10  ;;  %v217_v26 = vsel %vm214_vm0, %v202_v16, %v210_v20  ;;  %v219_v27 = vsel %vm218_vm1, %v202_v16, %v210_v20  ;;  %v224_v28 = vsel %vm214_vm0, %v203_v17, %v211_v21  ;;  %v225_v31 = vsel %vm218_vm1, %v203_v17, %v211_v21  ;;  %v1069_v7 = vld [vmem:[%s1333_s1 + $0x8] sm:$0xff]  ;;  %v1084_v16 = vld [vmem:[%s1333_s1 + $0x80] sm:$0xff] }
  0x17   : > { %733 = vmatpush.bf16.msra.mxu3 %v1097_v11  ;;  %v221_v30 = vrot.slane %v219_v27, 2  ;;  %v227_v35 = vrot.slane %v225_v31, 2  ;;  %v247_v41 = vshrl.u32 %v217_v26, 16  ;;  %v250_v42 = vshll.u32 %v217_v26, 16  ;;  %v1076_v17 = vld [vmem:[%s1333_s1 + $0x40] sm:$0xff]  ;;  %v1093_v26 = vld [vmem:[%s1333_s1 + $0xc8] sm:$0xff] }
  0x18   : > { %552 = vmatpush.bf16.msra.mxu2 %v1088_v12  ;;  %v260_v46 = vshrl.u32 %v224_v28, 16  ;;  %v263_v47 = vshll.u32 %v224_v28, 16  ;;  %v275_v59 = vrot.slane %v273_v49, 6  ;;  %v278_v61 = vrot.slane %v276_v54, 7  ;;  %v1068_v21 = vld [vmem:[%s1333_s1] sm:$0xff] }
  0x19   : > { %380 = vmatpush.bf16.msra.mxu0 %v1080_v13  ;;  %v256_v43 = vshll.u32 %v221_v30, 16  ;;  %v269_v48 = vshll.u32 %v227_v35, 16  ;;  %v249_v52 = vrot.slane %v247_v41, 6  ;;  %v252_v53 = vrot.slane %v250_v42, 7  ;;  %v1014_v27 = vld [vmem:[%s1187_s16 + $0x8] sm:$0x7] }
  0x1a   : > { %455 = vmatpush.bf16.msra.mxu1 %v1072_v14  ;;  %v262_v57 = vrot.slane %v260_v46, 6  ;;  %v265_v58 = vrot.slane %v263_v47, 7  ;;  %v295_v6 = vshll.u32 %v239_v40, 16  ;;  %v279_v9 = vor.u32 %v278_v61, %v275_v59  ;;  %v1015_v28 = vld [vmem:[%s1187_s16 + $0xc] sm:$0x7] }
  0x1b   : > { %734 = vmatpush.bf16.msra.mxu3 %v1096_v15  ;;  %v258_v56 = vrot.slane %v256_v43, 7  ;;  %v253_v60 = vor.u32 %v252_v53, %v249_v52  ;;  %v271_v4 = vrot.slane %v269_v48, 7  ;;  %v284_v10 = vrot.slane %v282_v62, 7  ;;  %v1016_v30 = vld [vmem:[%s1187_s16 + $0x10] sm:$0x7] }
  0x1c   : > { %553 = vmatpush.bf16.msra.mxu2 %v1087_v24  ;;  %v266_v3 = vor.u32 %v265_v58, %v262_v57  ;;  %v288_v11 = vrot.slane %v286_v63, 6  ;;  %v291_v13 = vrot.slane %v289_v5, 7  ;;  %v280_v15 = vrot.slane %v279_v9, 2  ;;  %v182_v32 = vld [vmem:[%s1187_s16] sm:$0x3] }
  0x1d   : > { %381 = vmatpush.bf16.msra.mxu0 %v1079_v25  ;;  %v254_v8 = vrot.slane %v253_v60, 2  ;;  %v297_v20 = vrot.slane %v295_v6, 7  ;;  %v1013_v25 = vld [vmem:[%s1187_s16 + $0x4] sm:$0x7]  ;;  %v574_v33 = vrot.slane %v1014_v27, 2  ;;  %v575_v35 = vrot.slane %v1015_v28, 2 }
  0x1e   : > { %456 = vmatpush.bf16.msra.mxu1 %v1071_v29  ;;  %v267_v12 = vrot.slane %v266_v3, 2  ;;  %v292_v19 = vor.u32 %v291_v13, %v288_v11  ;;  %v285_v22 = vsel %vm1259_vm8, %v280_v15, %v284_v10  ;;  %v1092_v29 = vld [vmem:[%s1333_s1 + $0xc0] sm:$0xff]  ;;  %v573_v31 = vrot.slane %v1013_v25, 2  ;;  %v184_v36 = vld [vmem:[%s1187_s16 + $0x8] sm:$0x3] }
  0x1f   : > { %735 = vmatpush.bf16.msra.mxu3 %v1095_v34  ;;  %v259_v14 = vsel %vm1259_vm8, %v254_v8, %v258_v56  ;;  %323 = vst [vmem:[#allocation1 + $0x2] ss:$4 sm:$0xff] %v285_v22  ;;  %v183_v34 = vld [vmem:[%s1187_s16 + $0x4] sm:$0x3]  ;;  %v576_v38 = vrot.slane %v1016_v30, 2  ;;  %v585_v41 = vsel %vm214_vm0, %v1014_v27, %v574_v33  ;;  %v591_v42 = vsel %vm214_vm0, %v1015_v28, %v575_v35 }
  0x20   : > { %554 = vmatpush.bf16.msra.mxu2 %v1086_v44  ;;  %v272_v18 = vsel %vm1259_vm8, %v267_v12, %v271_v4  ;;  %317 = vst [vmem:[#allocation1] ss:$4 sm:$0xff] %v259_v14  ;;  %v293_v23 = vrot.slane %v292_v19, 2  ;;  %v185_v39 = vld [vmem:[%s1187_s16 + $0xc] sm:$0x3]  ;;  %v579_v40 = vsel %vm214_vm0, %v1013_v25, %v573_v31  ;;  %v580_v46 = vsel %vm218_vm1, %v1013_v25, %v573_v31 }
  0x21   : > { %382 = vmatpush.bf16.msra.mxu0 %v1078_v45  ;;  %320 = vst [vmem:[#allocation1 + $0x1] ss:$4 sm:$0xff] %v272_v18  ;;  %v597_v43 = vsel %vm214_vm0, %v1016_v30, %v576_v38  ;;  %v601_v44 = vshrl.u32 %v579_v40, 16  ;;  %v604_v45 = vshll.u32 %v579_v40, 16  ;;  %v614_v47 = vshrl.u32 %v585_v41, 16 }
  0x22   : > { %457 = vmatpush.bf16.msra.mxu1 %v1070_v50  ;;  %v298_v24 = vsel %vm1259_vm8, %v293_v23, %v297_v20  ;;  %v617_v48 = vshll.u32 %v585_v41, 16  ;;  %v586_v49 = vsel %vm218_vm1, %v1014_v27, %v574_v33  ;;  %v627_v50 = vshrl.u32 %v591_v42, 16  ;;  %v962_v60 = vld [vmem:[%s1187_s16 + $0x8] sm:$0x3]  ;;  %v964_v9 = vld [vmem:[%s1187_s16 + $0x10] sm:$0x3] }
  0x23   : > { %736 = vmatpush.bf16.msra.mxu3 %v1094_v55  ;;  %326 = vst [vmem:[#allocation1 + $0x3] ss:$4 sm:$0xff] %v298_v24  ;;  %v630_v51 = vshll.u32 %v591_v42, 16  ;;  %v592_v52 = vsel %vm218_vm1, %v1015_v28, %v575_v35  ;;  %v640_v53 = vshrl.u32 %v597_v43, 16  ;;  %v643_v54 = vshll.u32 %v597_v43, 16 }
  0x24   : > { %555 = vmatpush.bf16.msra.mxu2 %v1085_v0  ;;  %v961_v55 = vld [vmem:[%s1187_s16 + $0x4] sm:$0x3]  ;;  %v582_v56 = vrot.slane %v580_v46, 2  ;;  %v598_v57 = vsel %vm218_vm1, %v1016_v30, %v576_v38  ;;  %v603_v58 = vrot.slane %v601_v44, 6  ;;  %v606_v59 = vrot.slane %v604_v45, 7 }
  0x25   : > { %383 = vmatpush.bf16.msra.mxu0 %v1077_v1  ;;  %v588_v61 = vrot.slane %v586_v49, 2  ;;  %v616_v62 = vrot.slane %v614_v47, 6  ;;  %v619_v63 = vrot.slane %v617_v48, 7  ;;  %v963_v0 = vld [vmem:[%s1187_s16 + $0xc] sm:$0x3]  ;;  %v594_v1 = vrot.slane %v592_v52, 2 }
  0x26   : > { %458 = vmatpush.bf16.msra.mxu1 %v1069_v7  ;;  %v629_v3 = vrot.slane %v627_v50, 6  ;;  %v632_v4 = vrot.slane %v630_v51, 7  ;;  %v600_v6 = vrot.slane %v598_v57, 2  ;;  %v642_v7 = vrot.slane %v640_v53, 6  ;;  %s1067_s16 = sshll.u32 %s1343_s13, 3 }
  0x27   : > { %737 = vmatpush.bf16.msra.mxu3 %v1093_v26  ;;  %v645_v8 = vrot.slane %v643_v54, 7  ;;  %v607_v10 = vor.u32 %v606_v59, %v603_v58  ;;  %v610_v11 = vshll.u32 %v582_v56, 16  ;;  %v620_v12 = vor.u32 %v619_v63, %v616_v62  ;;  %s177_s8 = scalar_lea.vmem %s1334_s2, %s1067_s16 }
  0x28   : > { %556 = vmatpush.bf16.msra.mxu2 %v1084_v16  ;;  %v623_v13 = vshll.u32 %v588_v61, 16  ;;  %v633_v14 = vor.u32 %v632_v4, %v629_v3  ;;  %v636_v15 = vshll.u32 %v594_v1, 16 }
  0x29   : > { %384 = vmatpush.bf16.msra.mxu0 %v1076_v17  ;;  %v646_v16 = vor.u32 %v645_v8, %v642_v7  ;;  %v649_v17 = vshll.u32 %v600_v6, 16  ;;  %v608_v18 = vrot.slane %v607_v10, 2  ;;  %v612_v19 = vrot.slane %v610_v11, 7 }
  0x2a   : > { %459 = vmatpush.bf16.msra.mxu1 %v1068_v21  ;;  %v327_v37 = vld.sshfl [vmem:[#allocation1] sm:$0xff pattern:$0x73625140]  ;;  %v621_v20 = vrot.slane %v620_v12, 2  ;;  %v625_v21 = vrot.slane %v623_v13, 7  ;;  %v634_v22 = vrot.slane %v633_v14, 2 }
  0x2b   : > { %738 = vmatpush.bf16.msra.mxu3 %v1092_v29  ;;  %392 = vst [vmem:[#allocation1] ss:$4 sm:$0xff] %v182_v32  ;;  %v638_v23 = vrot.slane %v636_v15, 7  ;;  %v647_v24 = vrot.slane %v646_v16, 2  ;;  %v651_v25 = vrot.slane %v649_v17, 7  ;;  %v613_v26 = vsel %vm1259_vm8, %v608_v18, %v612_v19 }
  0x2c   : > { %385 = vmatmul.bf16.vlgmr.msra.gmra.mxu0 %v327_v37  ;;  %395 = vst [vmem:[#allocation1 + $0x1] ss:$4 sm:$0xff] %v183_v34  ;;  %v626_v27 = vsel %vm1259_vm8, %v621_v20, %v625_v21 }
  0x2d   : > { %398 = vst [vmem:[#allocation1 + $0x2] ss:$4 sm:$0xff] %v184_v36  ;;  %v639_v29 = vsel %vm1259_vm8, %v634_v22, %v638_v23  ;;  %v652_v30 = vsel %vm1259_vm8, %v647_v24, %v651_v25 }
  0x2e   : > { %401 = vst [vmem:[#allocation1 + $0x3] ss:$4 sm:$0xff] %v185_v39 }
  0x35   : > { %v402_v5 = vld.sshfl [vmem:[#allocation1] sm:$0xff pattern:$0x73625140] }
  0x36   : > { %489 = vst [vmem:[#allocation1] ss:$4 sm:$0xff] %v961_v55  ;;  %460 = vmatmul.bf16.vlgmr.msra.gmra.mxu1 %v402_v5 }
  0x37   : > { %492 = vst [vmem:[#allocation1 + $0x1] ss:$4 sm:$0xff] %v962_v60 }
  0x38   : > { %495 = vst [vmem:[#allocation1 + $0x2] ss:$4 sm:$0xff] %v963_v0 }
  0x39   : > { %498 = vst [vmem:[#allocation1 + $0x3] ss:$4 sm:$0xff] %v964_v9 }
  0x40   : > { %v499_v28 = vld.sshfl [vmem:[#allocation1] sm:$0xff pattern:$0x73625140] }
  0x41   : > { %557 = vmatmul.bf16.vlgmr.msra.gmra.mxu2 %v499_v28  ;;  %671 = vst [vmem:[#allocation1] ss:$4 sm:$0xff] %v613_v26 }
  0x42   : > { %674 = vst [vmem:[#allocation1 + $0x1] ss:$4 sm:$0xff] %v626_v27 }
  0x43   : > { %677 = vst [vmem:[#allocation1 + $0x2] ss:$4 sm:$0xff] %v639_v29 }
  0x44   : > { %680 = vst [vmem:[#allocation1 + $0x3] ss:$4 sm:$0xff] %v652_v30 }
  0x4b   : > { %v681_v31 = vld.sshfl [vmem:[#allocation1] sm:$0xff pattern:$0x73625140] }
  0x4c   : > { %739 = vmatmul.bf16.vlgmr.msra.gmra.mxu3 %v681_v31 }
  0xa9   : > { %v386_v32 = vpop.f32.mrf.mxu0 }
  0xb1   : > { %v388_v39 = vpop.f32.mrf.mxu0 }
  0xb3   : > { %v461_v33 = vpop.f32.mrf.mxu1 }
  0xb4   : > { %v462_v34 = vadd.f32 %v461_v33, %v386_v32 }
  0xbb   : > { %v463_v40 = vpop.f32.mrf.mxu1 }
  0xbc   : > { %v464_v43 = vadd.f32 %v463_v40, %v388_v39 }
  0xc4   : > { %v558_v35 = vpop.f32.mrf.mxu2 }
  0xc5   : > { %v563_v36 = vadd.f32 %v558_v35, %v462_v34 }
  0xcc   : > { %v560_v42 = vpop.f32.mrf.mxu2 }
  0xcd   : > { %v564_v45 = vadd.f32 %v560_v42, %v464_v43 }
  0xcf   : > { %v740_v37 = vpop.f32.mrf.mxu3 }
  0xd0   : > { %v745_v38 = vadd.f32 %v740_v37, %v563_v36 }
  0xd2   : > { %v773_v2 = vrot.slane %v745_v38, 4  ;;  %v777_v41 = vpack.c.bf16 %v745_v38, %v745_v38  ;;  %v759_v47 = vmul.f32 %v745_v38, %v745_v38  ;;  %v748_v49 = vsel %vm747_vm10, %v745_v38, 0.0 }
  0xd4   : > { %v778_v44 = vpack.c.bf16 %v773_v2, %v773_v2  ;;  %782 = vst.msk [vmem:[%s177_s8] sm:$0x3] %vm781_vm9, %v777_v41  ;;  %v761_v55 = vsel %vm747_vm10, %v759_v47, 0.0 }
  0xd6   : > { %783 = vst.msk [vmem:[%s177_s8 + $0x2] sm:$0x3] %vm781_vm9, %v778_v44 }
  0xd7   : > { %v742_v46 = vpop.f32.mrf.mxu3 }
  0xd8   : > { %v746_v48 = vadd.f32 %v742_v46, %v564_v45 }
  0xda   : > { %v749_v50 = vsel %vm747_vm10, %v746_v48, 0.0  ;;  %v760_v51 = vmul.f32 %v746_v48, %v746_v48  ;;  %v774_v52 = vrot.slane %v746_v48, 4  ;;  %v779_v53 = vpack.c.bf16 %v746_v48, %v746_v48 }
  0xdb   : > { %v750_v54 = vadd.f32 %v749_v50, %v748_v49 }
  0xdc   : > { %v762_v56 = vsel %vm747_vm10, %v760_v51, 0.0  ;;  %v780_v57 = vpack.c.bf16 %v774_v52, %v774_v52  ;;  %784 = vst.msk [vmem:[%s177_s8 + $0x4] sm:$0x3] %vm781_vm9, %v779_v53 }
  0xdd   : > { %v751_v58 = vrot.slane %v750_v54, 4  ;;  %v763_v59 = vadd.f32 %v762_v56, %v761_v55 }
  0xde   : > { %785 = vst.msk [vmem:[%s177_s8 + $0x6] sm:$0x3] %vm781_vm9, %v780_v57 }
  0xdf   : > { %v752_v60 = vadd.f32 %v751_v58, %v750_v54  ;;  %v764_v61 = vrot.slane %v763_v59, 4 }
  0xe1   : > { %v753_v62 = vrot.slane %v752_v60, 2  ;;  %v765_v63 = vadd.f32 %v764_v61, %v763_v59 }
  0xe3   : > { %v754_v0 = vadd.f32 %v753_v62, %v752_v60  ;;  %v766_v1 = vrot.slane %v765_v63, 2 }
  0xe5   : > { %v755_v3 = vrot.slane %v754_v0, 1  ;;  %v767_v4 = vadd.f32 %v766_v1, %v765_v63 }
  0xe7   : > { %v756_v5 = vadd.f32 %v755_v3, %v754_v0  ;;  %v768_v6 = vrot.slane %v767_v4, 1 }
  0xe9   : > { %758 = vst.msk [vmem:[%s181_s14] sm:$0x1] %vm757_vm11, %v756_v5  ;;  %v769_v7 = vadd.f32 %v768_v6, %v767_v4 }
  0xeb   : > { %770 = vst.msk [vmem:[%s181_s14 + $0x1] sm:$0x1] %vm757_vm11, %v769_v7 }
  0xec PF: > { %s14_s12 = sadd.s32 1, %s1115_s12  }
  0xed   : > { %p11_p4 = scmp.ge.s32.totalorder %s14_s12, 4  }
  0xef   :  { %13 = sbr.rel (!%p11_p4) target bundleno = 1 (0x1), region = 86 }

</bundles_post_ra>
